<compile_context>
chip_gen: v5e
topology: v5e:2x2
jax: 0.10.0
libtpu: 0.0.40
codegen_flags: <defaults>
</compile_context>

<pallas_src>
import functools

import numpy as np

import jax
import jax.numpy as jnp
from jax.experimental import pallas as pl
from jax.experimental.pallas import tpu as pltpu


# ----------------------------------------------------------------------------
# Fused Pallas kernel (whole DSBEM forward for one batch element per grid step)
# ----------------------------------------------------------------------------
def _dsbem_kernel(x_ref, mask_ref, w1_ref, b1_ref, w2_ref, b2_ref,
                  wte_ref, bte_ref, wsa1_ref, bsa1_ref, wsa2_ref, scal_ref,
                  out_ref, edge_ref, buf_ref, taps_ref, *, C, N, W, PAD, TQ):
    maskv = mask_ref[...]                               # (9, N) border-validity masks
    buf_ref[...] = jnp.zeros_like(buf_ref)              # zero the shift-buffer margins
    # (center is re-staged before every conv; margins must be zero every grid step,
    #  scratch state is per-core so "zero only at step 0" would be unsafe on megacore)

    def conv3x3(src, w_ref, b_ref):
        """3x3 conv (padding=1): src (C, N) -> (Cout, N) as ONE MXU matmul.

        The 9 border-masked taps are stacked into the (9*C, N) scratch so the whole
        conv is a single (Cout, 9C) @ (9C, N) dot; folded BN bias is added."""
        buf_ref[:, PAD:PAD + N] = src                   # stage into padded buffer
        bufv = buf_ref[...]
        k = 0
        for dy in (-1, 0, 1):
            for dx in (-1, 0, 1):
                off = dy * W + dx
                taps_ref[k * C:(k + 1) * C, :] = (
                    bufv[:, PAD + off:PAD + off + N] * maskv[k:k + 1, :])
                k += 1
        return jnp.dot(w_ref[...], taps_ref[...],
                       preferred_element_type=jnp.float32) + b_ref[...]

    x = x_ref[0]                                        # (C, N)
    feat = jnp.maximum(conv3x3(x, w1_ref, b1_ref), 0.0)       # relu(bn1(conv1(x)))
    feat = jnp.maximum(conv3x3(feat, w2_ref, b2_ref), 0.0)    # relu(bn2(conv2(.)))

    # texture_conv (+BN, relu) and edge_conv (sigmoid) merged into one conv on feat.
    te = conv3x3(feat, wte_ref, bte_ref)                # (C+1, N)
    tfeat = jnp.maximum(te[:C, :], 0.0)                 # relu(bn(texture_conv(feat)))
    edge_ref[0] = jax.nn.sigmoid(te[C:C + 1, :])        # sigmoid(edge_conv(feat))

    # --- TextureAttention (no-downsample path: N == H*W <= chunk_size) ---
    # F.normalize over channels at every spatial position.
    norm2 = jnp.sum(tfeat * tfeat, axis=0, keepdims=True)           # (1, N)
    tn = tfeat * jax.lax.rsqrt(jnp.maximum(norm2, 1e-24))           # (C, N)
    tn2 = tn + tn                      # fold 1/temperature (= 2.0) into the key side
    tnT = jnp.transpose(tn, (1, 0))                                  # (N, C) queries

    gamma = scal_ref[0]                                 # SMEM scalars
    bsa2 = scal_ref[1]
    wsa1 = wsa1_ref[...]
    bsa1 = bsa1_ref[...]
    wsa2 = wsa2_ref[...]

    for i0 in range(0, N, TQ):                          # row-tiled softmax attention
        sim = jnp.dot(tnT[i0:i0 + TQ, :], tn2,
                      preferred_element_type=jnp.float32)            # (TQ, N), /temp
        sim = sim - jnp.max(sim, axis=-1, keepdims=True)
        e = jnp.exp(sim)
        sm = e * pl.reciprocal(jnp.sum(e, axis=-1, keepdims=True), approx=True)
        # attended[c, i] = sum_j feat[c, j] * sm[i, j]
        att = jax.lax.dot_general(feat, sm, (((1,), (1,)), ((), ())),
                                  preferred_element_type=jnp.float32)   # (C, TQ)
        tex = feat[:, i0:i0 + TQ] + gamma * att         # TextureAttention output
        # spatial_attn: 1x1 conv -> BN(folded) -> relu -> 1x1 conv -> sigmoid
        h = jnp.maximum(
            jnp.dot(wsa1, tex, preferred_element_type=jnp.float32) + bsa1, 0.0)
        sa = jax.nn.sigmoid(
            jnp.dot(wsa2, h, preferred_element_type=jnp.float32) + bsa2)  # (1, TQ)
        out_ref[0, :, i0:i0 + TQ] = (tex * sa + tex).astype(out_ref.dtype)


# ----------------------------------------------------------------------------
# Wrapper
# ----------------------------------------------------------------------------
def _build_masks(H, W):
    """(9, H*W) validity masks for the 9 taps of a 3x3, padding=1 conv."""
    p = np.arange(H * W)
    h, w = p // W, p % W
    rows = []
    for dy in (-1, 0, 1):
        for dx in (-1, 0, 1):
            rows.append((h + dy >= 0) & (h + dy < H) & (w + dx >= 0) & (w + dx < W))
    return np.stack(rows, 0).astype(np.float32)


def _flatten_taps(w):
    """(9, Cout, Cin) per-tap conv weights -> (Cout, 9*Cin), matching tap stacking."""
    k, co, ci = w.shape
    return jnp.transpose(w, (1, 0, 2)).reshape(co, k * ci)


@jax.jit
def dsbem_forward(x_nchw, params):
    B, C, H, W = x_nchw.shape
    N = H * W
    PAD = W + 1                       # max |tap offset| in flattened-spatial indexing
    TQ = 128 if N % 128 == 0 else N   # query-row tile for the attention softmax

    x_flat = x_nchw.reshape(B, C, N).astype(jnp.float32)       # NCHW -> (B,C,N): free
    masks = jnp.asarray(_build_masks(H, W))                    # compile-time constant

    w1f = _flatten_taps(params["w1"])                          # (C, 9C)
    w2f = _flatten_taps(params["w2"])                          # (C, 9C)
    wtef = _flatten_taps(params["wte"])                        # (C+1, 9C)

    kernel = functools.partial(_dsbem_kernel, C=C, N=N, W=W, PAD=PAD, TQ=TQ)

    def bcast(shape):
        nd = len(shape)
        return pl.BlockSpec(shape, lambda b, _nd=nd: (0,) * _nd)

    in_specs = [
        pl.BlockSpec((1, C, N), lambda b: (b, 0, 0)),          # x
        bcast(masks.shape),                                    # border masks
        bcast(w1f.shape), bcast(params["b1"].shape),
        bcast(w2f.shape), bcast(params["b2"].shape),
        bcast(wtef.shape), bcast(params["bte"].shape),
        bcast(params["wsa1"].shape), bcast(params["bsa1"].shape),
        bcast(params["wsa2"].shape),
        pl.BlockSpec(memory_space=pltpu.MemorySpace.SMEM),     # [gamma, bsa2] scalars
    ]
    out_specs = (pl.BlockSpec((1, C, N), lambda b: (b, 0, 0)),
                 pl.BlockSpec((1, 1, N), lambda b: (b, 0, 0)))
    out_shape = (jax.ShapeDtypeStruct((B, C, N), jnp.float32),
                 jax.ShapeDtypeStruct((B, 1, N), jnp.float32))

    enhanced, edge = pl.pallas_call(
        kernel,
        out_shape=out_shape,
        grid=(B,),
        in_specs=in_specs,
        out_specs=out_specs,
        scratch_shapes=[pltpu.VMEM((C, N + 2 * PAD), jnp.float32),   # shift buffer
                        pltpu.VMEM((9 * C, N), jnp.float32)],        # stacked taps
        compiler_params=pltpu.CompilerParams(dimension_semantics=("parallel",)),
    )(x_flat, masks, w1f, params["b1"], w2f, params["b2"],
      wtef, params["bte"], params["wsa1"], params["bsa1"],
      params["wsa2"], params["scal"])

    # Lane-dense (C, N) kernel layout -> NCHW is a pure reshape (no transpose).
    return enhanced.reshape(B, C, H, W), edge.reshape(B, 1, H, W)


# ----------------------------------------------------------------------------
# Parameter init (eval-mode BatchNorm folded into the conv weights)
# ----------------------------------------------------------------------------
def init_params(key, C):
    Ch = max(C // 2, 1)
    it = iter(jax.random.split(key, 32))

    def bn_params(c):
        return (jax.random.uniform(next(it), (c,), jnp.float32, 0.8, 1.2),   # weight
                jax.random.normal(next(it), (c,), jnp.float32) * 0.05,       # bias
                jax.random.normal(next(it), (c,), jnp.float32) * 0.05,       # mean
                jax.random.uniform(next(it), (c,), jnp.float32, 0.5, 1.5))   # var

    def fold_conv(w, b, bnp, eps=1e-5):
        # w: (9, Cout, Cin) per-tap weights, b: (Cout,)
        g, beta, mean, var = bnp
        s = g * jax.lax.rsqrt(var + eps)
        return w * s[None, :, None], ((b - mean) * s + beta)[:, None]

    p = {}
    # conv1 + bn1
    w = jax.random.normal(next(it), (9, C, C), jnp.float32) * 0.1
    b = jax.random.normal(next(it), (C,), jnp.float32) * 0.01
    p["w1"], p["b1"] = fold_conv(w, b, bn_params(C))
    # conv2 + bn2
    w = jax.random.normal(next(it), (9, C, C), jnp.float32) * 0.1
    b = jax.random.normal(next(it), (C,), jnp.float32) * 0.01
    p["w2"], p["b2"] = fold_conv(w, b, bn_params(C))
    # texture_conv + bn (TextureAttention)  and  edge_conv (no BN), merged on Cout
    wt = jax.random.normal(next(it), (9, C, C), jnp.float32) * 0.1
    bt = jax.random.normal(next(it), (C,), jnp.float32) * 0.01
    wt, bt = fold_conv(wt, bt, bn_params(C))
    we = jax.random.normal(next(it), (9, 1, C), jnp.float32) * 0.1
    be = jax.random.normal(next(it), (1,), jnp.float32).reshape(1, 1) * 0.01
    p["wte"] = jnp.concatenate([wt, we], axis=1)        # (9, C+1, C)
    p["bte"] = jnp.concatenate([bt, be], axis=0)        # (C+1, 1)
    # spatial_attn: 1x1 conv (C -> C//2) + BN + ReLU, then 1x1 conv (C//2 -> 1)
    w = jax.random.normal(next(it), (Ch, C), jnp.float32) * 0.1
    b = jax.random.normal(next(it), (Ch,), jnp.float32) * 0.01
    g, beta, mean, var = bn_params(Ch)
    s = g * jax.lax.rsqrt(var + 1e-5)
    p["wsa1"] = w * s[:, None]
    p["bsa1"] = ((b - mean) * s + beta)[:, None]
    p["wsa2"] = jax.random.normal(next(it), (1, Ch), jnp.float32) * 0.1
    bsa2 = jax.random.normal(next(it), (), jnp.float32) * 0.01
    gamma = jnp.float32(0.0)          # matches nn.Parameter(torch.zeros(1)) init
    p["scal"] = jnp.stack([gamma, bsa2]).astype(jnp.float32)   # SMEM scalars
    return p


# ----------------------------------------------------------------------------
if __name__ == "__main__":
    key = jax.random.PRNGKey(0)
    k_x, k_p = jax.random.split(key)

    B, C, H, W = 2, 4, 16, 16
    x = jax.random.normal(k_x, (B, C, H, W), jnp.float32)
    params = init_params(k_p, C)

    enhanced, edge_map = dsbem_forward(x, params)
    jax.block_until_ready(enhanced)
    jax.block_until_ready(edge_map)

    assert enhanced.shape == (B, C, H, W)
    assert edge_map.shape == (B, 1, H, W)
    assert bool(jnp.isfinite(enhanced).all())
    assert bool(jnp.isfinite(edge_map).all())
    print("KERNEL_OK")
</pallas_src>

<mosaic_0001>
module attributes {stable_mosaic.version = 11 : i64} {
  func.func @_dsbem_kernel(%arg0: i32, %arg1: memref<1x4x256xf32, #tpu.memory_space<vmem>>, %arg2: memref<9x256xf32, #tpu.memory_space<vmem>>, %arg3: memref<4x36xf32, #tpu.memory_space<vmem>>, %arg4: memref<4x1xf32, #tpu.memory_space<vmem>>, %arg5: memref<4x36xf32, #tpu.memory_space<vmem>>, %arg6: memref<4x1xf32, #tpu.memory_space<vmem>>, %arg7: memref<5x36xf32, #tpu.memory_space<vmem>>, %arg8: memref<5x1xf32, #tpu.memory_space<vmem>>, %arg9: memref<2x4xf32, #tpu.memory_space<vmem>>, %arg10: memref<2x1xf32, #tpu.memory_space<vmem>>, %arg11: memref<1x2xf32, #tpu.memory_space<vmem>>, %arg12: memref<2xf32, #tpu.memory_space<smem>>, %arg13: memref<1x4x256xf32, #tpu.memory_space<vmem>>, %arg14: memref<1x1x256xf32, #tpu.memory_space<vmem>>, %arg15: memref<4x290xf32, #tpu.memory_space<vmem>>, %arg16: memref<36x256xf32, #tpu.memory_space<vmem>>) attributes {dimension_semantics = [#tpu.dimension_semantics<parallel>], iteration_bounds = array<i64: 2>, scalar_prefetch = 0 : i64, scratch_operands = 2 : i64, tpu.core_type = #tpu.core_type<tc>, window_params = [{transform_indices = @transform_0, window_bounds = array<i64: 1, 4, 256>}, {pipeline_mode = #tpu.pipeline_mode<synchronous>, transform_indices = @transform_1, window_bounds = array<i64: 9, 256>}, {pipeline_mode = #tpu.pipeline_mode<synchronous>, transform_indices = @transform_2, window_bounds = array<i64: 4, 36>}, {pipeline_mode = #tpu.pipeline_mode<synchronous>, transform_indices = @transform_3, window_bounds = array<i64: 4, 1>}, {pipeline_mode = #tpu.pipeline_mode<synchronous>, transform_indices = @transform_4, window_bounds = array<i64: 4, 36>}, {pipeline_mode = #tpu.pipeline_mode<synchronous>, transform_indices = @transform_5, window_bounds = array<i64: 4, 1>}, {pipeline_mode = #tpu.pipeline_mode<synchronous>, transform_indices = @transform_6, window_bounds = array<i64: 5, 36>}, {pipeline_mode = #tpu.pipeline_mode<synchronous>, transform_indices = @transform_7, window_bounds = array<i64: 5, 1>}, {pipeline_mode = #tpu.pipeline_mode<synchronous>, transform_indices = @transform_8, window_bounds = array<i64: 2, 4>}, {pipeline_mode = #tpu.pipeline_mode<synchronous>, transform_indices = @transform_9, window_bounds = array<i64: 2, 1>}, {pipeline_mode = #tpu.pipeline_mode<synchronous>, transform_indices = @transform_10, window_bounds = array<i64: 1, 2>}, {transform_indices = @transform_11, window_bounds = array<i64: 2>}, {transform_indices = @transform_12, window_bounds = array<i64: 1, 4, 256>}, {transform_indices = @transform_13, window_bounds = array<i64: 1, 1, 256>}]} {
    %c0 = arith.constant 0 : index
    %c0_0 = arith.constant 0 : index
    %0 = vector.load %arg2[%c0, %c0_0] : memref<9x256xf32, #tpu.memory_space<vmem>>, vector<9x256xf32>
    %cst = arith.constant 0.000000e+00 : f32
    %1 = vector.broadcast %cst : f32 to vector<4x290xf32>
    %c0_1 = arith.constant 0 : index
    %c0_2 = arith.constant 0 : index
    %2 = vector.load %arg15[%c0_1, %c0_2] : memref<4x290xf32, #tpu.memory_space<vmem>>, vector<4x290xf32>
    tpu.vector_store %arg15[%c0_1, %c0_2], %1 {strides = array<i32>} : memref<4x290xf32, #tpu.memory_space<vmem>>, vector<4x290xf32>,
    %c0_3 = arith.constant 0 : index
    %c0_4 = arith.constant 0 : index
    %c0_5 = arith.constant 0 : index
    %3 = vector.load %arg1[%c0_3, %c0_4, %c0_5] : memref<1x4x256xf32, #tpu.memory_space<vmem>>, vector<1x4x256xf32>
    %4 = vector.shape_cast %3 : vector<1x4x256xf32> to vector<4x256xf32>
    %c0_6 = arith.constant 0 : index
    %c17 = arith.constant 17 : index
    %5 = vector.load %arg15[%c0_6, %c17] : memref<4x290xf32, #tpu.memory_space<vmem>>, vector<4x256xf32>
    tpu.vector_store %arg15[%c0_6, %c17], %4 {strides = array<i32>} : memref<4x290xf32, #tpu.memory_space<vmem>>, vector<4x256xf32>,
    %c0_7 = arith.constant 0 : index
    %c0_8 = arith.constant 0 : index
    %6 = vector.load %arg15[%c0_7, %c0_8] : memref<4x290xf32, #tpu.memory_space<vmem>>, vector<4x290xf32>
    %7 = vector.extract_strided_slice %6 {offsets = [0, 0], sizes = [4, 256], strides = [1, 1]} : vector<4x290xf32> to vector<4x256xf32>
    %8 = vector.extract_strided_slice %0 {offsets = [0, 0], sizes = [1, 256], strides = [1, 1]} : vector<9x256xf32> to vector<1x256xf32>
    %9 = vector.broadcast %8 : vector<1x256xf32> to vector<4x256xf32>
    %10 = arith.mulf %7, %9 : vector<4x256xf32>
    %c0_9 = arith.constant 0 : index
    %c0_10 = arith.constant 0 : index
    %11 = vector.load %arg16[%c0_9, %c0_10] : memref<36x256xf32, #tpu.memory_space<vmem>>, vector<4x256xf32>
    tpu.vector_store %arg16[%c0_9, %c0_10], %10 {strides = array<i32>} : memref<36x256xf32, #tpu.memory_space<vmem>>, vector<4x256xf32>,
    %12 = vector.extract_strided_slice %6 {offsets = [0, 1], sizes = [4, 256], strides = [1, 1]} : vector<4x290xf32> to vector<4x256xf32>
    %13 = vector.extract_strided_slice %0 {offsets = [1, 0], sizes = [1, 256], strides = [1, 1]} : vector<9x256xf32> to vector<1x256xf32>
    %14 = vector.broadcast %13 : vector<1x256xf32> to vector<4x256xf32>
    %15 = arith.mulf %12, %14 : vector<4x256xf32>
    %c4 = arith.constant 4 : index
    %c0_11 = arith.constant 0 : index
    %16 = vector.load %arg16[%c4, %c0_11] : memref<36x256xf32, #tpu.memory_space<vmem>>, vector<4x256xf32>
    tpu.vector_store %arg16[%c4, %c0_11], %15 {strides = array<i32>} : memref<36x256xf32, #tpu.memory_space<vmem>>, vector<4x256xf32>,
    %17 = vector.extract_strided_slice %6 {offsets = [0, 2], sizes = [4, 256], strides = [1, 1]} : vector<4x290xf32> to vector<4x256xf32>
    %18 = vector.extract_strided_slice %0 {offsets = [2, 0], sizes = [1, 256], strides = [1, 1]} : vector<9x256xf32> to vector<1x256xf32>
    %19 = vector.broadcast %18 : vector<1x256xf32> to vector<4x256xf32>
    %20 = arith.mulf %17, %19 : vector<4x256xf32>
    %c8 = arith.constant 8 : index
    %c0_12 = arith.constant 0 : index
    %21 = vector.load %arg16[%c8, %c0_12] : memref<36x256xf32, #tpu.memory_space<vmem>>, vector<4x256xf32>
    tpu.vector_store %arg16[%c8, %c0_12], %20 {strides = array<i32>} : memref<36x256xf32, #tpu.memory_space<vmem>>, vector<4x256xf32>,
    %22 = vector.extract_strided_slice %6 {offsets = [0, 16], sizes = [4, 256], strides = [1, 1]} : vector<4x290xf32> to vector<4x256xf32>
    %23 = vector.extract_strided_slice %0 {offsets = [3, 0], sizes = [1, 256], strides = [1, 1]} : vector<9x256xf32> to vector<1x256xf32>
    %24 = vector.broadcast %23 : vector<1x256xf32> to vector<4x256xf32>
    %25 = arith.mulf %22, %24 : vector<4x256xf32>
    %c12 = arith.constant 12 : index
    %c0_13 = arith.constant 0 : index
    %26 = vector.load %arg16[%c12, %c0_13] : memref<36x256xf32, #tpu.memory_space<vmem>>, vector<4x256xf32>
    tpu.vector_store %arg16[%c12, %c0_13], %25 {strides = array<i32>} : memref<36x256xf32, #tpu.memory_space<vmem>>, vector<4x256xf32>,
    %27 = vector.extract_strided_slice %6 {offsets = [0, 17], sizes = [4, 256], strides = [1, 1]} : vector<4x290xf32> to vector<4x256xf32>
    %28 = vector.extract_strided_slice %0 {offsets = [4, 0], sizes = [1, 256], strides = [1, 1]} : vector<9x256xf32> to vector<1x256xf32>
    %29 = vector.broadcast %28 : vector<1x256xf32> to vector<4x256xf32>
    %30 = arith.mulf %27, %29 : vector<4x256xf32>
    %c16 = arith.constant 16 : index
    %c0_14 = arith.constant 0 : index
    %31 = vector.load %arg16[%c16, %c0_14] : memref<36x256xf32, #tpu.memory_space<vmem>>, vector<4x256xf32>
    tpu.vector_store %arg16[%c16, %c0_14], %30 {strides = array<i32>} : memref<36x256xf32, #tpu.memory_space<vmem>>, vector<4x256xf32>,
    %32 = vector.extract_strided_slice %6 {offsets = [0, 18], sizes = [4, 256], strides = [1, 1]} : vector<4x290xf32> to vector<4x256xf32>
    %33 = vector.extract_strided_slice %0 {offsets = [5, 0], sizes = [1, 256], strides = [1, 1]} : vector<9x256xf32> to vector<1x256xf32>
    %34 = vector.broadcast %33 : vector<1x256xf32> to vector<4x256xf32>
    %35 = arith.mulf %32, %34 : vector<4x256xf32>
    %c20 = arith.constant 20 : index
    %c0_15 = arith.constant 0 : index
    %36 = vector.load %arg16[%c20, %c0_15] : memref<36x256xf32, #tpu.memory_space<vmem>>, vector<4x256xf32>
    tpu.vector_store %arg16[%c20, %c0_15], %35 {strides = array<i32>} : memref<36x256xf32, #tpu.memory_space<vmem>>, vector<4x256xf32>,
    %37 = vector.extract_strided_slice %6 {offsets = [0, 32], sizes = [4, 256], strides = [1, 1]} : vector<4x290xf32> to vector<4x256xf32>
    %38 = vector.extract_strided_slice %0 {offsets = [6, 0], sizes = [1, 256], strides = [1, 1]} : vector<9x256xf32> to vector<1x256xf32>
    %39 = vector.broadcast %38 : vector<1x256xf32> to vector<4x256xf32>
    %40 = arith.mulf %37, %39 : vector<4x256xf32>
    %c24 = arith.constant 24 : index
    %c0_16 = arith.constant 0 : index
    %41 = vector.load %arg16[%c24, %c0_16] : memref<36x256xf32, #tpu.memory_space<vmem>>, vector<4x256xf32>
    tpu.vector_store %arg16[%c24, %c0_16], %40 {strides = array<i32>} : memref<36x256xf32, #tpu.memory_space<vmem>>, vector<4x256xf32>,
    %42 = vector.extract_strided_slice %6 {offsets = [0, 33], sizes = [4, 256], strides = [1, 1]} : vector<4x290xf32> to vector<4x256xf32>
    %43 = vector.extract_strided_slice %0 {offsets = [7, 0], sizes = [1, 256], strides = [1, 1]} : vector<9x256xf32> to vector<1x256xf32>
    %44 = vector.broadcast %43 : vector<1x256xf32> to vector<4x256xf32>
    %45 = arith.mulf %42, %44 : vector<4x256xf32>
    %c28 = arith.constant 28 : index
    %c0_17 = arith.constant 0 : index
    %46 = vector.load %arg16[%c28, %c0_17] : memref<36x256xf32, #tpu.memory_space<vmem>>, vector<4x256xf32>
    tpu.vector_store %arg16[%c28, %c0_17], %45 {strides = array<i32>} : memref<36x256xf32, #tpu.memory_space<vmem>>, vector<4x256xf32>,
    %47 = vector.extract_strided_slice %6 {offsets = [0, 34], sizes = [4, 256], strides = [1, 1]} : vector<4x290xf32> to vector<4x256xf32>
    %48 = vector.extract_strided_slice %0 {offsets = [8, 0], sizes = [1, 256], strides = [1, 1]} : vector<9x256xf32> to vector<1x256xf32>
    %49 = vector.broadcast %48 : vector<1x256xf32> to vector<4x256xf32>
    %50 = arith.mulf %47, %49 : vector<4x256xf32>
    %c32 = arith.constant 32 : index
    %c0_18 = arith.constant 0 : index
    %51 = vector.load %arg16[%c32, %c0_18] : memref<36x256xf32, #tpu.memory_space<vmem>>, vector<4x256xf32>
    tpu.vector_store %arg16[%c32, %c0_18], %50 {strides = array<i32>} : memref<36x256xf32, #tpu.memory_space<vmem>>, vector<4x256xf32>,
    %c0_19 = arith.constant 0 : index
    %c0_20 = arith.constant 0 : index
    %52 = vector.load %arg3[%c0_19, %c0_20] : memref<4x36xf32, #tpu.memory_space<vmem>>, vector<4x36xf32>
    %c0_21 = arith.constant 0 : index
    %c0_22 = arith.constant 0 : index
    %53 = vector.load %arg16[%c0_21, %c0_22] : memref<36x256xf32, #tpu.memory_space<vmem>>, vector<36x256xf32>
    %cst_23 = arith.constant dense<0.000000e+00> : vector<4x256xf32>
    %54 = tpu.matmul %52, %53, %cst_23 {dimension_numbers = #tpu.dot_dimension_numbers<[1], [0], [0], [1], [0, 0, 1, 1], [], []>} : vector<4x36xf32>, vector<36x256xf32>, vector<4x256xf32> -> vector<4x256xf32>
    %c0_24 = arith.constant 0 : index
    %c0_25 = arith.constant 0 : index
    %55 = vector.load %arg4[%c0_24, %c0_25] : memref<4x1xf32, #tpu.memory_space<vmem>>, vector<4x1xf32>
    %56 = vector.broadcast %55 : vector<4x1xf32> to vector<4x256xf32>
    %57 = arith.addf %54, %56 : vector<4x256xf32>
    %cst_26 = arith.constant 0.000000e+00 : f32
    %58 = vector.broadcast %cst_26 : f32 to vector<4x256xf32>
    %59 = arith.maximumf %57, %58 : vector<4x256xf32>
    %c0_27 = arith.constant 0 : index
    %c17_28 = arith.constant 17 : index
    %60 = vector.load %arg15[%c0_27, %c17_28] : memref<4x290xf32, #tpu.memory_space<vmem>>, vector<4x256xf32>
    tpu.vector_store %arg15[%c0_27, %c17_28], %59 {strides = array<i32>} : memref<4x290xf32, #tpu.memory_space<vmem>>, vector<4x256xf32>,
    %c0_29 = arith.constant 0 : index
    %c0_30 = arith.constant 0 : index
    %61 = vector.load %arg15[%c0_29, %c0_30] : memref<4x290xf32, #tpu.memory_space<vmem>>, vector<4x290xf32>
    %62 = vector.extract_strided_slice %61 {offsets = [0, 0], sizes = [4, 256], strides = [1, 1]} : vector<4x290xf32> to vector<4x256xf32>
    %63 = vector.extract_strided_slice %0 {offsets = [0, 0], sizes = [1, 256], strides = [1, 1]} : vector<9x256xf32> to vector<1x256xf32>
    %64 = vector.broadcast %63 : vector<1x256xf32> to vector<4x256xf32>
    %65 = arith.mulf %62, %64 : vector<4x256xf32>
    %c0_31 = arith.constant 0 : index
    %c0_32 = arith.constant 0 : index
    %66 = vector.load %arg16[%c0_31, %c0_32] : memref<36x256xf32, #tpu.memory_space<vmem>>, vector<4x256xf32>
    tpu.vector_store %arg16[%c0_31, %c0_32], %65 {strides = array<i32>} : memref<36x256xf32, #tpu.memory_space<vmem>>, vector<4x256xf32>,
    %67 = vector.extract_strided_slice %61 {offsets = [0, 1], sizes = [4, 256], strides = [1, 1]} : vector<4x290xf32> to vector<4x256xf32>
    %68 = vector.extract_strided_slice %0 {offsets = [1, 0], sizes = [1, 256], strides = [1, 1]} : vector<9x256xf32> to vector<1x256xf32>
    %69 = vector.broadcast %68 : vector<1x256xf32> to vector<4x256xf32>
    %70 = arith.mulf %67, %69 : vector<4x256xf32>
    %c4_33 = arith.constant 4 : index
    %c0_34 = arith.constant 0 : index
    %71 = vector.load %arg16[%c4_33, %c0_34] : memref<36x256xf32, #tpu.memory_space<vmem>>, vector<4x256xf32>
    tpu.vector_store %arg16[%c4_33, %c0_34], %70 {strides = array<i32>} : memref<36x256xf32, #tpu.memory_space<vmem>>, vector<4x256xf32>,
    %72 = vector.extract_strided_slice %61 {offsets = [0, 2], sizes = [4, 256], strides = [1, 1]} : vector<4x290xf32> to vector<4x256xf32>
    %73 = vector.extract_strided_slice %0 {offsets = [2, 0], sizes = [1, 256], strides = [1, 1]} : vector<9x256xf32> to vector<1x256xf32>
    %74 = vector.broadcast %73 : vector<1x256xf32> to vector<4x256xf32>
    %75 = arith.mulf %72, %74 : vector<4x256xf32>
    %c8_35 = arith.constant 8 : index
    %c0_36 = arith.constant 0 : index
    %76 = vector.load %arg16[%c8_35, %c0_36] : memref<36x256xf32, #tpu.memory_space<vmem>>, vector<4x256xf32>
    tpu.vector_store %arg16[%c8_35, %c0_36], %75 {strides = array<i32>} : memref<36x256xf32, #tpu.memory_space<vmem>>, vector<4x256xf32>,
    %77 = vector.extract_strided_slice %61 {offsets = [0, 16], sizes = [4, 256], strides = [1, 1]} : vector<4x290xf32> to vector<4x256xf32>
    %78 = vector.extract_strided_slice %0 {offsets = [3, 0], sizes = [1, 256], strides = [1, 1]} : vector<9x256xf32> to vector<1x256xf32>
    %79 = vector.broadcast %78 : vector<1x256xf32> to vector<4x256xf32>
    %80 = arith.mulf %77, %79 : vector<4x256xf32>
    %c12_37 = arith.constant 12 : index
    %c0_38 = arith.constant 0 : index
    %81 = vector.load %arg16[%c12_37, %c0_38] : memref<36x256xf32, #tpu.memory_space<vmem>>, vector<4x256xf32>
    tpu.vector_store %arg16[%c12_37, %c0_38], %80 {strides = array<i32>} : memref<36x256xf32, #tpu.memory_space<vmem>>, vector<4x256xf32>,
    %82 = vector.extract_strided_slice %61 {offsets = [0, 17], sizes = [4, 256], strides = [1, 1]} : vector<4x290xf32> to vector<4x256xf32>
    %83 = vector.extract_strided_slice %0 {offsets = [4, 0], sizes = [1, 256], strides = [1, 1]} : vector<9x256xf32> to vector<1x256xf32>
    %84 = vector.broadcast %83 : vector<1x256xf32> to vector<4x256xf32>
    %85 = arith.mulf %82, %84 : vector<4x256xf32>
    %c16_39 = arith.constant 16 : index
    %c0_40 = arith.constant 0 : index
    %86 = vector.load %arg16[%c16_39, %c0_40] : memref<36x256xf32, #tpu.memory_space<vmem>>, vector<4x256xf32>
    tpu.vector_store %arg16[%c16_39, %c0_40], %85 {strides = array<i32>} : memref<36x256xf32, #tpu.memory_space<vmem>>, vector<4x256xf32>,
    %87 = vector.extract_strided_slice %61 {offsets = [0, 18], sizes = [4, 256], strides = [1, 1]} : vector<4x290xf32> to vector<4x256xf32>
    %88 = vector.extract_strided_slice %0 {offsets = [5, 0], sizes = [1, 256], strides = [1, 1]} : vector<9x256xf32> to vector<1x256xf32>
    %89 = vector.broadcast %88 : vector<1x256xf32> to vector<4x256xf32>
    %90 = arith.mulf %87, %89 : vector<4x256xf32>
    %c20_41 = arith.constant 20 : index
    %c0_42 = arith.constant 0 : index
    %91 = vector.load %arg16[%c20_41, %c0_42] : memref<36x256xf32, #tpu.memory_space<vmem>>, vector<4x256xf32>
    tpu.vector_store %arg16[%c20_41, %c0_42], %90 {strides = array<i32>} : memref<36x256xf32, #tpu.memory_space<vmem>>, vector<4x256xf32>,
    %92 = vector.extract_strided_slice %61 {offsets = [0, 32], sizes = [4, 256], strides = [1, 1]} : vector<4x290xf32> to vector<4x256xf32>
    %93 = vector.extract_strided_slice %0 {offsets = [6, 0], sizes = [1, 256], strides = [1, 1]} : vector<9x256xf32> to vector<1x256xf32>
    %94 = vector.broadcast %93 : vector<1x256xf32> to vector<4x256xf32>
    %95 = arith.mulf %92, %94 : vector<4x256xf32>
    %c24_43 = arith.constant 24 : index
    %c0_44 = arith.constant 0 : index
    %96 = vector.load %arg16[%c24_43, %c0_44] : memref<36x256xf32, #tpu.memory_space<vmem>>, vector<4x256xf32>
    tpu.vector_store %arg16[%c24_43, %c0_44], %95 {strides = array<i32>} : memref<36x256xf32, #tpu.memory_space<vmem>>, vector<4x256xf32>,
    %97 = vector.extract_strided_slice %61 {offsets = [0, 33], sizes = [4, 256], strides = [1, 1]} : vector<4x290xf32> to vector<4x256xf32>
    %98 = vector.extract_strided_slice %0 {offsets = [7, 0], sizes = [1, 256], strides = [1, 1]} : vector<9x256xf32> to vector<1x256xf32>
    %99 = vector.broadcast %98 : vector<1x256xf32> to vector<4x256xf32>
    %100 = arith.mulf %97, %99 : vector<4x256xf32>
    %c28_45 = arith.constant 28 : index
    %c0_46 = arith.constant 0 : index
    %101 = vector.load %arg16[%c28_45, %c0_46] : memref<36x256xf32, #tpu.memory_space<vmem>>, vector<4x256xf32>
    tpu.vector_store %arg16[%c28_45, %c0_46], %100 {strides = array<i32>} : memref<36x256xf32, #tpu.memory_space<vmem>>, vector<4x256xf32>,
    %102 = vector.extract_strided_slice %61 {offsets = [0, 34], sizes = [4, 256], strides = [1, 1]} : vector<4x290xf32> to vector<4x256xf32>
    %103 = vector.extract_strided_slice %0 {offsets = [8, 0], sizes = [1, 256], strides = [1, 1]} : vector<9x256xf32> to vector<1x256xf32>
    %104 = vector.broadcast %103 : vector<1x256xf32> to vector<4x256xf32>
    %105 = arith.mulf %102, %104 : vector<4x256xf32>
    %c32_47 = arith.constant 32 : index
    %c0_48 = arith.constant 0 : index
    %106 = vector.load %arg16[%c32_47, %c0_48] : memref<36x256xf32, #tpu.memory_space<vmem>>, vector<4x256xf32>
    tpu.vector_store %arg16[%c32_47, %c0_48], %105 {strides = array<i32>} : memref<36x256xf32, #tpu.memory_space<vmem>>, vector<4x256xf32>,
    %c0_49 = arith.constant 0 : index
    %c0_50 = arith.constant 0 : index
    %107 = vector.load %arg5[%c0_49, %c0_50] : memref<4x36xf32, #tpu.memory_space<vmem>>, vector<4x36xf32>
    %c0_51 = arith.constant 0 : index
    %c0_52 = arith.constant 0 : index
    %108 = vector.load %arg16[%c0_51, %c0_52] : memref<36x256xf32, #tpu.memory_space<vmem>>, vector<36x256xf32>
    %cst_53 = arith.constant dense<0.000000e+00> : vector<4x256xf32>
    %109 = tpu.matmul %107, %108, %cst_53 {dimension_numbers = #tpu.dot_dimension_numbers<[1], [0], [0], [1], [0, 0, 1, 1], [], []>} : vector<4x36xf32>, vector<36x256xf32>, vector<4x256xf32> -> vector<4x256xf32>
    %c0_54 = arith.constant 0 : index
    %c0_55 = arith.constant 0 : index
    %110 = vector.load %arg6[%c0_54, %c0_55] : memref<4x1xf32, #tpu.memory_space<vmem>>, vector<4x1xf32>
    %111 = vector.broadcast %110 : vector<4x1xf32> to vector<4x256xf32>
    %112 = arith.addf %109, %111 : vector<4x256xf32>
    %cst_56 = arith.constant 0.000000e+00 : f32
    %113 = vector.broadcast %cst_56 : f32 to vector<4x256xf32>
    %114 = arith.maximumf %112, %113 : vector<4x256xf32>
    %c0_57 = arith.constant 0 : index
    %c17_58 = arith.constant 17 : index
    %115 = vector.load %arg15[%c0_57, %c17_58] : memref<4x290xf32, #tpu.memory_space<vmem>>, vector<4x256xf32>
    tpu.vector_store %arg15[%c0_57, %c17_58], %114 {strides = array<i32>} : memref<4x290xf32, #tpu.memory_space<vmem>>, vector<4x256xf32>,
    %c0_59 = arith.constant 0 : index
    %c0_60 = arith.constant 0 : index
    %116 = vector.load %arg15[%c0_59, %c0_60] : memref<4x290xf32, #tpu.memory_space<vmem>>, vector<4x290xf32>
    %117 = vector.extract_strided_slice %116 {offsets = [0, 0], sizes = [4, 256], strides = [1, 1]} : vector<4x290xf32> to vector<4x256xf32>
    %118 = vector.extract_strided_slice %0 {offsets = [0, 0], sizes = [1, 256], strides = [1, 1]} : vector<9x256xf32> to vector<1x256xf32>
    %119 = vector.broadcast %118 : vector<1x256xf32> to vector<4x256xf32>
    %120 = arith.mulf %117, %119 : vector<4x256xf32>
    %c0_61 = arith.constant 0 : index
    %c0_62 = arith.constant 0 : index
    %121 = vector.load %arg16[%c0_61, %c0_62] : memref<36x256xf32, #tpu.memory_space<vmem>>, vector<4x256xf32>
    tpu.vector_store %arg16[%c0_61, %c0_62], %120 {strides = array<i32>} : memref<36x256xf32, #tpu.memory_space<vmem>>, vector<4x256xf32>,
    %122 = vector.extract_strided_slice %116 {offsets = [0, 1], sizes = [4, 256], strides = [1, 1]} : vector<4x290xf32> to vector<4x256xf32>
    %123 = vector.extract_strided_slice %0 {offsets = [1, 0], sizes = [1, 256], strides = [1, 1]} : vector<9x256xf32> to vector<1x256xf32>
    %124 = vector.broadcast %123 : vector<1x256xf32> to vector<4x256xf32>
    %125 = arith.mulf %122, %124 : vector<4x256xf32>
    %c4_63 = arith.constant 4 : index
    %c0_64 = arith.constant 0 : index
    %126 = vector.load %arg16[%c4_63, %c0_64] : memref<36x256xf32, #tpu.memory_space<vmem>>, vector<4x256xf32>
    tpu.vector_store %arg16[%c4_63, %c0_64], %125 {strides = array<i32>} : memref<36x256xf32, #tpu.memory_space<vmem>>, vector<4x256xf32>,
    %127 = vector.extract_strided_slice %116 {offsets = [0, 2], sizes = [4, 256], strides = [1, 1]} : vector<4x290xf32> to vector<4x256xf32>
    %128 = vector.extract_strided_slice %0 {offsets = [2, 0], sizes = [1, 256], strides = [1, 1]} : vector<9x256xf32> to vector<1x256xf32>
    %129 = vector.broadcast %128 : vector<1x256xf32> to vector<4x256xf32>
    %130 = arith.mulf %127, %129 : vector<4x256xf32>
    %c8_65 = arith.constant 8 : index
    %c0_66 = arith.constant 0 : index
    %131 = vector.load %arg16[%c8_65, %c0_66] : memref<36x256xf32, #tpu.memory_space<vmem>>, vector<4x256xf32>
    tpu.vector_store %arg16[%c8_65, %c0_66], %130 {strides = array<i32>} : memref<36x256xf32, #tpu.memory_space<vmem>>, vector<4x256xf32>,
    %132 = vector.extract_strided_slice %116 {offsets = [0, 16], sizes = [4, 256], strides = [1, 1]} : vector<4x290xf32> to vector<4x256xf32>
    %133 = vector.extract_strided_slice %0 {offsets = [3, 0], sizes = [1, 256], strides = [1, 1]} : vector<9x256xf32> to vector<1x256xf32>
    %134 = vector.broadcast %133 : vector<1x256xf32> to vector<4x256xf32>
    %135 = arith.mulf %132, %134 : vector<4x256xf32>
    %c12_67 = arith.constant 12 : index
    %c0_68 = arith.constant 0 : index
    %136 = vector.load %arg16[%c12_67, %c0_68] : memref<36x256xf32, #tpu.memory_space<vmem>>, vector<4x256xf32>
    tpu.vector_store %arg16[%c12_67, %c0_68], %135 {strides = array<i32>} : memref<36x256xf32, #tpu.memory_space<vmem>>, vector<4x256xf32>,
    %137 = vector.extract_strided_slice %116 {offsets = [0, 17], sizes = [4, 256], strides = [1, 1]} : vector<4x290xf32> to vector<4x256xf32>
    %138 = vector.extract_strided_slice %0 {offsets = [4, 0], sizes = [1, 256], strides = [1, 1]} : vector<9x256xf32> to vector<1x256xf32>
    %139 = vector.broadcast %138 : vector<1x256xf32> to vector<4x256xf32>
    %140 = arith.mulf %137, %139 : vector<4x256xf32>
    %c16_69 = arith.constant 16 : index
    %c0_70 = arith.constant 0 : index
    %141 = vector.load %arg16[%c16_69, %c0_70] : memref<36x256xf32, #tpu.memory_space<vmem>>, vector<4x256xf32>
    tpu.vector_store %arg16[%c16_69, %c0_70], %140 {strides = array<i32>} : memref<36x256xf32, #tpu.memory_space<vmem>>, vector<4x256xf32>,
    %142 = vector.extract_strided_slice %116 {offsets = [0, 18], sizes = [4, 256], strides = [1, 1]} : vector<4x290xf32> to vector<4x256xf32>
    %143 = vector.extract_strided_slice %0 {offsets = [5, 0], sizes = [1, 256], strides = [1, 1]} : vector<9x256xf32> to vector<1x256xf32>
    %144 = vector.broadcast %143 : vector<1x256xf32> to vector<4x256xf32>
    %145 = arith.mulf %142, %144 : vector<4x256xf32>
    %c20_71 = arith.constant 20 : index
    %c0_72 = arith.constant 0 : index
    %146 = vector.load %arg16[%c20_71, %c0_72] : memref<36x256xf32, #tpu.memory_space<vmem>>, vector<4x256xf32>
    tpu.vector_store %arg16[%c20_71, %c0_72], %145 {strides = array<i32>} : memref<36x256xf32, #tpu.memory_space<vmem>>, vector<4x256xf32>,
    %147 = vector.extract_strided_slice %116 {offsets = [0, 32], sizes = [4, 256], strides = [1, 1]} : vector<4x290xf32> to vector<4x256xf32>
    %148 = vector.extract_strided_slice %0 {offsets = [6, 0], sizes = [1, 256], strides = [1, 1]} : vector<9x256xf32> to vector<1x256xf32>
    %149 = vector.broadcast %148 : vector<1x256xf32> to vector<4x256xf32>
    %150 = arith.mulf %147, %149 : vector<4x256xf32>
    %c24_73 = arith.constant 24 : index
    %c0_74 = arith.constant 0 : index
    %151 = vector.load %arg16[%c24_73, %c0_74] : memref<36x256xf32, #tpu.memory_space<vmem>>, vector<4x256xf32>
    tpu.vector_store %arg16[%c24_73, %c0_74], %150 {strides = array<i32>} : memref<36x256xf32, #tpu.memory_space<vmem>>, vector<4x256xf32>,
    %152 = vector.extract_strided_slice %116 {offsets = [0, 33], sizes = [4, 256], strides = [1, 1]} : vector<4x290xf32> to vector<4x256xf32>
    %153 = vector.extract_strided_slice %0 {offsets = [7, 0], sizes = [1, 256], strides = [1, 1]} : vector<9x256xf32> to vector<1x256xf32>
    %154 = vector.broadcast %153 : vector<1x256xf32> to vector<4x256xf32>
    %155 = arith.mulf %152, %154 : vector<4x256xf32>
    %c28_75 = arith.constant 28 : index
    %c0_76 = arith.constant 0 : index
    %156 = vector.load %arg16[%c28_75, %c0_76] : memref<36x256xf32, #tpu.memory_space<vmem>>, vector<4x256xf32>
    tpu.vector_store %arg16[%c28_75, %c0_76], %155 {strides = array<i32>} : memref<36x256xf32, #tpu.memory_space<vmem>>, vector<4x256xf32>,
    %157 = vector.extract_strided_slice %116 {offsets = [0, 34], sizes = [4, 256], strides = [1, 1]} : vector<4x290xf32> to vector<4x256xf32>
    %158 = vector.extract_strided_slice %0 {offsets = [8, 0], sizes = [1, 256], strides = [1, 1]} : vector<9x256xf32> to vector<1x256xf32>
    %159 = vector.broadcast %158 : vector<1x256xf32> to vector<4x256xf32>
    %160 = arith.mulf %157, %159 : vector<4x256xf32>
    %c32_77 = arith.constant 32 : index
    %c0_78 = arith.constant 0 : index
    %161 = vector.load %arg16[%c32_77, %c0_78] : memref<36x256xf32, #tpu.memory_space<vmem>>, vector<4x256xf32>
    tpu.vector_store %arg16[%c32_77, %c0_78], %160 {strides = array<i32>} : memref<36x256xf32, #tpu.memory_space<vmem>>, vector<4x256xf32>,
    %c0_79 = arith.constant 0 : index
    %c0_80 = arith.constant 0 : index
    %162 = vector.load %arg7[%c0_79, %c0_80] : memref<5x36xf32, #tpu.memory_space<vmem>>, vector<5x36xf32>
    %c0_81 = arith.constant 0 : index
    %c0_82 = arith.constant 0 : index
    %163 = vector.load %arg16[%c0_81, %c0_82] : memref<36x256xf32, #tpu.memory_space<vmem>>, vector<36x256xf32>
    %cst_83 = arith.constant dense<0.000000e+00> : vector<5x256xf32>
    %164 = tpu.matmul %162, %163, %cst_83 {dimension_numbers = #tpu.dot_dimension_numbers<[1], [0], [0], [1], [0, 0, 1, 1], [], []>} : vector<5x36xf32>, vector<36x256xf32>, vector<5x256xf32> -> vector<5x256xf32>
    %c0_84 = arith.constant 0 : index
    %c0_85 = arith.constant 0 : index
    %165 = vector.load %arg8[%c0_84, %c0_85] : memref<5x1xf32, #tpu.memory_space<vmem>>, vector<5x1xf32>
    %166 = vector.broadcast %165 : vector<5x1xf32> to vector<5x256xf32>
    %167 = arith.addf %164, %166 : vector<5x256xf32>
    %168 = vector.extract_strided_slice %167 {offsets = [0, 0], sizes = [4, 256], strides = [1, 1]} : vector<5x256xf32> to vector<4x256xf32>
    %cst_86 = arith.constant 0.000000e+00 : f32
    %169 = vector.broadcast %cst_86 : f32 to vector<4x256xf32>
    %170 = arith.maximumf %168, %169 : vector<4x256xf32>
    %171 = vector.extract_strided_slice %167 {offsets = [4, 0], sizes = [1, 256], strides = [1, 1]} : vector<5x256xf32> to vector<1x256xf32>
    %172 = arith.negf %171 : vector<1x256xf32>
    %173 = math.exp %172 : vector<1x256xf32>
    %cst_87 = arith.constant 1.000000e+00 : f32
    %174 = vector.broadcast %cst_87 : f32 to vector<1x256xf32>
    %175 = arith.addf %174, %173 : vector<1x256xf32>
    %176 = arith.divf %174, %175 : vector<1x256xf32>
    %c0_88 = arith.constant 0 : index
    %c0_89 = arith.constant 0 : index
    %c0_90 = arith.constant 0 : index
    %177 = vector.load %arg14[%c0_88, %c0_89, %c0_90] : memref<1x1x256xf32, #tpu.memory_space<vmem>>, vector<1x1x256xf32>
    %178 = vector.shape_cast %177 : vector<1x1x256xf32> to vector<1x256xf32>
    %179 = vector.shape_cast %176 : vector<1x256xf32> to vector<1x1x256xf32>
    tpu.vector_store %arg14[%c0_88, %c0_89, %c0_90], %179 {strides = array<i32>} : memref<1x1x256xf32, #tpu.memory_space<vmem>>, vector<1x1x256xf32>,
    %180 = arith.mulf %170, %170 : vector<4x256xf32>
    %cst_91 = arith.constant dense<0.000000e+00> : vector<256xf32>
    %181 = vector.multi_reduction <add>, %180, %cst_91 [0] : vector<4x256xf32> to vector<256xf32>
    %182 = vector.shape_cast %181 : vector<256xf32> to vector<1x256xf32>
    %cst_92 = arith.constant 1.000000e-24 : f32
    %183 = vector.broadcast %cst_92 : f32 to vector<1x256xf32>
    %184 = arith.maximumf %182, %183 : vector<1x256xf32>
    %185 = math.rsqrt %184 : vector<1x256xf32>
    %186 = vector.broadcast %185 : vector<1x256xf32> to vector<4x256xf32>
    %187 = arith.mulf %170, %186 : vector<4x256xf32>
    %188 = arith.addf %187, %187 : vector<4x256xf32>
    %189 = tpu.transpose %187, [1, 0] : vector<4x256xf32> -> vector<256x4xf32>
    %c0_93 = arith.constant 0 : index
    %190 = memref.load %arg12[%c0_93] : memref<2xf32, #tpu.memory_space<smem>>
    %c1 = arith.constant 1 : index
    %191 = memref.load %arg12[%c1] : memref<2xf32, #tpu.memory_space<smem>>
    %c0_94 = arith.constant 0 : index
    %c0_95 = arith.constant 0 : index
    %192 = vector.load %arg9[%c0_94, %c0_95] : memref<2x4xf32, #tpu.memory_space<vmem>>, vector<2x4xf32>
    %c0_96 = arith.constant 0 : index
    %c0_97 = arith.constant 0 : index
    %193 = vector.load %arg10[%c0_96, %c0_97] : memref<2x1xf32, #tpu.memory_space<vmem>>, vector<2x1xf32>
    %c0_98 = arith.constant 0 : index
    %c0_99 = arith.constant 0 : index
    %194 = vector.load %arg11[%c0_98, %c0_99] : memref<1x2xf32, #tpu.memory_space<vmem>>, vector<1x2xf32>
    %195 = vector.extract_strided_slice %189 {offsets = [0, 0], sizes = [128, 4], strides = [1, 1]} : vector<256x4xf32> to vector<128x4xf32>
    %cst_100 = arith.constant dense<0.000000e+00> : vector<128x256xf32>
    %196 = tpu.matmul %195, %188, %cst_100 {dimension_numbers = #tpu.dot_dimension_numbers<[1], [0], [0], [1], [0, 0, 1, 1], [], []>} : vector<128x4xf32>, vector<4x256xf32>, vector<128x256xf32> -> vector<128x256xf32>
    %cst_101 = arith.constant dense<0xFF800000> : vector<128xf32>
    %197 = vector.multi_reduction <maximumf>, %196, %cst_101 [1] : vector<128x256xf32> to vector<128xf32>
    %198 = vector.shape_cast %197 : vector<128xf32> to vector<128x1xf32>
    %199 = vector.broadcast %198 : vector<128x1xf32> to vector<128x256xf32>
    %200 = arith.subf %196, %199 : vector<128x256xf32>
    %201 = math.exp %200 : vector<128x256xf32>
    %cst_102 = arith.constant dense<0.000000e+00> : vector<128xf32>
    %202 = vector.multi_reduction <add>, %201, %cst_102 [1] : vector<128x256xf32> to vector<128xf32>
    %203 = vector.shape_cast %202 : vector<128xf32> to vector<128x1xf32>
    %204 = tpu.reciprocal %203 {approx = true} : vector<128x1xf32> -> vector<128x1xf32>
    %205 = vector.broadcast %204 : vector<128x1xf32> to vector<128x256xf32>
    %206 = arith.mulf %201, %205 : vector<128x256xf32>
    %cst_103 = arith.constant dense<0.000000e+00> : vector<4x128xf32>
    %207 = tpu.matmul %114, %206, %cst_103 {dimension_numbers = #tpu.dot_dimension_numbers<[1], [1], [0], [0], [0, 0, 1, 0], [], []>} : vector<4x256xf32>, vector<128x256xf32>, vector<4x128xf32> -> vector<4x128xf32>
    %208 = vector.extract_strided_slice %114 {offsets = [0, 0], sizes = [4, 128], strides = [1, 1]} : vector<4x256xf32> to vector<4x128xf32>
    %209 = vector.broadcast %190 : f32 to vector<4x128xf32>
    %210 = arith.mulf %209, %207 : vector<4x128xf32>
    %211 = arith.addf %208, %210 : vector<4x128xf32>
    %cst_104 = arith.constant dense<0.000000e+00> : vector<2x128xf32>
    %212 = tpu.matmul %192, %211, %cst_104 {dimension_numbers = #tpu.dot_dimension_numbers<[1], [0], [0], [1], [0, 0, 1, 1], [], []>} : vector<2x4xf32>, vector<4x128xf32>, vector<2x128xf32> -> vector<2x128xf32>
    %213 = vector.broadcast %193 : vector<2x1xf32> to vector<2x128xf32>
    %214 = arith.addf %212, %213 : vector<2x128xf32>
    %cst_105 = arith.constant 0.000000e+00 : f32
    %215 = vector.broadcast %cst_105 : f32 to vector<2x128xf32>
    %216 = arith.maximumf %214, %215 : vector<2x128xf32>
    %cst_106 = arith.constant dense<0.000000e+00> : vector<1x128xf32>
    %217 = tpu.matmul %194, %216, %cst_106 {dimension_numbers = #tpu.dot_dimension_numbers<[1], [0], [0], [1], [0, 0, 1, 1], [], []>} : vector<1x2xf32>, vector<2x128xf32>, vector<1x128xf32> -> vector<1x128xf32>
    %218 = vector.broadcast %191 : f32 to vector<1x128xf32>
    %219 = arith.addf %217, %218 : vector<1x128xf32>
    %220 = arith.negf %219 : vector<1x128xf32>
    %221 = math.exp %220 : vector<1x128xf32>
    %cst_107 = arith.constant 1.000000e+00 : f32
    %222 = vector.broadcast %cst_107 : f32 to vector<1x128xf32>
    %223 = arith.addf %222, %221 : vector<1x128xf32>
    %224 = arith.divf %222, %223 : vector<1x128xf32>
    %225 = vector.broadcast %224 : vector<1x128xf32> to vector<4x128xf32>
    %226 = arith.mulf %211, %225 : vector<4x128xf32>
    %227 = arith.addf %226, %211 : vector<4x128xf32>
    %c0_108 = arith.constant 0 : index
    %c0_109 = arith.constant 0 : index
    %c0_110 = arith.constant 0 : index
    %228 = vector.load %arg13[%c0_108, %c0_109, %c0_110] : memref<1x4x256xf32, #tpu.memory_space<vmem>>, vector<1x4x128xf32>
    %229 = vector.shape_cast %228 : vector<1x4x128xf32> to vector<4x128xf32>
    %230 = vector.shape_cast %227 : vector<4x128xf32> to vector<1x4x128xf32>
    tpu.vector_store %arg13[%c0_108, %c0_109, %c0_110], %230 {strides = array<i32>} : memref<1x4x256xf32, #tpu.memory_space<vmem>>, vector<1x4x128xf32>,
    %231 = vector.extract_strided_slice %189 {offsets = [128, 0], sizes = [128, 4], strides = [1, 1]} : vector<256x4xf32> to vector<128x4xf32>
    %cst_111 = arith.constant dense<0.000000e+00> : vector<128x256xf32>
    %232 = tpu.matmul %231, %188, %cst_111 {dimension_numbers = #tpu.dot_dimension_numbers<[1], [0], [0], [1], [0, 0, 1, 1], [], []>} : vector<128x4xf32>, vector<4x256xf32>, vector<128x256xf32> -> vector<128x256xf32>
    %cst_112 = arith.constant dense<0xFF800000> : vector<128xf32>
    %233 = vector.multi_reduction <maximumf>, %232, %cst_112 [1] : vector<128x256xf32> to vector<128xf32>
    %234 = vector.shape_cast %233 : vector<128xf32> to vector<128x1xf32>
    %235 = vector.broadcast %234 : vector<128x1xf32> to vector<128x256xf32>
    %236 = arith.subf %232, %235 : vector<128x256xf32>
    %237 = math.exp %236 : vector<128x256xf32>
    %cst_113 = arith.constant dense<0.000000e+00> : vector<128xf32>
    %238 = vector.multi_reduction <add>, %237, %cst_113 [1] : vector<128x256xf32> to vector<128xf32>
    %239 = vector.shape_cast %238 : vector<128xf32> to vector<128x1xf32>
    %240 = tpu.reciprocal %239 {approx = true} : vector<128x1xf32> -> vector<128x1xf32>
    %241 = vector.broadcast %240 : vector<128x1xf32> to vector<128x256xf32>
    %242 = arith.mulf %237, %241 : vector<128x256xf32>
    %cst_114 = arith.constant dense<0.000000e+00> : vector<4x128xf32>
    %243 = tpu.matmul %114, %242, %cst_114 {dimension_numbers = #tpu.dot_dimension_numbers<[1], [1], [0], [0], [0, 0, 1, 0], [], []>} : vector<4x256xf32>, vector<128x256xf32>, vector<4x128xf32> -> vector<4x128xf32>
    %244 = vector.extract_strided_slice %114 {offsets = [0, 128], sizes = [4, 128], strides = [1, 1]} : vector<4x256xf32> to vector<4x128xf32>
    %245 = vector.broadcast %190 : f32 to vector<4x128xf32>
    %246 = arith.mulf %245, %243 : vector<4x128xf32>
    %247 = arith.addf %244, %246 : vector<4x128xf32>
    %cst_115 = arith.constant dense<0.000000e+00> : vector<2x128xf32>
    %248 = tpu.matmul %192, %247, %cst_115 {dimension_numbers = #tpu.dot_dimension_numbers<[1], [0], [0], [1], [0, 0, 1, 1], [], []>} : vector<2x4xf32>, vector<4x128xf32>, vector<2x128xf32> -> vector<2x128xf32>
    %249 = vector.broadcast %193 : vector<2x1xf32> to vector<2x128xf32>
    %250 = arith.addf %248, %249 : vector<2x128xf32>
    %cst_116 = arith.constant 0.000000e+00 : f32
    %251 = vector.broadcast %cst_116 : f32 to vector<2x128xf32>
    %252 = arith.maximumf %250, %251 : vector<2x128xf32>
    %cst_117 = arith.constant dense<0.000000e+00> : vector<1x128xf32>
    %253 = tpu.matmul %194, %252, %cst_117 {dimension_numbers = #tpu.dot_dimension_numbers<[1], [0], [0], [1], [0, 0, 1, 1], [], []>} : vector<1x2xf32>, vector<2x128xf32>, vector<1x128xf32> -> vector<1x128xf32>
    %254 = vector.broadcast %191 : f32 to vector<1x128xf32>
    %255 = arith.addf %253, %254 : vector<1x128xf32>
    %256 = arith.negf %255 : vector<1x128xf32>
    %257 = math.exp %256 : vector<1x128xf32>
    %cst_118 = arith.constant 1.000000e+00 : f32
    %258 = vector.broadcast %cst_118 : f32 to vector<1x128xf32>
    %259 = arith.addf %258, %257 : vector<1x128xf32>
    %260 = arith.divf %258, %259 : vector<1x128xf32>
    %261 = vector.broadcast %260 : vector<1x128xf32> to vector<4x128xf32>
    %262 = arith.mulf %247, %261 : vector<4x128xf32>
    %263 = arith.addf %262, %247 : vector<4x128xf32>
    %c0_119 = arith.constant 0 : index
    %c0_120 = arith.constant 0 : index
    %c128 = arith.constant 128 : index
    %264 = vector.load %arg13[%c0_119, %c0_120, %c128] : memref<1x4x256xf32, #tpu.memory_space<vmem>>, vector<1x4x128xf32>
    %265 = vector.shape_cast %264 : vector<1x4x128xf32> to vector<4x128xf32>
    %266 = vector.shape_cast %263 : vector<4x128xf32> to vector<1x4x128xf32>
    tpu.vector_store %arg13[%c0_119, %c0_120, %c128], %266 {strides = array<i32>} : memref<1x4x256xf32, #tpu.memory_space<vmem>>, vector<1x4x128xf32>,
    return
  }
  func.func @transform_0(%arg0: i32) -> (i32, i32, i32) {
    %c0_i32 = arith.constant 0 : i32
    %c0_i32_0 = arith.constant 0 : i32
    %c0_i32_1 = arith.constant 0 : i32
    return %arg0, %c0_i32, %c0_i32_0 : i32, i32, i32
  }
  func.func @transform_1(%arg0: i32) -> (i32, i32) {
    %c0_i32 = arith.constant 0 : i32
    %c0_i32_0 = arith.constant 0 : i32
    %c0_i32_1 = arith.constant 0 : i32
    return %c0_i32, %c0_i32_0 : i32, i32
  }
  func.func @transform_2(%arg0: i32) -> (i32, i32) {
    %c0_i32 = arith.constant 0 : i32
    %c0_i32_0 = arith.constant 0 : i32
    %c0_i32_1 = arith.constant 0 : i32
    return %c0_i32, %c0_i32_0 : i32, i32
  }
  func.func @transform_3(%arg0: i32) -> (i32, i32) {
    %c0_i32 = arith.constant 0 : i32
    %c0_i32_0 = arith.constant 0 : i32
    %c0_i32_1 = arith.constant 0 : i32
    return %c0_i32, %c0_i32_0 : i32, i32
  }
  func.func @transform_4(%arg0: i32) -> (i32, i32) {
    %c0_i32 = arith.constant 0 : i32
    %c0_i32_0 = arith.constant 0 : i32
    %c0_i32_1 = arith.constant 0 : i32
    return %c0_i32, %c0_i32_0 : i32, i32
  }
  func.func @transform_5(%arg0: i32) -> (i32, i32) {
    %c0_i32 = arith.constant 0 : i32
    %c0_i32_0 = arith.constant 0 : i32
    %c0_i32_1 = arith.constant 0 : i32
    return %c0_i32, %c0_i32_0 : i32, i32
  }
  func.func @transform_6(%arg0: i32) -> (i32, i32) {
    %c0_i32 = arith.constant 0 : i32
    %c0_i32_0 = arith.constant 0 : i32
    %c0_i32_1 = arith.constant 0 : i32
    return %c0_i32, %c0_i32_0 : i32, i32
  }
  func.func @transform_7(%arg0: i32) -> (i32, i32) {
    %c0_i32 = arith.constant 0 : i32
    %c0_i32_0 = arith.constant 0 : i32
    %c0_i32_1 = arith.constant 0 : i32
    return %c0_i32, %c0_i32_0 : i32, i32
  }
  func.func @transform_8(%arg0: i32) -> (i32, i32) {
    %c0_i32 = arith.constant 0 : i32
    %c0_i32_0 = arith.constant 0 : i32
    %c0_i32_1 = arith.constant 0 : i32
    return %c0_i32, %c0_i32_0 : i32, i32
  }
  func.func @transform_9(%arg0: i32) -> (i32, i32) {
    %c0_i32 = arith.constant 0 : i32
    %c0_i32_0 = arith.constant 0 : i32
    %c0_i32_1 = arith.constant 0 : i32
    return %c0_i32, %c0_i32_0 : i32, i32
  }
  func.func @transform_10(%arg0: i32) -> (i32, i32) {
    %c0_i32 = arith.constant 0 : i32
    %c0_i32_0 = arith.constant 0 : i32
    %c0_i32_1 = arith.constant 0 : i32
    return %c0_i32, %c0_i32_0 : i32, i32
  }
  func.func @transform_11(%arg0: i32) -> i32 {
    %c0_i32 = arith.constant 0 : i32
    %c0_i32_0 = arith.constant 0 : i32
    return %c0_i32 : i32
  }
  func.func @transform_12(%arg0: i32) -> (i32, i32, i32) {
    %c0_i32 = arith.constant 0 : i32
    %c0_i32_0 = arith.constant 0 : i32
    %c0_i32_1 = arith.constant 0 : i32
    return %arg0, %c0_i32, %c0_i32_0 : i32, i32, i32
  }
  func.func @transform_13(%arg0: i32) -> (i32, i32, i32) {
    %c0_i32 = arith.constant 0 : i32
    %c0_i32_0 = arith.constant 0 : i32
    %c0_i32_1 = arith.constant 0 : i32
    return %arg0, %c0_i32, %c0_i32_0 : i32, i32, i32
  }
}

</mosaic_0001>

<bundles_post_ra>
// kernel: dsbem_forward.1
= control target key start
LH: loop header
LB: loop body
LE: loop exit
PB: predicated region body
PF: predicated region fallthrough
CT: control target
= control target key end

     0   :  { %19 = vsyncpa [#allocation5], 0  ;;  %s3228_s25 = smov 0   ;;  %s4253_s0 = inlined_call_operand.vmem [shape: f32[2,4,256], index: 0, kind: input, shape index: {}]   ;;  %s4254_s1 = inlined_call_operand.vmem [shape: f32[9,256], index: 1, kind: input, shape index: {}]   ;;  %s4255_s2 = inlined_call_operand.vmem [shape: f32[4,36], index: 2, kind: input, shape index: {}]   ;;  %s4256_s3 = inlined_call_operand.vmem [shape: f32[4,1], index: 3, kind: input, shape index: {}]   ;;  %s4257_s4 = inlined_call_operand.vmem [shape: f32[4,36], index: 4, kind: input, shape index: {}]   ;;  %s4258_s5 = inlined_call_operand.vmem [shape: f32[4,1], index: 5, kind: input, shape index: {}]   ;;  %s4259_s6 = inlined_call_operand.vmem [shape: f32[5,36], index: 6, kind: input, shape index: {}]   ;;  %s4260_s7 = inlined_call_operand.vmem [shape: f32[5,1], index: 7, kind: input, shape index: {}]   ;;  %s4261_s8 = inlined_call_operand.vmem [shape: f32[2,4], index: 8, kind: input, shape index: {}]   ;;  %s4262_s9 = inlined_call_operand.vmem [shape: f32[2,1], index: 9, kind: input, shape index: {}]   ;;  %s4263_s10 = inlined_call_operand.vmem [shape: f32[1,2], index: 10, kind: input, shape index: {}]   ;;  %s4264_s11 = inlined_call_operand.vmem [shape: f32[2], index: 11, kind: input, shape index: {}]   ;;  %s4265_s12 = inlined_call_operand.vmem [shape: f32[2,4,256], index: 12, kind: output, shape index: {0}]   ;;  %s4266_s13 = inlined_call_operand.vmem [shape: f32[2,1,256], index: 13, kind: output, shape index: {1}]  }
   0x1 LB: > { %s2749_s26 = sadd.s32 4294967295, %s3137_s25   ;;  %p2751_p0 = scmp.ge.s32.totalorder %s3137_s25, 1  ;;  %s3137_s25 = sphi %s3228_s25, %s25_s25  }
   0x2   : > { %p339_p1 = scmp.lt.s32.totalorder %s3137_s25, 3  ;;  %s381_s29 = sshll.u32 %s4264_s11, 4  ;;  %s382_s29 = int_to_ptr.vmem [resolvable:$true] %s381_s29 }
   0x3   : > { %p2866_p3 = scmp.eq.s32.totalorder %s2749_s26, 0  ;;  %s3139_s30 = smov [#allocation4]  }
   0x4   : > { %p340_p2 = pnand %p2751_p0, %p339_p1 }
   0x6   : > { %p2862_p4 = pneg %p340_p2  ;;  %402 = sbr.rel (%p340_p2) target bundleno = 3532 (0xdcc), region = 68 }
   0x8   : > { %p2863_p5 = pnand %p2866_p3, %p2862_p4 }
   0xa   : > { %2865 = dma.vmem_to_smem (!%p2863_p5), %s382_s29, 16, %s3139_s30, [#allocation5]  }
   0xb   : > { %3132 = dma.done.wait (%p2866_p3), [#allocation5], 16  }
   0xc   : > { %3134 = vsyncadd (%p2866_p3), [#allocation5], 4294967280 }
   0xd   : > { %409 = sfence }
   0xe   : > { %v466_v0 = vld [vmem:[%s4254_s1] sm:$0xff]  ;;  %v467_v1 = vld [vmem:[%s4254_s1 + $0x8] sm:$0xff]  ;;  %p452_p6 = scmp.lt.s32.totalorder %s2749_s26, 1  ;;  %vm495_vm0 = vcmask 1043456   ;;  %s3140_s22 = smov 2   ;;  %vm471_vm1 = vcmask 273408  }
   0xf   : > { %v491_v2 = vperm.slane %v467_v1, 0  ;;  %v544_v3 = vperm.slane %v466_v0, 2  ;;  %v545_v4 = vperm.slane %v467_v1, 2  ;;  %v490_v5 = vperm.slane %v466_v0, 0  ;;  %s3141_s23 = smov 17   ;;  %s3142_s24 = smov 16  }
  0x10   : > { %s4270_s26 = smov (!%p452_p6, %s2749_s26), 1  ;;  %v581_v8 = vperm.slane %v467_v1, 3  ;;  %v508_v9 = vperm.slane %v467_v1, 1  ;;  %v617_v10 = vperm.slane %v466_v0, 4  ;;  %v618_v11 = vperm.slane %v467_v1, 4  ;;  %s3143_s29 = smov 1  }
  0x11   : > { %v494_v6 = vrot.slane %v491_v2, 4  ;;  %v548_v7 = vrot.slane %v545_v4, 4  ;;  %s2856_s18 = sshll.u32 %s4270_s26, 3  ;;  %v580_v16 = vperm.slane %v466_v0, 3  ;;  %v653_v18 = vperm.slane %v467_v1, 5  ;;  %s3144_s30 = smov 18  }
  0x12   : > { %s456_s21 = scalar_lea.vmem %s4253_s0, %s2856_s18  ;;  %v621_v15 = vrot.slane %v618_v11, 4  ;;  %v584_v17 = vrot.slane %v581_v8, 4  ;;  %v507_v19 = vperm.slane %v466_v0, 1  ;;  %v511_v20 = vrot.slane %v508_v9, 4  ;;  %v2899_v29 = vld [vmem:[%s4254_s1 + $0x18] ss:$0 sm:$0xff] }
  0x13   : > { %v549_v12 = vsel %vm495_vm0, %v544_v3, %v548_v7  ;;  %v3250_v13 = vsel %vm495_vm0, %v490_v5, %v494_v6  ;;  %v473_v14 = vld [vmem:[%s456_s21] sm:$0xff]  ;;  %v652_v22 = vperm.slane %v466_v0, 5  ;;  %v656_v23 = vrot.slane %v653_v18, 4  ;;  %v2898_v34 = vld [vmem:[%s4254_s1 + $0x10] ss:$0 sm:$0xff]  ;;  %s3145_s16 = smov 33  }
  0x14   : > { %550 = vrot.lane.b32.xlu1 %v549_v12, %s3140_s22  ;;  %475 = vrot.lane.b32.xlu0 %v473_v14, %s3141_s23  ;;  %v622_v21 = vsel %vm495_vm0, %v617_v10, %v621_v15  ;;  %v585_v24 = vsel %vm495_vm0, %v580_v16, %v584_v17  ;;  %v726_v25 = vperm.slane %v467_v1, 7  ;;  %v512_v26 = vsel %vm495_vm0, %v507_v19, %v511_v20  ;;  %s3146_s17 = smov 32   ;;  %s3147_s19 = smov 34  }
  0x15   : > { %623 = vrot.lane.b32.xlu2 %v622_v21, %s3141_s23  ;;  %v690_v27 = vperm.slane %v467_v1, 6  ;;  %v657_v28 = vsel %vm495_vm0, %v652_v22, %v656_v23  ;;  %v725_v30 = vperm.slane %v466_v0, 7  ;;  %v689_v32 = vperm.slane %v466_v0, 6  ;;  %s3149_s20 = smov 127   ;;  %s3150_s21 = smov 126  }
  0x16   : > { %v729_v31 = vrot.slane %v726_v25, 4  ;;  %v766_v35 = vrot.slane %v2899_v29, 4  ;;  %v3148_v39 = vmov 0.0   ;;  %vm482_vm2 = vcmask 1043592   ;;  %s3151_s22 = smov 112   ;;  %s3153_s27 = smov 110  }
  0x17   : > { %v693_v33 = vrot.slane %v690_v27, 4  ;;  %470 = vst [vmem:[#allocation2] sm:$0xff] %v3148_v39  ;;  %vm483_vm3 = vcmask 1047556   ;;  %vm478_vm4 = vcmask 138240   ;;  %vm486_vm5 = vcmask 134144   ;;  %s3154_s28 = smov 96  }
  0x18   : > { %v730_v36 = vsel %vm495_vm0, %v725_v30, %v729_v31  ;;  %v767_v38 = vsel %vm495_vm0, %v2898_v34, %v766_v35  ;;  %472 = vst.msk [vmem:[#allocation2 + $0x8] sm:$0xf] %vm471_vm1, %v3148_v39  ;;  %vm3272_vm6 = vmor %vm483_vm3, %vm482_vm2  ;;  %vm516_vm7 = vcmask 7168   ;;  %vm553_vm8 = vcmask 15360  }
  0x19   : > { %v694_v37 = vsel %vm495_vm0, %v689_v32, %v693_v33  ;;  %vm589_vm9 = vcmask 130048   ;;  %vm661_vm10 = vcmask 146432   ;;  %vm698_vm11 = vcmask 261120  }
  0x1a   : > { %vm734_vm12 = vcmask 269312   ;;  %vm771_vm13 = vcmask 277504   ;;  %vm537_vm14 = vcmask 1039360   ;;  %vm610_vm15 = vcmask 916480  }
  0x1b   : > { %vm573_vm1 = vcmask 1031168   ;;  %vm718_vm2 = vcmask 785408   ;;  %vm645_vm3 = vcmask 908288  }
  0x1c   : > { %586 = vrot.lane.b32.xlu1 %v585_v24, %s3142_s24  ;;  %513 = vrot.lane.b32.xlu0 %v512_v26, %s3143_s29  ;;  %s3152_s24 = smov 111   ;;  %s3155_s29 = smov 95  }
  0x1d   : > { %658 = vrot.lane.b32.xlu2 %v657_v28, %s3144_s30  ;;  %s3156_s30 = smov 94  }
  0x24   : > { %731 = vrot.lane.b32.xlu1 %v730_v36, %s3145_s16  ;;  %695 = vrot.lane.b32.xlu0 %v694_v37, %s3146_s17 }
  0x25   : > { %768 = vrot.lane.b32.xlu2 %v767_v38, %s3147_s19  ;;  %s3924_s19 = sld [smem:[#allocation4]] }
  0x6f   : > { %v624_v1 = vpop.permute.xlu2 %623 }
  0x70   : > { %v3314_v3 = vrot.slane %v624_v1, 4 }
  0x72   : > { %v3328_v11 = vsel %vm478_vm4, %v3314_v3, %v624_v1 }
  0x77   : > { %v659_v10 = vpop.permute.xlu2 %658 }
  0x78   : > { %v3330_v12 = vrot.slane %v659_v10, 4 }
  0x7a   : > { %v3342_v20 = vsel %vm661_vm10, %v3330_v12, %v659_v10  ;;  %vm791_vm10 = vcmask 769024  }
  0x7f   : > { %v769_v34 = vpop.permute.xlu2 %768 }
  0x80   : > { %v3363_v36 = vrot.slane %v769_v34, 4 }
  0x86   : > { %v476_v40 = vpop.permute.xlu0 %475  ;;  %v551_v49 = vpop.permute.xlu1 %550 }
  0x87   : > { %v477_v42 = vrot.slane %v476_v40, 4  ;;  %v3290_v51 = vrot.slane %v551_v49, 4 }
  0x89   : > { %v479_v43 = vsel %vm478_vm4, %v477_v42, %v476_v40  ;;  %487 = vst.msk [vmem:[#allocation2 + $0x8] sm:$0xf] %vm486_vm5, %v477_v42  ;;  %v3302_v59 = vsel %vm553_vm8, %v3290_v51, %v551_v49 }
  0x8a   : > { %485 = vst.msk [vmem:[#allocation2] sm:$0xff] %vm3272_vm6, %v479_v43 }
  0x8e   : > { %v514_v44 = vpop.permute.xlu0 %513  ;;  %v587_v58 = vpop.permute.xlu1 %586 }
  0x8f   : > { %v3280_v45 = vrot.slane %v514_v44, 4  ;;  %v3304_v60 = vrot.slane %v587_v58, 4 }
  0x90   : > { %v3284_v47 = vld [vmem:[#allocation2 + $0x8] sm:$0xf] }
  0x91   : > { %v3282_v46 = vld [vmem:[#allocation2] sm:$0xff]  ;;  %v521_v50 = vmul.f32 %v3280_v45, %v3284_v47  ;;  %v3293_v52 = vsel %vm516_vm7, %v3280_v45, %v514_v44  ;;  %v558_v56 = vmul.f32 %v3290_v51, %v3284_v47  ;;  %v594_v62 = vmul.f32 %v3304_v60, %v3284_v47 }
  0x92   : > { %v498_v48 = vmul.f32 %v3250_v13, %v3282_v46  ;;  %v520_v55 = vmul.f32 %v3293_v52, %v3282_v46  ;;  %v557_v61 = vmul.f32 %v3302_v59, %v3282_v46  ;;  %v3317_v4 = vsel %vm589_vm9, %v3304_v60, %v587_v58 }
  0x93   : > { %527 = vst [vmem:[#allocation1 + $0x11] ss:$2 sm:$0xff] %v521_v50  ;;  %v593_v5 = vmul.f32 %v3317_v4, %v3282_v46  ;;  %v630_v6 = vmul.f32 %v3314_v3, %v3284_v47  ;;  %v629_v14 = vmul.f32 %v3328_v11, %v3282_v46  ;;  %v666_v15 = vmul.f32 %v3330_v12, %v3284_v47 }
  0x94   : > { %500 = vst [vmem:[#allocation1] ss:$2 sm:$0xff] %v498_v48  ;;  %v665_v22 = vmul.f32 %v3342_v20, %v3282_v46  ;;  %v776_v39 = vmul.f32 %v3363_v36, %v3284_v47  ;;  %v3375_v44 = vsel %vm771_vm13, %v3363_v36, %v769_v34  ;;  %vm682_vm7 = vcmask 900096  }
  0x95   : > { %v775_v48 = vmul.f32 %v3375_v44, %v3282_v46  ;;  %vm755_vm9 = vcmask 777216   ;;  %v3157_v34 = vmov 0  }
  0x96   : > { %v696_v19 = vpop.permute.xlu0 %695  ;;  %v732_v27 = vpop.permute.xlu1 %731  ;;  %2895 = vset.pattern.permute.xlu0 %v3157_v34  ;;  %2896 = vset.pattern.permute.xlu2 %v3157_v34 }
  0x97   : > { %v3344_v21 = vrot.slane %v696_v19, 4  ;;  %v3352_v28 = vrot.slane %v732_v27, 4  ;;  %2897 = vset.pattern.permute.xlu1 %v3157_v34 }
  0x99   : > { %v703_v25 = vmul.f32 %v3344_v21, %v3284_v47  ;;  %v3355_v29 = vsel %vm698_vm11, %v3344_v21, %v696_v19  ;;  %v739_v33 = vmul.f32 %v3352_v28, %v3284_v47  ;;  %v3366_v37 = vsel %vm734_vm12, %v3352_v28, %v732_v27 }
  0x9a   : > { %v530_v57 = vld.sshfl [vmem:[#allocation1 + $0x10] sm:$0xff pattern:$0x75316420]  ;;  %v702_v30 = vmul.f32 %v3355_v29, %v3282_v46  ;;  %v738_v38 = vmul.f32 %v3366_v37, %v3282_v46  ;;  %vm815_vm11 = vcmask 293888  }
  0x9b   : > { %v501_v53 = vld.sshfl [vmem:[#allocation1] sm:$0xff pattern:$0x75316420]  ;;  %v502_v54 = vld.sshfl [vmem:[#allocation1 + $0x8] sm:$0xff pattern:$0x75316420]  ;;  %535 = vrot.lane.b32.xlu2 %v530_v57, %s3149_s20 }
  0x9c   : > { %505 = vst [vmem:[#allocation3 + $0x30] sm:$0xf] %v501_v53 }
  0x9d   : > { %506 = vst [vmem:[#allocation3] sm:$0xf] %v502_v54 }
  0x9e   : > { %525 = vst [vmem:[#allocation1 + $0x1] ss:$2 sm:$0xff] %v520_v55 }
  0x9f   : > { %563 = vst [vmem:[#allocation1 + $0x10] ss:$2 sm:$0xff] %v558_v56 }
  0xa5   : > { %v3310_v63 = vld.sshfl [vmem:[#allocation1] sm:$0xff pattern:$0x75316420]  ;;  %v529_v0 = vld.sshfl [vmem:[#allocation1 + $0x8] sm:$0xff pattern:$0x75316420] }
  0xa6   : > { %561 = vst [vmem:[#allocation1] ss:$2 sm:$0xff] %v557_v61  ;;  %v566_v2 = vld.sshfl [vmem:[#allocation1 + $0x10] sm:$0xff pattern:$0x75316420]  ;;  %533 = vrot.lane.b32.xlu1 %v529_v0, %s3149_s20 }
  0xa7   : > { %600 = vst [vmem:[#allocation1 + $0x11] ss:$2 sm:$0xff] %v594_v62  ;;  %571 = vrot.lane.b32.xlu2 %v566_v2, %s3150_s21 }
  0xad   : > { %v3323_v7 = vld.sshfl [vmem:[#allocation1] sm:$0xff pattern:$0x75316420]  ;;  %v565_v8 = vld.sshfl [vmem:[#allocation1 + $0x8] sm:$0xff pattern:$0x75316420] }
  0xae   : > { %598 = vst [vmem:[#allocation1 + $0x1] ss:$2 sm:$0xff] %v593_v5  ;;  %v603_v9 = vld.sshfl [vmem:[#allocation1 + $0x10] sm:$0xff pattern:$0x75316420] }
  0xaf   : > { %635 = vst [vmem:[#allocation1 + $0x10] ss:$2 sm:$0xff] %v630_v6  ;;  %608 = vrot.lane.b32.xlu1 %v603_v9, %s3151_s22 }
  0xb5   : > { %v3336_v16 = vld.sshfl [vmem:[#allocation1] sm:$0xff pattern:$0x75316420]  ;;  %v602_v17 = vld.sshfl [vmem:[#allocation1 + $0x8] sm:$0xff pattern:$0x75316420] }
  0xb6   : > { %633 = vst [vmem:[#allocation1] ss:$2 sm:$0xff] %v629_v14  ;;  %v638_v18 = vld.sshfl [vmem:[#allocation1 + $0x10] sm:$0xff pattern:$0x75316420]  ;;  %606 = vrot.lane.b32.xlu0 %v602_v17, %s3151_s22 }
  0xb7   : > { %672 = vst [vmem:[#allocation1 + $0x11] ss:$2 sm:$0xff] %v666_v15  ;;  %643 = vrot.lane.b32.xlu2 %v638_v18, %s3152_s24  ;;  %569 = vrot.lane.b32.xlu1 %v565_v8, %s3150_s21 }
  0xbd   : > { %v636_v23 = vld.sshfl [vmem:[#allocation1] sm:$0xff pattern:$0x75316420]  ;;  %v637_v24 = vld.sshfl [vmem:[#allocation1 + $0x8] sm:$0xff pattern:$0x75316420] }
  0xbe   : > { %670 = vst [vmem:[#allocation1 + $0x1] ss:$2 sm:$0xff] %v665_v22  ;;  %v675_v26 = vld.sshfl [vmem:[#allocation1 + $0x10] sm:$0xff pattern:$0x75316420] }
  0xbf   : > { %708 = vst [vmem:[#allocation1 + $0x10] ss:$2 sm:$0xff] %v703_v25  ;;  %680 = vrot.lane.b32.xlu1 %v675_v26, %s3153_s27  ;;  %639 = vrot.lane.b32.xlu2 %v636_v23, %s3152_s24 }
  0xc5   : > { %v673_v31 = vld.sshfl [vmem:[#allocation1] sm:$0xff pattern:$0x75316420]  ;;  %v674_v32 = vld.sshfl [vmem:[#allocation1 + $0x8] sm:$0xff pattern:$0x75316420] }
  0xc6   : > { %706 = vst [vmem:[#allocation1] ss:$2 sm:$0xff] %v702_v30  ;;  %v711_v35 = vld.sshfl [vmem:[#allocation1 + $0x10] sm:$0xff pattern:$0x75316420] }
  0xc7   : > { %745 = vst [vmem:[#allocation1 + $0x11] ss:$2 sm:$0xff] %v739_v33  ;;  %716 = vrot.lane.b32.xlu0 %v711_v35, %s3154_s28  ;;  %641 = vrot.lane.b32.xlu1 %v637_v24, %s3152_s24  ;;  %v809_v33 = vld [vmem:[%s4256_s3] sm:$0xf] }
  0xcd   : > { %v710_v40 = vld.sshfl [vmem:[#allocation1 + $0x8] sm:$0xff pattern:$0x75316420]  ;;  %v709_v42 = vld.sshfl [vmem:[#allocation1] sm:$0xff pattern:$0x75316420] }
  0xce   : > { %v748_v43 = vld.sshfl [vmem:[#allocation1 + $0x10] sm:$0xff pattern:$0x75316420]  ;;  %743 = vst [vmem:[#allocation1 + $0x1] ss:$2 sm:$0xff] %v738_v38 }
  0xcf   : > { %781 = vst [vmem:[#allocation1 + $0x10] ss:$2 sm:$0xff] %v776_v39  ;;  %678 = vrot.lane.b32.xlu0 %v674_v32, %s3153_s27  ;;  %753 = vrot.lane.b32.xlu2 %v748_v43, %s3155_s29 }
  0xd5   : > { %v747_v49 = vld.sshfl [vmem:[#allocation1 + $0x8] sm:$0xff pattern:$0x75316420]  ;;  %v746_v50 = vld.sshfl [vmem:[#allocation1] sm:$0xff pattern:$0x75316420] }
  0xd6   : > { %v784_v47 = vld.sshfl [vmem:[#allocation1 + $0x10] sm:$0xff pattern:$0x75316420]  ;;  %779 = vst [vmem:[#allocation1] ss:$2 sm:$0xff] %v775_v48 }
  0xd7   : > { %676 = vrot.lane.b32.xlu0 %v673_v31, %s3153_s27  ;;  %789 = vrot.lane.b32.xlu1 %v784_v47, %s3156_s30 }
  0xd8   : > { %714 = vrot.lane.b32.xlu2 %v710_v40, %s3154_s28 }
  0xdd   : > { %v783_v53 = vld.sshfl [vmem:[#allocation1 + $0x8] sm:$0xff pattern:$0x75316420]  ;;  %v782_v46 = vld.sshfl [vmem:[#allocation1] sm:$0xff pattern:$0x75316420] }
  0xdf   : > { %751 = vrot.lane.b32.xlu1 %v747_v49, %s3155_s29  ;;  %749 = vrot.lane.b32.xlu0 %v746_v50, %s3155_s29 }
  0xe0   : > { %712 = vrot.lane.b32.xlu2 %v709_v42, %s3154_s28 }
  0xe7   : > { %604 = vrot.lane.b32.xlu1 %v3336_v16, %s3151_s22  ;;  %787 = vrot.lane.b32.xlu0 %v783_v53, %s3156_s30 }
  0xe8   : > { %531 = vrot.lane.b32.xlu2 %v3310_v63, %s3149_s20 }
  0xef   : > { %785 = vrot.lane.b32.xlu0 %v782_v46, %s3156_s30 }
  0xf5   : > { %v536_v54 = vpop.permute.xlu2 %535 }
  0xf7   : > { %567 = vrot.lane.b32.xlu0 %v3323_v7, %s3150_s21 }
  0xff   : > { %812 = vperm.xlu0 %2895, %v809_v33  }
 0x101   : > { %v572_v55 = vpop.permute.xlu2 %571 }
 0x111   : > { %v644_v56 = vpop.permute.xlu2 %643 }
 0x118   : > { %v534_v57 = vpop.permute.xlu1 %533 }
 0x119   : > { %v539_v58 = vsel %vm537_vm14, %v534_v57, %v536_v54  ;;  %v640_v61 = vpop.permute.xlu2 %639 }
 0x11a   : > { %543 = vst [vmem:[#allocation3] sm:$0xf0] %v539_v58 }
 0x121   : > { %v609_v62 = vpop.permute.xlu1 %608 }
 0x128   : > { %v607_v0 = vpop.permute.xlu0 %606 }
 0x129   : > { %v754_v63 = vpop.permute.xlu2 %753  ;;  %v3394_v1 = vpop.permute.xlu1 %569  ;;  %v612_v2 = vsel %vm610_vm15, %v607_v0, %v609_v62 }
 0x12a   : > { %v575_v5 = vsel %vm573_vm1, %v3394_v1, %v572_v55  ;;  %616 = vst [vmem:[#allocation3 + $0x10] sm:$0xf0] %v612_v2  ;;  %v798_v55 = vld [vmem:[%s4255_s2] sm:$0xf] }
 0x12b   : > { %579 = vst [vmem:[#allocation3 + $0x10] sm:$0xf] %v575_v5 }
 0x131   : > { %v681_v6 = vpop.permute.xlu1 %680 }
 0x132   : > { %v715_v7 = vpop.permute.xlu2 %714  ;;  %v802_v47 = vld [vmem:[#allocation3 + $0x10] sm:$0xff] }
 0x139   : > { %v717_v8 = vpop.permute.xlu0 %716  ;;  %v642_v9 = vpop.permute.xlu1 %641 }
 0x13a   : > { %v713_v10 = vpop.permute.xlu2 %712  ;;  %v720_v14 = vsel %vm718_vm2, %v715_v7, %v717_v8  ;;  %v646_v15 = vsel %vm645_vm3, %v640_v61, %v642_v9  ;;  %v647_v17 = vsel %vm645_vm3, %v642_v9, %v644_v56  ;;  %v800_v56 = vld [vmem:[#allocation3] sm:$0xff] }
 0x13b   : > { %v719_v16 = vsel %vm718_vm2, %v713_v10, %v715_v7  ;;  %724 = vst [vmem:[#allocation3 + $0x20] sm:$0xf] %v720_v14 }
 0x13c   : > { %723 = vst [vmem:[#allocation3 + $0x8] sm:$0xf] %v719_v16 }
 0x13d   : > { %650 = vst [vmem:[#allocation3 + $0x48] sm:$0xf] %v646_v15 }
 0x13e   : > { %651 = vst [vmem:[#allocation3 + $0x28] sm:$0xf] %v647_v17 }
 0x141   : > { %v679_v18 = vpop.permute.xlu0 %678 }
 0x142   : > { %v532_v19 = vpop.permute.xlu2 %531  ;;  %v684_v22 = vsel %vm682_vm7, %v679_v18, %v681_v6 }
 0x143   : > { %v538_v23 = vsel %vm537_vm14, %v532_v19, %v534_v57  ;;  %688 = vst [vmem:[#allocation3 + $0x28] sm:$0xf0] %v684_v22 }
 0x144   : > { %542 = vst [vmem:[#allocation3 + $0x30] sm:$0xf0] %v538_v23 }
 0x149   : > { %v790_v24 = vpop.permute.xlu1 %789  ;;  %v677_v25 = vpop.permute.xlu0 %676 }
 0x14a   : > { %v683_v26 = vsel %vm682_vm7, %v677_v25, %v679_v18  ;;  %v804_v50 = vld [vmem:[#allocation3 + $0x28] sm:$0xff] }
 0x14b   : > { %687 = vst [vmem:[#allocation3 + $0x48] sm:$0xf0] %v683_v26  ;;  %v799_v62 = vld [vmem:[#allocation3 + $0x30] sm:$0xff] }
 0x151   : > { %v752_v27 = vpop.permute.xlu1 %751  ;;  %v750_v30 = vpop.permute.xlu0 %749 }
 0x152   : > { %v757_v31 = vsel %vm755_vm9, %v752_v27, %v754_v63  ;;  %v756_v32 = vsel %vm755_vm9, %v750_v30, %v752_v27  ;;  %v803_v58 = vld [vmem:[#allocation3 + $0x48] sm:$0xff] }
 0x153   : > { %761 = vst [vmem:[#allocation3 + $0x20] sm:$0xf0] %v757_v31 }
 0x154   : > { %760 = vst [vmem:[#allocation3 + $0x8] sm:$0xf0] %v756_v32 }
 0x159   : > { %v605_v35 = vpop.permute.xlu1 %604  ;;  %v788_v38 = vpop.permute.xlu0 %787 }
 0x15a   : > { %v611_v39 = vsel %vm610_vm15, %v605_v35, %v607_v0  ;;  %v793_v40 = vsel %vm791_vm10, %v788_v38, %v790_v24  ;;  %v806_v49 = vld [vmem:[#allocation3 + $0x20] sm:$0xff] }
 0x15b   : > { %615 = vst [vmem:[#allocation3 + $0x18] sm:$0xf0] %v611_v39  ;;  %v805_v57 = vld [vmem:[#allocation3 + $0x8] sm:$0xff] }
 0x15c   : > { %797 = vst [vmem:[#allocation3 + $0x38] sm:$0xf] %v793_v40 }
 0x161   : > { %v786_v42 = vpop.permute.xlu0 %785 }
 0x162   : > { %v792_v43 = vsel %vm791_vm10, %v786_v42, %v788_v38 }
 0x163   : > { %796 = vst [vmem:[#allocation3 + $0x40] sm:$0xf] %v792_v43  ;;  %v808_v48 = vld [vmem:[#allocation3 + $0x38] sm:$0xf] }
 0x164   : > { %2763 = vmatpush.msk.msra.mxu3 %vm495_vm0, %v808_v48 }
 0x166   : > { %857 = vmatpush.msra.mxu3 %v806_v49 }
 0x168   : > { %858 = vmatpush.msra.mxu3 %v804_v50 }
 0x169   : > { %v568_v53 = vpop.permute.xlu0 %567 }
 0x16a   : > { %859 = vmatpush.msra.mxu3 %v802_v47  ;;  %v574_v46 = vsel %vm573_vm1, %v568_v53, %v3394_v1  ;;  %v807_v54 = vld [vmem:[#allocation3 + $0x40] sm:$0xf] }
 0x16b   : > { %578 = vst [vmem:[#allocation3 + $0x18] sm:$0xf] %v574_v46  ;;  %2761 = vmatpush.msk.msra.mxu2 %vm495_vm0, %v807_v54 }
 0x16c   : > { %860 = vmatpush.msra.mxu3 %v800_v56 }
 0x16d   : > { %837 = vmatpush.msra.mxu2 %v805_v57  ;;  %2764 = vmatmul.msk.f32.vlgmr.msra.gmra.mxu3 %vm815_vm11, %v798_v55 }
 0x16f   : > { %838 = vmatpush.msra.mxu2 %v803_v58 }
 0x171   : > { %v813_v0 = vpop.permute.xlu0 %812 }
 0x172   : > { %v801_v61 = vld [vmem:[#allocation3 + $0x18] sm:$0xff] }
 0x173   : > { %839 = vmatpush.msra.mxu2 %v801_v61 }
 0x175   : > { %840 = vmatpush.msra.mxu2 %v799_v62 }
 0x176   : > { %2762 = vmatmul.msk.f32.vlgmr.msra.gmra.mxu2 %vm815_vm11, %v798_v55 }
 0x1f0   : > { %v862_v63 = vpop.f32.mrf.mxu3 }
 0x1f1   : > { %v863_v1 = vadd.f32 %v862_v63, %v813_v0 }
 0x1f3   : > { %v866_v2 = vmax.f32 %v863_v1, 0.0 }
 0x1f5   : > { %v869_v6 = vrot.slane %v866_v2, 4 }
 0x1f9   : > { %v842_v5 = vpop.f32.mrf.mxu2 }
 0x1fa   : > { %v843_v7 = vadd.f32 %v842_v5, %v813_v0 }
 0x1fc   : > { %v865_v8 = vmax.f32 %v843_v7, 0.0 }
 0x1fe   : > { %v870_v9 = vsel %vm495_vm0, %v865_v8, %v869_v6 }
 0x1ff   : > { %871 = vrot.lane.b32.xlu1 %v870_v9, %s3141_s23 }
 0x271   : > { %v872_v10 = vpop.permute.xlu1 %871 }
 0x272   : > { %v873_v14 = vrot.slane %v872_v10, 4 }
 0x274   : > { %v874_v15 = vsel %vm478_vm4, %v873_v14, %v872_v10  ;;  %878 = vst.msk [vmem:[#allocation2 + $0x8] sm:$0xf] %vm486_vm5, %v873_v14 }
 0x275   : > { %877 = vst.msk [vmem:[#allocation2] sm:$0xff] %vm3272_vm6, %v874_v15  ;;  %v1081_v15 = vld [vmem:[%s4258_s5] sm:$0xf] }
 0x27b   : > { %v880_v16 = vld [vmem:[#allocation2 + $0x8] sm:$0xf] }
 0x27c   : > { %v3429_v17 = vld [vmem:[#allocation2] sm:$0xff]  ;;  %v891_v18 = vmul.f32 %v880_v16, %v3280_v45  ;;  %v914_v22 = vmul.f32 %v880_v16, %v3290_v51  ;;  %v936_v27 = vmul.f32 %v880_v16, %v3304_v60  ;;  %v959_v34 = vmul.f32 %v880_v16, %v3314_v3 }
 0x27d   : > { %v881_v19 = vmul.f32 %v3429_v17, %v3250_v13  ;;  %v890_v24 = vmul.f32 %v3429_v17, %v3293_v52  ;;  %v913_v31 = vmul.f32 %v3429_v17, %v3302_v59  ;;  %v935_v38 = vmul.f32 %v3429_v17, %v3317_v4 }
 0x27e   : > { %897 = vst [vmem:[#allocation1 + $0x11] ss:$2 sm:$0xff] %v891_v18  ;;  %v981_v42 = vmul.f32 %v880_v16, %v3330_v12  ;;  %v958_v48 = vmul.f32 %v3429_v17, %v3328_v11  ;;  %v1004_v47 = vmul.f32 %v880_v16, %v3344_v21  ;;  %v980_v46 = vmul.f32 %v3429_v17, %v3342_v20 }
 0x27f   : > { %883 = vst [vmem:[#allocation1] ss:$2 sm:$0xff] %v881_v19  ;;  %v1026_v56 = vmul.f32 %v880_v16, %v3352_v28  ;;  %v1003_v58 = vmul.f32 %v3429_v17, %v3355_v29  ;;  %v1049_v0 = vmul.f32 %v880_v16, %v3363_v36  ;;  %v1025_v1 = vmul.f32 %v3429_v17, %v3366_v37 }
 0x280   : > { %v1048_v7 = vmul.f32 %v3429_v17, %v3375_v44 }
 0x285   : > { %v3435_v23 = vld.sshfl [vmem:[#allocation1 + $0x10] sm:$0xff pattern:$0x75316420] }
 0x286   : > { %919 = vst [vmem:[#allocation1 + $0x10] ss:$2 sm:$0xff] %v914_v22  ;;  %v884_v25 = vld.sshfl [vmem:[#allocation1] sm:$0xff pattern:$0x75316420] }
 0x287   : > { %v885_v26 = vld.sshfl [vmem:[#allocation1 + $0x8] sm:$0xff pattern:$0x75316420]  ;;  %888 = vst [vmem:[#allocation3 + $0x30] sm:$0xf] %v884_v25 }
 0x288   : > { %895 = vst [vmem:[#allocation1 + $0x1] ss:$2 sm:$0xff] %v890_v24 }
 0x289   : > { %889 = vst [vmem:[#allocation3] sm:$0xf] %v885_v26 }
 0x28d   : > { %v922_v30 = vld.sshfl [vmem:[#allocation1 + $0x10] sm:$0xff pattern:$0x75316420] }
 0x28e   : > { %927 = vrot.lane.b32.xlu2 %v922_v30, %s3150_s21  ;;  %942 = vst [vmem:[#allocation1 + $0x11] ss:$2 sm:$0xff] %v936_v27 }
 0x28f   : > { %v899_v32 = vld.sshfl [vmem:[#allocation1 + $0x8] sm:$0xff pattern:$0x75316420]  ;;  %v3443_v33 = vld.sshfl [vmem:[#allocation1] sm:$0xff pattern:$0x75316420] }
 0x290   : > { %903 = vrot.lane.b32.xlu1 %v899_v32, %s3149_s20  ;;  %917 = vst [vmem:[#allocation1] ss:$2 sm:$0xff] %v913_v31 }
 0x295   : > { %v945_v35 = vld.sshfl [vmem:[#allocation1 + $0x10] sm:$0xff pattern:$0x75316420] }
 0x296   : > { %964 = vst [vmem:[#allocation1 + $0x10] ss:$2 sm:$0xff] %v959_v34 }
 0x297   : > { %v920_v39 = vld.sshfl [vmem:[#allocation1] sm:$0xff pattern:$0x75316420]  ;;  %v921_v40 = vld.sshfl [vmem:[#allocation1 + $0x8] sm:$0xff pattern:$0x75316420] }
 0x298   : > { %940 = vst [vmem:[#allocation1 + $0x1] ss:$2 sm:$0xff] %v935_v38  ;;  %950 = vrot.lane.b32.xlu1 %v945_v35, %s3151_s22 }
 0x29d   : > { %v967_v43 = vld.sshfl [vmem:[#allocation1 + $0x10] sm:$0xff pattern:$0x75316420] }
 0x29e   : > { %972 = vrot.lane.b32.xlu2 %v967_v43, %s3152_s24  ;;  %987 = vst [vmem:[#allocation1 + $0x11] ss:$2 sm:$0xff] %v981_v42 }
 0x29f   : > { %v943_v49 = vld.sshfl [vmem:[#allocation1] sm:$0xff pattern:$0x75316420]  ;;  %v944_v50 = vld.sshfl [vmem:[#allocation1 + $0x8] sm:$0xff pattern:$0x75316420] }
 0x2a0   : > { %925 = vrot.lane.b32.xlu1 %v921_v40, %s3150_s21  ;;  %948 = vrot.lane.b32.xlu0 %v944_v50, %s3151_s22  ;;  %962 = vst [vmem:[#allocation1] ss:$2 sm:$0xff] %v958_v48 }
 0x2a5   : > { %v990_v53 = vld.sshfl [vmem:[#allocation1 + $0x10] sm:$0xff pattern:$0x75316420] }
 0x2a6   : > { %1009 = vst [vmem:[#allocation1 + $0x10] ss:$2 sm:$0xff] %v1004_v47 }
 0x2a7   : > { %v965_v54 = vld.sshfl [vmem:[#allocation1] sm:$0xff pattern:$0x75316420]  ;;  %v966_v55 = vld.sshfl [vmem:[#allocation1 + $0x8] sm:$0xff pattern:$0x75316420] }
 0x2a8   : > { %995 = vrot.lane.b32.xlu1 %v990_v53, %s3153_s27  ;;  %968 = vrot.lane.b32.xlu2 %v965_v54, %s3152_s24  ;;  %985 = vst [vmem:[#allocation1 + $0x1] ss:$2 sm:$0xff] %v980_v46 }
 0x2ad   : > { %v1012_v57 = vld.sshfl [vmem:[#allocation1 + $0x10] sm:$0xff pattern:$0x75316420] }
 0x2ae   : > { %1017 = vrot.lane.b32.xlu0 %v1012_v57, %s3154_s28  ;;  %1032 = vst [vmem:[#allocation1 + $0x11] ss:$2 sm:$0xff] %v1026_v56 }
 0x2af   : > { %v989_v61 = vld.sshfl [vmem:[#allocation1 + $0x8] sm:$0xff pattern:$0x75316420]  ;;  %v988_v62 = vld.sshfl [vmem:[#allocation1] sm:$0xff pattern:$0x75316420] }
 0x2b0   : > { %970 = vrot.lane.b32.xlu1 %v966_v55, %s3152_s24  ;;  %1007 = vst [vmem:[#allocation1] ss:$2 sm:$0xff] %v1003_v58 }
 0x2b5   : > { %v1035_v63 = vld.sshfl [vmem:[#allocation1 + $0x10] sm:$0xff pattern:$0x75316420] }
 0x2b6   : > { %1040 = vrot.lane.b32.xlu2 %v1035_v63, %s3155_s29  ;;  %1054 = vst [vmem:[#allocation1 + $0x10] ss:$2 sm:$0xff] %v1049_v0  ;;  %993 = vrot.lane.b32.xlu0 %v989_v61, %s3153_s27 }
 0x2b7   : > { %v1011_v2 = vld.sshfl [vmem:[#allocation1 + $0x8] sm:$0xff pattern:$0x75316420]  ;;  %v1010_v5 = vld.sshfl [vmem:[#allocation1] sm:$0xff pattern:$0x75316420] }
 0x2b8   : > { %1030 = vst [vmem:[#allocation1 + $0x1] ss:$2 sm:$0xff] %v1025_v1 }
 0x2bd   : > { %v1057_v6 = vld.sshfl [vmem:[#allocation1 + $0x10] sm:$0xff pattern:$0x75316420] }
 0x2be   : > { %1062 = vrot.lane.b32.xlu1 %v1057_v6, %s3156_s30  ;;  %991 = vrot.lane.b32.xlu0 %v988_v62, %s3153_s27 }
 0x2bf   : > { %1015 = vrot.lane.b32.xlu2 %v1011_v2, %s3154_s28  ;;  %v1034_v8 = vld.sshfl [vmem:[#allocation1 + $0x8] sm:$0xff pattern:$0x75316420]  ;;  %v1033_v9 = vld.sshfl [vmem:[#allocation1] sm:$0xff pattern:$0x75316420] }
 0x2c0   : > { %1052 = vst [vmem:[#allocation1] ss:$2 sm:$0xff] %v1048_v7 }
 0x2c6   : > { %1038 = vrot.lane.b32.xlu1 %v1034_v8, %s3155_s29  ;;  %1036 = vrot.lane.b32.xlu0 %v1033_v9, %s3155_s29  ;;  %v1070_v9 = vld [vmem:[%s4257_s4] sm:$0xf] }
 0x2c7   : > { %1013 = vrot.lane.b32.xlu2 %v1010_v5, %s3154_s28  ;;  %v1055_v10 = vld.sshfl [vmem:[#allocation1] sm:$0xff pattern:$0x75316420]  ;;  %v1056_v14 = vld.sshfl [vmem:[#allocation1 + $0x8] sm:$0xff pattern:$0x75316420] }
 0x2ce   : > { %946 = vrot.lane.b32.xlu1 %v943_v49, %s3151_s22  ;;  %1058 = vrot.lane.b32.xlu0 %v1055_v10, %s3156_s30 }
 0x2cf   : > { %1060 = vrot.lane.b32.xlu2 %v1056_v14, %s3156_s30 }
 0x2d6   : > { %923 = vrot.lane.b32.xlu0 %v920_v39, %s3150_s21 }
 0x2d7   : > { %905 = vrot.lane.b32.xlu2 %v3435_v23, %s3149_s20 }
 0x2de   : > { %1084 = vperm.xlu0 %2895, %v1081_v15  }
 0x2df   : > { %901 = vrot.lane.b32.xlu2 %v3443_v33, %s3149_s20 }
 0x2e8   : > { %v928_v16 = vpop.permute.xlu2 %927 }
 0x2f8   : > { %v973_v17 = vpop.permute.xlu2 %972 }
 0x302   : > { %v904_v18 = vpop.permute.xlu1 %903  ;;  %v969_v19 = vpop.permute.xlu2 %968 }
 0x30a   : > { %v951_v22 = vpop.permute.xlu1 %950 }
 0x310   : > { %v1041_v24 = vpop.permute.xlu2 %1040 }
 0x312   : > { %v926_v25 = vpop.permute.xlu1 %925  ;;  %v949_v26 = vpop.permute.xlu0 %948 }
 0x313   : > { %v930_v27 = vsel %vm573_vm1, %v926_v25, %v928_v16  ;;  %v953_v23 = vsel %vm610_vm15, %v949_v26, %v951_v22 }
 0x314   : > { %934 = vst [vmem:[#allocation3 + $0x10] sm:$0xf] %v930_v27 }
 0x315   : > { %957 = vst [vmem:[#allocation3 + $0x10] sm:$0xf0] %v953_v23 }
 0x319   : > { %v1016_v30 = vpop.permute.xlu2 %1015 }
 0x31a   : > { %v996_v31 = vpop.permute.xlu1 %995 }
 0x31c   : > { %v1074_v8 = vld [vmem:[#allocation3 + $0x10] sm:$0xff] }
 0x320   : > { %v1018_v32 = vpop.permute.xlu0 %1017 }
 0x321   : > { %v1020_v34 = vsel %vm718_vm2, %v1016_v30, %v1018_v32  ;;  %v1014_v33 = vpop.permute.xlu2 %1013 }
 0x322   : > { %1024 = vst [vmem:[#allocation3 + $0x20] sm:$0xf] %v1020_v34  ;;  %v1019_v35 = vsel %vm718_vm2, %v1014_v33, %v1016_v30  ;;  %v971_v38 = vpop.permute.xlu1 %970 }
 0x323   : > { %1023 = vst [vmem:[#allocation3 + $0x8] sm:$0xf] %v1019_v35  ;;  %v974_v39 = vsel %vm645_vm3, %v969_v19, %v971_v38  ;;  %v975_v40 = vsel %vm645_vm3, %v971_v38, %v973_v17 }
 0x324   : > { %978 = vst [vmem:[#allocation3 + $0x48] sm:$0xf] %v974_v39 }
 0x325   : > { %979 = vst [vmem:[#allocation3 + $0x28] sm:$0xf] %v975_v40 }
 0x328   : > { %v994_v42 = vpop.permute.xlu0 %993 }
 0x329   : > { %v998_v43 = vsel %vm682_vm7, %v994_v42, %v996_v31  ;;  %v1061_v48 = vpop.permute.xlu2 %1060 }
 0x32a   : > { %1002 = vst [vmem:[#allocation3 + $0x28] sm:$0xf0] %v998_v43 }
 0x330   : > { %v1063_v49 = vpop.permute.xlu1 %1062  ;;  %v992_v50 = vpop.permute.xlu0 %991 }
 0x331   : > { %v1065_v47 = vsel %vm791_vm10, %v1061_v48, %v1063_v49  ;;  %v997_v53 = vsel %vm682_vm7, %v992_v50, %v994_v42  ;;  %v906_v46 = vpop.permute.xlu2 %905  ;;  %v1076_v7 = vld [vmem:[#allocation3 + $0x28] sm:$0xff] }
 0x332   : > { %1069 = vst [vmem:[#allocation3 + $0x38] sm:$0xf] %v1065_v47  ;;  %v908_v54 = vsel %vm537_vm14, %v904_v18, %v906_v46 }
 0x333   : > { %1001 = vst [vmem:[#allocation3 + $0x48] sm:$0xf0] %v997_v53 }
 0x334   : > { %912 = vst [vmem:[#allocation3] sm:$0xf0] %v908_v54 }
 0x338   : > { %v1039_v55 = vpop.permute.xlu1 %1038  ;;  %v1037_v56 = vpop.permute.xlu0 %1036 }
 0x339   : > { %v1043_v57 = vsel %vm755_vm9, %v1039_v55, %v1041_v24  ;;  %v1042_v58 = vsel %vm755_vm9, %v1037_v56, %v1039_v55  ;;  %v902_v61 = vpop.permute.xlu2 %901  ;;  %v1080_v62 = vld [vmem:[#allocation3 + $0x38] sm:$0xf] }
 0x33a   : > { %1047 = vst [vmem:[#allocation3 + $0x20] sm:$0xf0] %v1043_v57  ;;  %v907_v0 = vsel %vm537_vm14, %v902_v61, %v904_v18  ;;  %2767 = vmatpush.msk.msrb.mxu3 %vm495_vm0, %v1080_v62  ;;  %v1075_v18 = vld [vmem:[#allocation3 + $0x48] sm:$0xff] }
 0x33b   : > { %1046 = vst [vmem:[#allocation3 + $0x8] sm:$0xf0] %v1042_v58  ;;  %v1072_v10 = vld [vmem:[#allocation3] sm:$0xff] }
 0x33c   : > { %911 = vst [vmem:[#allocation3 + $0x30] sm:$0xf0] %v907_v0 }
 0x340   : > { %v947_v63 = vpop.permute.xlu1 %946  ;;  %v1059_v1 = vpop.permute.xlu0 %1058 }
 0x341   : > { %v952_v2 = vsel %vm610_vm15, %v947_v63, %v949_v26  ;;  %v1064_v5 = vsel %vm791_vm10, %v1059_v1, %v1061_v48  ;;  %v1078_v6 = vld [vmem:[#allocation3 + $0x20] sm:$0xff] }
 0x342   : > { %956 = vst [vmem:[#allocation3 + $0x18] sm:$0xf0] %v952_v2  ;;  %1128 = vmatpush.msrb.mxu3 %v1078_v6  ;;  %v1077_v17 = vld [vmem:[#allocation3 + $0x8] sm:$0xff] }
 0x343   : > { %1068 = vst [vmem:[#allocation3 + $0x40] sm:$0xf] %v1064_v5  ;;  %v1071_v22 = vld [vmem:[#allocation3 + $0x30] sm:$0xff] }
 0x344   : > { %1129 = vmatpush.msrb.mxu3 %v1076_v7 }
 0x346   : > { %1130 = vmatpush.msrb.mxu3 %v1074_v8 }
 0x348   : > { %1131 = vmatpush.msrb.mxu3 %v1072_v10  ;;  %v924_v14 = vpop.permute.xlu0 %923 }
 0x349   : > { %v929_v15 = vsel %vm573_vm1, %v924_v14, %v926_v25  ;;  %2768 = vmatmul.msk.f32.vlgmr.msrb.gmra.mxu3 %vm815_vm11, %v1070_v9 }
 0x34a   : > { %933 = vst [vmem:[#allocation3 + $0x18] sm:$0xf] %v929_v15  ;;  %v1079_v16 = vld [vmem:[#allocation3 + $0x40] sm:$0xf] }
 0x34b   : > { %2765 = vmatpush.msk.msrb.mxu2 %vm495_vm0, %v1079_v16 }
 0x34d   : > { %1108 = vmatpush.msrb.mxu2 %v1077_v17 }
 0x34f   : > { %1109 = vmatpush.msrb.mxu2 %v1075_v18 }
 0x350   : > { %v1085_v26 = vpop.permute.xlu0 %1084 }
 0x351   : > { %v1073_v19 = vld [vmem:[#allocation3 + $0x18] sm:$0xff] }
 0x352   : > { %1110 = vmatpush.msrb.mxu2 %v1073_v19 }
 0x354   : > { %1111 = vmatpush.msrb.mxu2 %v1071_v22 }
 0x355   : > { %2766 = vmatmul.msk.f32.vlgmr.msrb.gmra.mxu2 %vm815_vm11, %v1070_v9 }
 0x3cc   : > { %v1133_v24 = vpop.f32.mrf.mxu3 }
 0x3cd   : > { %v1134_v27 = vadd.f32 %v1133_v24, %v1085_v26 }
 0x3cf   : > { %v3513_v25 = vmax.f32 %v1134_v27, 0.0 }
 0x3d1   : > { %v1140_v32 = vrot.slane %v3513_v25, 4 }
 0x3d8   : > { %v1113_v23 = vpop.f32.mrf.mxu2 }
 0x3d9   : > { %v1114_v30 = vadd.f32 %v1113_v23, %v1085_v26 }
 0x3db   : > { %v3515_v31 = vmax.f32 %v1114_v30, 0.0 }
 0x3dd   : > { %v1141_v34 = vsel %vm495_vm0, %v3515_v31, %v1140_v32 }
 0x3de   : > { %1142 = vrot.lane.b32.xlu1 %v1141_v34, %s3141_s23 }
 0x450   : > { %v1143_v33 = vpop.permute.xlu1 %1142 }
 0x451   : > { %v1144_v35 = vrot.slane %v1143_v33, 4 }
 0x453   : > { %v1145_v38 = vsel %vm478_vm4, %v1144_v35, %v1143_v33  ;;  %1149 = vst.msk [vmem:[#allocation2 + $0x8] sm:$0xf] %vm486_vm5, %v1144_v35 }
 0x454   : > { %1148 = vst.msk [vmem:[#allocation2] sm:$0xff] %vm3272_vm6, %v1145_v38 }
 0x45a   : > { %v3525_v39 = vld [vmem:[#allocation2 + $0x8] sm:$0xf] }
 0x45b   : > { %v3527_v40 = vld [vmem:[#allocation2] sm:$0xff]  ;;  %v1162_v42 = vmul.f32 %v3525_v39, %v3280_v45  ;;  %v1185_v47 = vmul.f32 %v3525_v39, %v3290_v51 }
 0x45c   : > { %v1152_v43 = vmul.f32 %v3527_v40, %v3250_v13  ;;  %v1161_v48 = vmul.f32 %v3527_v40, %v3293_v52  ;;  %v1184_v45 = vmul.f32 %v3527_v40, %v3302_v59  ;;  %v1207_v52 = vmul.f32 %v3525_v39, %v3304_v60 }
 0x45d   : > { %1168 = vst [vmem:[#allocation1 + $0x11] ss:$2 sm:$0xff] %v1162_v42  ;;  %v1206_v51 = vmul.f32 %v3527_v40, %v3317_v4  ;;  %v1230_v59 = vmul.f32 %v3525_v39, %v3314_v3  ;;  %v1229_v60 = vmul.f32 %v3527_v40, %v3328_v11  ;;  %v1252_v4 = vmul.f32 %v3525_v39, %v3330_v12 }
 0x45e   : > { %1154 = vst [vmem:[#allocation1] ss:$2 sm:$0xff] %v1152_v43  ;;  %v1251_v3 = vmul.f32 %v3527_v40, %v3342_v20  ;;  %v1275_v11 = vmul.f32 %v3525_v39, %v3344_v21  ;;  %v1274_v12 = vmul.f32 %v3527_v40, %v3355_v29  ;;  %v1297_v20 = vmul.f32 %v3525_v39, %v3352_v28 }
 0x45f   : > { %v1296_v21 = vmul.f32 %v3527_v40, %v3366_v37  ;;  %v1320_v29 = vmul.f32 %v3525_v39, %v3363_v36  ;;  %v1319_v28 = vmul.f32 %v3527_v40, %v3375_v44 }
 0x464   : > { %v3535_v41 = vld.sshfl [vmem:[#allocation1 + $0x10] sm:$0xff pattern:$0x75316420] }
 0x465   : > { %v1155_v49 = vld.sshfl [vmem:[#allocation1] sm:$0xff pattern:$0x75316420]  ;;  %v1156_v50 = vld.sshfl [vmem:[#allocation1 + $0x8] sm:$0xff pattern:$0x75316420] }
 0x466   : > { %1166 = vst [vmem:[#allocation1 + $0x1] ss:$2 sm:$0xff] %v1161_v48 }
 0x467   : > { %1159 = vst [vmem:[#allocation3 + $0x30] sm:$0xf] %v1155_v49 }
 0x468   : > { %1160 = vst [vmem:[#allocation3] sm:$0xf] %v1156_v50 }
 0x469   : > { %1190 = vst [vmem:[#allocation1 + $0x10] ss:$2 sm:$0xff] %v1185_v47 }
 0x46d   : > { %v1169_v13 = vld.sshfl [vmem:[#allocation1] sm:$0xff pattern:$0x75316420]  ;;  %v3541_v53 = vld.sshfl [vmem:[#allocation1 + $0x8] sm:$0xff pattern:$0x75316420] }
 0x46e   : > { %1172 = vrot.lane.b32.xlu1 %v1169_v13, %s3149_s20  ;;  %1188 = vst [vmem:[#allocation1] ss:$2 sm:$0xff] %v1184_v45 }
 0x470   : > { %v3546_v46 = vld.sshfl [vmem:[#allocation1 + $0x10] sm:$0xff pattern:$0x75316420] }
 0x471   : > { %1213 = vst [vmem:[#allocation1 + $0x11] ss:$2 sm:$0xff] %v1207_v52 }
 0x475   : > { %v1192_v54 = vld.sshfl [vmem:[#allocation1 + $0x8] sm:$0xff pattern:$0x75316420]  ;;  %v1191_v55 = vld.sshfl [vmem:[#allocation1] sm:$0xff pattern:$0x75316420] }
 0x476   : > { %1196 = vrot.lane.b32.xlu1 %v1192_v54, %s3150_s21  ;;  %1194 = vrot.lane.b32.xlu0 %v1191_v55, %s3150_s21  ;;  %1211 = vst [vmem:[#allocation1 + $0x1] ss:$2 sm:$0xff] %v1206_v51 }
 0x478   : > { %v1216_v56 = vld.sshfl [vmem:[#allocation1 + $0x10] sm:$0xff pattern:$0x75316420] }
 0x479   : > { %1235 = vst [vmem:[#allocation1 + $0x10] ss:$2 sm:$0xff] %v1230_v59 }
 0x47d   : > { %v1215_v57 = vld.sshfl [vmem:[#allocation1 + $0x8] sm:$0xff pattern:$0x75316420]  ;;  %v1214_v58 = vld.sshfl [vmem:[#allocation1] sm:$0xff pattern:$0x75316420] }
 0x47e   : > { %1219 = vrot.lane.b32.xlu0 %v1215_v57, %s3151_s22  ;;  %1217 = vrot.lane.b32.xlu2 %v1214_v58, %s3151_s22  ;;  %1233 = vst [vmem:[#allocation1] ss:$2 sm:$0xff] %v1229_v60 }
 0x480   : > { %v1238_v61 = vld.sshfl [vmem:[#allocation1 + $0x10] sm:$0xff pattern:$0x75316420] }
 0x481   : > { %1258 = vst [vmem:[#allocation1 + $0x11] ss:$2 sm:$0xff] %v1252_v4 }
 0x485   : > { %v1237_v62 = vld.sshfl [vmem:[#allocation1 + $0x8] sm:$0xff pattern:$0x75316420]  ;;  %v1236_v0 = vld.sshfl [vmem:[#allocation1] sm:$0xff pattern:$0x75316420] }
 0x486   : > { %1241 = vrot.lane.b32.xlu0 %v1237_v62, %s3152_s24  ;;  %1239 = vrot.lane.b32.xlu2 %v1236_v0, %s3152_s24  ;;  %1256 = vst [vmem:[#allocation1 + $0x1] ss:$2 sm:$0xff] %v1251_v3  ;;  %v1341_v0 = vld [vmem:[%s4259_s6] sm:$0x1f] }
 0x488   : > { %v1261_v63 = vld.sshfl [vmem:[#allocation1 + $0x10] sm:$0xff pattern:$0x75316420] }
 0x489   : > { %1280 = vst [vmem:[#allocation1 + $0x10] ss:$2 sm:$0xff] %v1275_v11 }
 0x48d   : > { %v1260_v1 = vld.sshfl [vmem:[#allocation1 + $0x8] sm:$0xff pattern:$0x75316420]  ;;  %v1259_v2 = vld.sshfl [vmem:[#allocation1] sm:$0xff pattern:$0x75316420] }
 0x48e   : > { %1264 = vrot.lane.b32.xlu2 %v1260_v1, %s3153_s27  ;;  %1262 = vrot.lane.b32.xlu1 %v1259_v2, %s3153_s27  ;;  %1278 = vst [vmem:[#allocation1] ss:$2 sm:$0xff] %v1274_v12 }
 0x490   : > { %v1283_v5 = vld.sshfl [vmem:[#allocation1 + $0x10] sm:$0xff pattern:$0x75316420] }
 0x491   : > { %1303 = vst [vmem:[#allocation1 + $0x11] ss:$2 sm:$0xff] %v1297_v20 }
 0x495   : > { %v1282_v6 = vld.sshfl [vmem:[#allocation1 + $0x8] sm:$0xff pattern:$0x75316420]  ;;  %v1281_v7 = vld.sshfl [vmem:[#allocation1] sm:$0xff pattern:$0x75316420] }
 0x496   : > { %1286 = vrot.lane.b32.xlu2 %v1282_v6, %s3154_s28  ;;  %1284 = vrot.lane.b32.xlu1 %v1281_v7, %s3154_s28  ;;  %1301 = vst [vmem:[#allocation1 + $0x1] ss:$2 sm:$0xff] %v1296_v21 }
 0x498   : > { %v1306_v8 = vld.sshfl [vmem:[#allocation1 + $0x10] sm:$0xff pattern:$0x75316420] }
 0x499   : > { %1325 = vst [vmem:[#allocation1 + $0x10] ss:$2 sm:$0xff] %v1320_v29 }
 0x49d   : > { %v1305_v9 = vld.sshfl [vmem:[#allocation1 + $0x8] sm:$0xff pattern:$0x75316420]  ;;  %v1304_v10 = vld.sshfl [vmem:[#allocation1] sm:$0xff pattern:$0x75316420] }
 0x49e   : > { %1309 = vrot.lane.b32.xlu1 %v1305_v9, %s3155_s29  ;;  %1307 = vrot.lane.b32.xlu0 %v1304_v10, %s3155_s29  ;;  %1323 = vst [vmem:[#allocation1] ss:$2 sm:$0xff] %v1319_v28 }
 0x4a0   : > { %v1328_v36 = vld.sshfl [vmem:[#allocation1 + $0x10] sm:$0xff pattern:$0x75316420] }
 0x4a5   : > { %v1327_v37 = vld.sshfl [vmem:[#allocation1 + $0x8] sm:$0xff pattern:$0x75316420]  ;;  %v1326_v14 = vld.sshfl [vmem:[#allocation1] sm:$0xff pattern:$0x75316420] }
 0x4a6   : > { %1288 = vrot.lane.b32.xlu1 %v1283_v5, %s3154_s28  ;;  %1331 = vrot.lane.b32.xlu0 %v1327_v37, %s3156_s30 }
 0x4a7   : > { %1329 = vrot.lane.b32.xlu2 %v1326_v14, %s3156_s30 }
 0x4ae   : > { %1266 = vrot.lane.b32.xlu1 %v1261_v63, %s3153_s27  ;;  %1333 = vrot.lane.b32.xlu0 %v1328_v36, %s3156_s30 }
 0x4af   : > { %1174 = vrot.lane.b32.xlu2 %v3541_v53, %s3149_s20 }
 0x4b6   : > { %1176 = vrot.lane.b32.xlu1 %v3535_v41, %s3149_s20  ;;  %1243 = vrot.lane.b32.xlu0 %v1238_v61, %s3152_s24  ;;  %s2760_s24 = sshll.u32 %s4270_s26, 1  ;;  %s3990_s20 = sld [smem:[#allocation4 + $0x1]] }
 0x4b7   : > { %1311 = vrot.lane.b32.xlu2 %v1306_v8, %s3155_s29  ;;  %s465_s29 = scalar_lea.vmem %s4266_s13, %s2760_s24  ;;  %s4019_s24 = scalar_lea.vmem %s4265_s12, %s2856_s18 }
 0x4be   : > { %1221 = vrot.lane.b32.xlu0 %v1216_v56, %s3151_s22 }
 0x4bf   : > { %1198 = vrot.lane.b32.xlu2 %v3546_v46, %s3150_s21  ;;  %v1352_v46 = vld [vmem:[%s4260_s7] sm:$0x1f] }
 0x4c7   : > { %1355 = vperm.xlu2 %2896, %v1352_v46  }
 0x4d8   : > { %v1218_v44 = vpop.permute.xlu2 %1217 }
 0x4e0   : > { %v1173_v15 = vpop.permute.xlu1 %1172  ;;  %v1240_v16 = vpop.permute.xlu2 %1239 }
 0x4e8   : > { %v1197_v17 = vpop.permute.xlu1 %1196  ;;  %v1195_v18 = vpop.permute.xlu0 %1194 }
 0x4e9   : > { %v1200_v19 = vsel %vm573_vm1, %v1195_v18, %v1197_v17  ;;  %v1265_v22 = vpop.permute.xlu2 %1264 }
 0x4ea   : > { %1204 = vst [vmem:[#allocation3 + $0x18] sm:$0xf] %v1200_v19 }
 0x4f0   : > { %v3597_v24 = vpop.permute.xlu0 %1219 }
 0x4f1   : > { %v1223_v26 = vsel %vm610_vm15, %v1218_v44, %v3597_v24  ;;  %v1287_v23 = vpop.permute.xlu2 %1286 }
 0x4f2   : > { %1227 = vst [vmem:[#allocation3 + $0x18] sm:$0xf0] %v1223_v26 }
 0x4f8   : > { %v1242_v27 = vpop.permute.xlu0 %1241 }
 0x4f9   : > { %v1245_v30 = vsel %vm645_vm3, %v1240_v16, %v1242_v27  ;;  %v1344_v61 = vld [vmem:[#allocation3 + $0x18] sm:$0xff] }
 0x4fa   : > { %1249 = vst [vmem:[#allocation3 + $0x48] sm:$0xf] %v1245_v30 }
 0x500   : > { %v1263_v32 = vpop.permute.xlu1 %1262 }
 0x501   : > { %v1268_v34 = vsel %vm682_vm7, %v1263_v32, %v1265_v22  ;;  %v1330_v33 = vpop.permute.xlu2 %1329 }
 0x502   : > { %1272 = vst [vmem:[#allocation3 + $0x48] sm:$0xf0] %v1268_v34 }
 0x508   : > { %v1285_v35 = vpop.permute.xlu1 %1284 }
 0x509   : > { %v1290_v38 = vsel %vm718_vm2, %v1285_v35, %v1287_v23  ;;  %v1175_v39 = vpop.permute.xlu2 %1174  ;;  %v1346_v57 = vld [vmem:[#allocation3 + $0x48] sm:$0xff] }
 0x50a   : > { %1294 = vst [vmem:[#allocation3 + $0x8] sm:$0xf] %v1290_v38  ;;  %v1178_v40 = vsel %vm537_vm14, %v1173_v15, %v1175_v39 }
 0x50b   : > { %1182 = vst [vmem:[#allocation3 + $0x30] sm:$0xf0] %v1178_v40 }
 0x510   : > { %v1310_v42 = vpop.permute.xlu1 %1309  ;;  %v1308_v43 = vpop.permute.xlu0 %1307 }
 0x511   : > { %v1313_v48 = vsel %vm755_vm9, %v1308_v43, %v1310_v42  ;;  %v1312_v49 = vpop.permute.xlu2 %1311 }
 0x512   : > { %1317 = vst [vmem:[#allocation3 + $0x8] sm:$0xf0] %v1313_v48  ;;  %v1314_v50 = vsel %vm755_vm9, %v1310_v42, %v1312_v49  ;;  %v1342_v11 = vld [vmem:[#allocation3 + $0x30] sm:$0xff] }
 0x513   : > { %1318 = vst [vmem:[#allocation3 + $0x20] sm:$0xf0] %v1314_v50 }
 0x518   : > { %v1289_v41 = vpop.permute.xlu1 %1288  ;;  %v1332_v47 = vpop.permute.xlu0 %1331 }
 0x519   : > { %v1291_v45 = vsel %vm718_vm2, %v1287_v23, %v1289_v41  ;;  %v1335_v13 = vsel %vm791_vm10, %v1330_v33, %v1332_v47  ;;  %v1199_v53 = vpop.permute.xlu2 %1198  ;;  %v1348_v60 = vld [vmem:[#allocation3 + $0x8] sm:$0xff] }
 0x51a   : > { %1295 = vst [vmem:[#allocation3 + $0x20] sm:$0xf] %v1291_v45  ;;  %v1201_v52 = vsel %vm573_vm1, %v1197_v17, %v1199_v53 }
 0x51b   : > { %1339 = vst [vmem:[#allocation3 + $0x40] sm:$0xf] %v1335_v13 }
 0x51c   : > { %1205 = vst [vmem:[#allocation3 + $0x10] sm:$0xf] %v1201_v52 }
 0x520   : > { %v1267_v51 = vpop.permute.xlu1 %1266  ;;  %v1334_v54 = vpop.permute.xlu0 %1333 }
 0x521   : > { %v1269_v55 = vsel %vm682_vm7, %v1265_v22, %v1267_v51  ;;  %v1336_v59 = vsel %vm791_vm10, %v1332_v47, %v1334_v54  ;;  %v1349_v12 = vld [vmem:[#allocation3 + $0x20] sm:$0xff]  ;;  %v1356_v6 = vpop.permute.xlu2 %1355 }
 0x522   : > { %1273 = vst [vmem:[#allocation3 + $0x28] sm:$0xf0] %v1269_v55  ;;  %v1350_v56 = vld [vmem:[#allocation3 + $0x40] sm:$0xf] }
 0x523   : > { %1340 = vst [vmem:[#allocation3 + $0x38] sm:$0xf] %v1336_v59  ;;  %2769 = vmatpush.msk.msra.mxu2 %vm495_vm0, %v1350_v56 }
 0x525   : > { %1379 = vmatpush.msra.mxu2 %v1348_v60 }
 0x527   : > { %1380 = vmatpush.msra.mxu2 %v1346_v57 }
 0x528   : > { %v1177_v58 = vpop.permute.xlu1 %1176  ;;  %v1244_v4 = vpop.permute.xlu0 %1243 }
 0x529   : > { %v1179_v3 = vsel %vm537_vm14, %v1175_v39, %v1177_v58  ;;  %v1246_v62 = vsel %vm645_vm3, %v1242_v27, %v1244_v4  ;;  %1381 = vmatpush.msra.mxu2 %v1344_v61 }
 0x52a   : > { %1183 = vst [vmem:[#allocation3] sm:$0xf0] %v1179_v3  ;;  %v1351_v63 = vld [vmem:[#allocation3 + $0x38] sm:$0xf] }
 0x52b   : > { %1250 = vst [vmem:[#allocation3 + $0x28] sm:$0xf] %v1246_v62  ;;  %1382 = vmatpush.msra.mxu2 %v1342_v11  ;;  %2771 = vmatpush.msk.msra.mxu3 %vm495_vm0, %v1351_v63 }
 0x52c   : > { %2770 = vmatmul.msk.f32.vlgmr.msra.gmra.mxu2 %vm815_vm11, %v1341_v0 }
 0x52d   : > { %1399 = vmatpush.msra.mxu3 %v1349_v12 }
 0x530   : > { %v1222_v1 = vpop.permute.xlu0 %1221 }
 0x531   : > { %v1224_v2 = vsel %vm610_vm15, %v3597_v24, %v1222_v1  ;;  %v1343_v21 = vld [vmem:[#allocation3] sm:$0xff] }
 0x532   : > { %1228 = vst [vmem:[#allocation3 + $0x10] sm:$0xf0] %v1224_v2  ;;  %v1347_v20 = vld [vmem:[#allocation3 + $0x28] sm:$0xff] }
 0x533   : > { %1400 = vmatpush.msra.mxu3 %v1347_v20 }
 0x539   : > { %v1345_v5 = vld [vmem:[#allocation3 + $0x10] sm:$0xff] }
 0x53a   : > { %1401 = vmatpush.msra.mxu3 %v1345_v5 }
 0x53c   : > { %1402 = vmatpush.msra.mxu3 %v1343_v21 }
 0x53d   : > { %2772 = vmatmul.msk.f32.vlgmr.msra.gmra.mxu3 %vm815_vm11, %v1341_v0 }
 0x5af   : > { %v1384_v7 = vpop.f32.mrf.mxu2 }
 0x5b0   : > { %v1385_v29 = vadd.f32 %v1384_v7, %v1356_v6 }
 0x5b2   : > { %v3626_v8 = vmax.f32 %v1385_v29, 0.0  ;;  %v2773_v28 = vmul.f32 -1.442695, %v1385_v29 }
 0x5b4   : > { %2900 = vpow2.f32 %v2773_v28  ;;  %v1459_v9 = vmul.f32 %v3626_v8, %v3626_v8 }
 0x5b6   : > { %v1461_v10 = vsel %vm495_vm0, %v1459_v9, 0.0 }
 0x5b7   : > { %v1462_v37 = vrot.slane %v1461_v10, 4 }
 0x5b9   : > { %v1463_v14 = vadd.f32 %v1462_v37, %v1461_v10 }
 0x5ba   : > { %v2901_v36 = vpop.eup %2900 }
 0x5bb   : > { %v1415_v44 = vadd.f32 1.0, %v2901_v36  ;;  %v1464_v15 = vrot.slane %v1463_v14, 2 }
 0x5bd   : > { %2902 = vrcp.f32 %v1415_v44  ;;  %v1465_v16 = vadd.f32 %v1464_v15, %v1463_v14  ;;  %v1428_v33 = vand.u32 2147483648, %v1415_v44  ;;  %v1426_v39 = vand.u32 2147483647, %v1415_v44 }
 0x5be   : > { %vm1422_vm5 = vweird.f32 %v1415_v44 }
 0x5bf   : > { %v1466_v17 = vrot.slane %v1465_v16, 1  ;;  %v1429_v49 = vor.u32 1.1754944e-38, %v1428_v33  ;;  %vm1427_vm12 = vcmp.eq.f32.partialorder %v1426_v39, 8.507059e+37 }
 0x5c0   : > { %v1404_v18 = vpop.f32.mrf.mxu3 }
 0x5c1   : > { %v1405_v19 = vadd.f32 %v1404_v18, %v1356_v6  ;;  %v1467_v22 = vadd.f32 %v1466_v17, %v1465_v16  ;;  %v1454_v6 = vlaneseq }
 0x5c3   : > { %v2903_v24 = vpop.eup %2902  ;;  %v3631_v26 = vmax.f32 %v1405_v19, 0.0  ;;  %v2774_v27 = vmul.f32 -1.442695, %v1405_v19  ;;  %v1475_v30 = vmax.f32 %v1467_v22, 1e-24  ;;  %vm1456_vm9 = vcmp.lt.s32.totalorder %v1454_v6, 256 }
 0x5c4   : > { %v1418_v23 = vmul.f32 %v2903_v24, %v1415_v44  ;;  %vm1423_vm4 = vweird.f32 %v2903_v24 }
 0x5c5   : > { %2904 = vpow2.f32 %v2774_v27  ;;  %v1460_v32 = vmul.f32 %v3631_v26, %v3631_v26  ;;  %vm1424_vm6 = vmor %vm1422_vm5, %vm1423_vm4  ;;  %vm1483_vm14 = vweird.f32 %v1475_v30  ;;  %vm1570_vm5 = vcmask 31744  }
 0x5c6   : > { %v1419_v34 = vsub.f32 1.0, %v1418_v23  ;;  %2906 = vrsqrt.f32 %v1475_v30 }
 0x5c7   : > { %v1468_v35 = vsel %vm495_vm0, %v1460_v32, 0.0 }
 0x5c8   : > { %v1420_v38 = vmul.f32 %v2903_v24, %v1419_v34  ;;  %v1469_v40 = vrot.slane %v1468_v35, 4 }
 0x5ca   : > { %v1421_v42 = vadd.f32 %v2903_v24, %v1420_v38  ;;  %v1470_v43 = vadd.f32 %v1469_v40, %v1468_v35 }
 0x5cb   : > { %v2905_v48 = vpop.eup %2904 }
 0x5cc   : > { %v2907_v50 = vpop.eup %2906  ;;  %v1425_v41 = vsel %vm1424_vm6, %v2903_v24, %v1421_v42  ;;  %v1416_v47 = vadd.f32 1.0, %v2905_v48  ;;  %v1471_v45 = vrot.slane %v1470_v43, 2  ;;  %vm2074_vm6 = vcmask 1041408  }
 0x5cd   : > { %v1430_v13 = vsel %vm1427_vm12, %v1429_v49, %v1425_v41  ;;  %v1478_v53 = vmul.f32 %v2907_v50, %v1475_v30  ;;  %vm1484_vm13 = vweird.f32 %v2907_v50 }
 0x5ce   : > { %1449 = vst [vmem:[#allocation1] sm:$0xff] %v1430_v13  ;;  %2908 = vrcp.f32 %v1416_v47  ;;  %v1472_v52 = vadd.f32 %v1471_v45, %v1470_v43  ;;  %vm1485_vm15 = vmor %vm1483_vm14, %vm1484_vm13  ;;  %v1443_v3 = vand.u32 2147483648, %v1416_v47  ;;  %v1441_v11 = vand.u32 2147483647, %v1416_v47 }
 0x5cf   : > { %v1479_v46 = vmul.f32 %v2907_v50, %v1478_v53  ;;  %vm1437_vm2 = vweird.f32 %v1416_v47 }
 0x5d0   : > { %v1473_v51 = vrot.slane %v1472_v52, 1  ;;  %v1444_v1 = vor.u32 1.1754944e-38, %v1443_v3  ;;  %vm1442_vm7 = vcmp.eq.f32.partialorder %v1441_v11, 8.507059e+37 }
 0x5d1   : > { %v1480_v54 = vmul.f32 0.5, %v1479_v46 }
 0x5d2   : > { %v1474_v55 = vadd.f32 %v1473_v51, %v1472_v52 }
 0x5d3   : > { %v1481_v59 = vsub.f32 1.5, %v1480_v54 }
 0x5d4   : > { %v2909_v56 = vpop.eup %2908  ;;  %v1476_v57 = vmax.f32 %v1474_v55, 1e-24 }
 0x5d5   : > { %v1433_v60 = vmul.f32 %v2909_v56, %v1416_v47  ;;  %v1482_v58 = vmul.f32 %v2907_v50, %v1481_v59  ;;  %vm1438_vm1 = vweird.f32 %v2909_v56 }
 0x5d6   : > { %2910 = vrsqrt.f32 %v1476_v57  ;;  %vm1439_vm3 = vmor %vm1437_vm2, %vm1438_vm1  ;;  %vm1493_vm11 = vweird.f32 %v1476_v57 }
 0x5d7   : > { %v1434_v4 = vsub.f32 1.0, %v1433_v60  ;;  %v1486_v61 = vsel %vm1485_vm15, %v2907_v50, %v1482_v58 }
 0x5d8   : > { %v1497_v62 = vmul.f32 %v1486_v61, %v3626_v8 }
 0x5d9   : > { %v1435_v0 = vmul.f32 %v2909_v56, %v1434_v4 }
 0x5da   : > { %1501 = vxpose.xlu0.b32.start.end [1/1] (short) %v1497_v62, 128  ;;  %v3637_v63 = vadd.f32 %v1497_v62, %v1497_v62 }
 0x5db   : > { %v1436_v12 = vadd.f32 %v2909_v56, %v1435_v0 }
 0x5dc   : > { %2776 = vmatpush.msk.msrb.mxu2 %vm495_vm0, %v3637_v63  ;;  %v2911_v2 = vpop.eup %2910 }
 0x5dd   : > { %v1440_v20 = vsel %vm1439_vm3, %v2909_v56, %v1436_v12  ;;  %v1488_v21 = vmul.f32 %v2911_v2, %v1476_v57  ;;  %vm1494_vm10 = vweird.f32 %v2911_v2 }
 0x5de   : > { %v1445_v5 = vsel %vm1442_vm7, %v1444_v1, %v1440_v20  ;;  %vm1495_vm4 = vmor %vm1493_vm11, %vm1494_vm10 }
 0x5df   : > { %1450 = vst [vmem:[#allocation1 + $0x9] sm:$0xff] %v1445_v5  ;;  %v1489_v7 = vmul.f32 %v2911_v2, %v1488_v21 }
 0x5e1   : > { %v1490_v29 = vmul.f32 0.5, %v1489_v7 }
 0x5e3   : > { %v1491_v8 = vsub.f32 1.5, %v1490_v29 }
 0x5e5   : > { %v1492_v9 = vmul.f32 %v2911_v2, %v1491_v8 }
 0x5e6   : > { %v1452_v28 = vld [vmem:[#allocation1 + $0x4] ss:$9 sm:$0xff] }
 0x5e7   : > { %1458 = vst.msk [vmem:[%s465_s29] sm:$0x3] %vm1456_vm9, %v1452_v28  ;;  %v1496_v10 = vsel %vm1495_vm4, %v2911_v2, %v1492_v9 }
 0x5e8   : > { %v3646_v37 = vmul.f32 %v1496_v10, %v3631_v26 }
 0x5ea   : > { %v3650_v14 = vadd.f32 %v3646_v37, %v3646_v37 }
 0x5ec   : > { %2793 = vmatpush.msk.msrb.mxu3 %vm495_vm0, %v3650_v14 }
 0x67e   : > { %v1517_v36 = vpop.trf.xlu0 }
 0x67f   : > { %2777 = vmatmul.msk.f32.vlgmr.msrb.gmra.mxu2 %vm1570_vm5, %v1517_v36  ;;  %2794 = vmatmul.msk.f32.vlgmr.msrb.gmra.mxu3 %vm1570_vm5, %v1517_v36 }
 0x686   : > { %v1518_v44 = vpop.trf.xlu0 }
 0x687   : > { %2778 = vmatmul.msk.f32.gmra.mxu2 %vm1570_vm5, %v1518_v44  ;;  %2795 = vmatmul.msk.f32.gmra.mxu3 %vm1570_vm5, %v1518_v44 }
 0x68e   : > { %v1519_v15 = vpop.trf.xlu0 }
 0x68f   : > { %2779 = vmatmul.msk.f32.gmra.mxu2 %vm1570_vm5, %v1519_v15  ;;  %2796 = vmatmul.msk.f32.gmra.mxu3 %vm1570_vm5, %v1519_v15 }
 0x696   : > { %v1520_v16 = vpop.trf.xlu0 }
 0x697   : > { %2780 = vmatmul.msk.f32.gmra.mxu2 %vm1570_vm5, %v1520_v16  ;;  %2797 = vmatmul.msk.f32.gmra.mxu3 %vm1570_vm5, %v1520_v16 }
 0x69e   : > { %v1521_v17 = vpop.trf.xlu0 }
 0x69f   : > { %2781 = vmatmul.msk.f32.gmra.mxu2 %vm1570_vm5, %v1521_v17  ;;  %2798 = vmatmul.msk.f32.gmra.mxu3 %vm1570_vm5, %v1521_v17 }
 0x6a6   : > { %v1522_v18 = vpop.trf.xlu0 }
 0x6a7   : > { %2782 = vmatmul.msk.f32.gmra.mxu2 %vm1570_vm5, %v1522_v18  ;;  %2799 = vmatmul.msk.f32.gmra.mxu3 %vm1570_vm5, %v1522_v18 }
 0x6ae   : > { %v1523_v19 = vpop.trf.xlu0 }
 0x6af   : > { %2783 = vmatmul.msk.f32.gmra.mxu2 %vm1570_vm5, %v1523_v19  ;;  %2800 = vmatmul.msk.f32.gmra.mxu3 %vm1570_vm5, %v1523_v19 }
 0x6b6   : > { %v1524_v22 = vpop.trf.xlu0 }
 0x6b7   : > { %2784 = vmatmul.msk.f32.gmra.mxu2 %vm1570_vm5, %v1524_v22  ;;  %2801 = vmatmul.msk.f32.gmra.mxu3 %vm1570_vm5, %v1524_v22 }
 0x6be   : > { %v1525_v24 = vpop.trf.xlu0 }
 0x6bf   : > { %2785 = vmatmul.msk.f32.gmra.mxu2 %vm1570_vm5, %v1525_v24  ;;  %2802 = vmatmul.msk.f32.gmra.mxu3 %vm1570_vm5, %v1525_v24 }
 0x6c6   : > { %v1526_v26 = vpop.trf.xlu0 }
 0x6c7   : > { %2786 = vmatmul.msk.f32.gmra.mxu2 %vm1570_vm5, %v1526_v26  ;;  %2803 = vmatmul.msk.f32.gmra.mxu3 %vm1570_vm5, %v1526_v26 }
 0x6ce   : > { %v1527_v27 = vpop.trf.xlu0 }
 0x6cf   : > { %2787 = vmatmul.msk.f32.gmra.mxu2 %vm1570_vm5, %v1527_v27  ;;  %2804 = vmatmul.msk.f32.gmra.mxu3 %vm1570_vm5, %v1527_v27 }
 0x6d6   : > { %v1528_v23 = vpop.trf.xlu0 }
 0x6d7   : > { %2788 = vmatmul.msk.f32.gmra.mxu2 %vm1570_vm5, %v1528_v23  ;;  %2805 = vmatmul.msk.f32.gmra.mxu3 %vm1570_vm5, %v1528_v23 }
 0x6de   : > { %v1529_v30 = vpop.trf.xlu0 }
 0x6df   : > { %2789 = vmatmul.msk.f32.gmra.mxu2 %vm1570_vm5, %v1529_v30  ;;  %2806 = vmatmul.msk.f32.gmra.mxu3 %vm1570_vm5, %v1529_v30 }
 0x6e6   : > { %v1530_v32 = vpop.trf.xlu0 }
 0x6e7   : > { %2790 = vmatmul.msk.f32.gmra.mxu2 %vm1570_vm5, %v1530_v32  ;;  %2807 = vmatmul.msk.f32.gmra.mxu3 %vm1570_vm5, %v1530_v32 }
 0x6ee   : > { %v1531_v34 = vpop.trf.xlu0 }
 0x6ef   : > { %2791 = vmatmul.msk.f32.gmra.mxu2 %vm1570_vm5, %v1531_v34  ;;  %2808 = vmatmul.msk.f32.gmra.mxu3 %vm1570_vm5, %v1531_v34 }
 0x6f6   : > { %v1532_v33 = vpop.trf.xlu0 }
 0x6f7   : > { %2792 = vmatmul.msk.f32.gmra.mxu2 %vm1570_vm5, %v1532_v33  ;;  %2809 = vmatmul.msk.f32.gmra.mxu3 %vm1570_vm5, %v1532_v33 }
 0x702   : > { %v3686_v35 = vpop.f32.mrf.mxu2  ;;  %v3688_v38 = vpop.f32.mrf.mxu3 }
 0x703   : > { %v1755_v17 = vmax.f32 %v3686_v35, %v3688_v38 }
 0x70a   : > { %v3690_v39 = vpop.f32.mrf.mxu2  ;;  %v3692_v40 = vpop.f32.mrf.mxu3 }
 0x70b   : > { %v1758_v15 = vmax.f32 %v3690_v39, %v3692_v40 }
 0x712   : > { %v3694_v42 = vpop.f32.mrf.mxu2  ;;  %v3696_v43 = vpop.f32.mrf.mxu3 }
 0x713   : > { %v1761_v36 = vmax.f32 %v3694_v42, %v3696_v43 }
 0x71a   : > { %v3698_v48 = vpop.f32.mrf.mxu2  ;;  %v3700_v49 = vpop.f32.mrf.mxu3 }
 0x71b   : > { %v1764_v16 = vmax.f32 %v3698_v48, %v3700_v49 }
 0x722   : > { %v3702_v50 = vpop.f32.mrf.mxu2  ;;  %v3704_v41 = vpop.f32.mrf.mxu3 }
 0x723   : > { %v1767_v9 = vmax.f32 %v3702_v50, %v3704_v41 }
 0x72a   : > { %v3706_v47 = vpop.f32.mrf.mxu2  ;;  %v3708_v45 = vpop.f32.mrf.mxu3 }
 0x72b   : > { %v1770_v44 = vmax.f32 %v3706_v47, %v3708_v45 }
 0x732   : > { %v3710_v13 = vpop.f32.mrf.mxu2  ;;  %v3712_v53 = vpop.f32.mrf.mxu3 }
 0x733   : > { %v1773_v8 = vmax.f32 %v3710_v13, %v3712_v53 }
 0x73a   : > { %v3714_v52 = vpop.f32.mrf.mxu2  ;;  %v3716_v46 = vpop.f32.mrf.mxu3 }
 0x73b   : > { %v1776_v10 = vmax.f32 %v3714_v52, %v3716_v46 }
 0x742   : > { %v3718_v51 = vpop.f32.mrf.mxu2  ;;  %v3720_v54 = vpop.f32.mrf.mxu3 }
 0x743   : > { %v1779_v7 = vmax.f32 %v3718_v51, %v3720_v54 }
 0x74a   : > { %v3722_v55 = vpop.f32.mrf.mxu2  ;;  %v3724_v59 = vpop.f32.mrf.mxu3 }
 0x74b   : > { %v1782_v28 = vmax.f32 %v3722_v55, %v3724_v59 }
 0x752   : > { %v3726_v56 = vpop.f32.mrf.mxu2  ;;  %v3728_v60 = vpop.f32.mrf.mxu3 }
 0x753   : > { %v1785_v21 = vmax.f32 %v3726_v56, %v3728_v60 }
 0x75a   : > { %v3730_v57 = vpop.f32.mrf.mxu2  ;;  %v3732_v58 = vpop.f32.mrf.mxu3 }
 0x75b   : > { %v1788_v29 = vmax.f32 %v3730_v57, %v3732_v58 }
 0x762   : > { %v1678_v4 = vpop.f32.mrf.mxu2  ;;  %v1743_v61 = vpop.f32.mrf.mxu3 }
 0x763   : > { %v1791_v3 = vmax.f32 %v1678_v4, %v1743_v61 }
 0x765   : > { %1792 = vmax.xlane.f32.xlu2 %v1791_v3 }
 0x76a   : > { %v3734_v62 = vpop.f32.mrf.mxu2  ;;  %v3736_v0 = vpop.f32.mrf.mxu3 }
 0x76b   : > { %v1794_v11 = vmax.f32 %v3734_v62, %v3736_v0 }
 0x76d   : > { %1795 = vmax.xlane.f32.xlu0 %v1794_v11 }
 0x772   : > { %v1684_v12 = vpop.f32.mrf.mxu2  ;;  %v1749_v1 = vpop.f32.mrf.mxu3 }
 0x773   : > { %v1797_v2 = vmax.f32 %v1684_v12, %v1749_v1 }
 0x775   : > { %1798 = vmax.xlane.f32.xlu2 %v1797_v2 }
 0x77a   : > { %v1687_v20 = vpop.f32.mrf.mxu2  ;;  %v1752_v5 = vpop.f32.mrf.mxu3 }
 0x77b   : > { %v1800_v6 = vmax.f32 %v1687_v20, %v1752_v5 }
 0x77d   : > { %1786 = vmax.xlane.f32.xlu2 %v1785_v21  ;;  %1801 = vmax.xlane.f32.xlu1 %v1800_v6 }
 0x785   : > { %1780 = vmax.xlane.f32.xlu2 %v1779_v7  ;;  %1789 = vmax.xlane.f32.xlu1 %v1788_v29 }
 0x78d   : > { %1774 = vmax.xlane.f32.xlu2 %v1773_v8  ;;  %1783 = vmax.xlane.f32.xlu1 %v1782_v28 }
 0x795   : > { %1768 = vmax.xlane.f32.xlu2 %v1767_v9  ;;  %1777 = vmax.xlane.f32.xlu1 %v1776_v10 }
 0x79d   : > { %1762 = vmax.xlane.f32.xlu2 %v1761_v36  ;;  %1771 = vmax.xlane.f32.xlu1 %v1770_v44 }
 0x7a5   : > { %1759 = vmax.xlane.f32.xlu2 %v1758_v15  ;;  %1765 = vmax.xlane.f32.xlu1 %v1764_v16 }
 0x7ad   : > { %1756 = vmax.xlane.f32.xlu2 %v1755_v17 }
 0x7d8   : > { %v1793_v18 = vpop.xlane.xlu2 %1792 }
 0x7d9   : > { %v1827_v19 = vsub.f32 %v1678_v4, %v1793_v18  ;;  %v1828_v22 = vsub.f32 %v1743_v61, %v1793_v18 }
 0x7db   : > { %v1883_v24 = vmul.f32 1.442695, %v1827_v19  ;;  %v1885_v26 = vmul.f32 1.442695, %v1828_v22 }
 0x7dd   : > { %2912 = vpow2.f32 %v1883_v24 }
 0x7de   : > { %2914 = vpow2.f32 %v1885_v26 }
 0x7e0   : > { %v1796_v4 = vpop.xlane.xlu0 %1795 }
 0x7e1   : > { %v1829_v28 = vsub.f32 %v3734_v62, %v1796_v4  ;;  %v1830_v36 = vsub.f32 %v3736_v0, %v1796_v4 }
 0x7e3   : > { %v3764_v27 = vpop.eup %2912 }
 0x7e4   : > { %v3766_v23 = vpop.eup %2914 }
 0x7e5   : > { %v1935_v30 = vadd.f32 %v3766_v23, %v3764_v27 }
 0x7e7   : > { %1936 = vadd.xlane.f32.xlu2 %v1935_v30 }
 0x7e8   : > { %v1799_v32 = vpop.xlane.xlu2 %1798 }
 0x7e9   : > { %v1831_v34 = vsub.f32 %v1684_v12, %v1799_v32  ;;  %v1832_v33 = vsub.f32 %v1749_v1, %v1799_v32 }
 0x7eb   : > { %v1891_v3 = vmul.f32 1.442695, %v1831_v34  ;;  %v1893_v11 = vmul.f32 1.442695, %v1832_v33 }
 0x7ed   : > { %2916 = vpow2.f32 %v1891_v3 }
 0x7ee   : > { %2918 = vpow2.f32 %v1893_v11 }
 0x7f0   : > { %v1787_v61 = vpop.xlane.xlu2 %1786  ;;  %v1802_v2 = vpop.xlane.xlu1 %1801 }
 0x7f1   : > { %v1823_v21 = vsub.f32 %v3726_v56, %v1787_v61  ;;  %v1824_v6 = vsub.f32 %v3728_v60, %v1787_v61  ;;  %v1833_v7 = vsub.f32 %v1687_v20, %v1802_v2  ;;  %v1834_v29 = vsub.f32 %v1752_v5, %v1802_v2 }
 0x7f2   : > { %v1887_v60 = vmul.f32 1.442695, %v1829_v28  ;;  %v1889_v20 = vmul.f32 1.442695, %v1830_v36 }
 0x7f3   : > { %v3772_v8 = vpop.eup %2916  ;;  %v1875_v9 = vmul.f32 1.442695, %v1823_v21  ;;  %v1877_v12 = vmul.f32 1.442695, %v1824_v6  ;;  %v1895_v1 = vmul.f32 1.442695, %v1833_v7 }
 0x7f4   : > { %v3775_v10 = vpop.eup %2918  ;;  %v1897_v44 = vmul.f32 1.442695, %v1834_v29 }
 0x7f5   : > { %2920 = vpow2.f32 %v1875_v9  ;;  %v1941_v56 = vadd.f32 %v3775_v10, %v3772_v8 }
 0x7f6   : > { %2922 = vpow2.f32 %v1877_v12 }
 0x7f7   : > { %2924 = vpow2.f32 %v1895_v1  ;;  %1942 = vadd.xlane.f32.xlu1 %v1941_v56 }
 0x7f8   : > { %2926 = vpow2.f32 %v1897_v44  ;;  %v1781_v5 = vpop.xlane.xlu2 %1780  ;;  %v1790_v62 = vpop.xlane.xlu1 %1789 }
 0x7f9   : > { %v1819_v15 = vsub.f32 %v3718_v51, %v1781_v5  ;;  %v1820_v16 = vsub.f32 %v3720_v54, %v1781_v5  ;;  %2928 = vpow2.f32 %v1887_v60  ;;  %v1825_v19 = vsub.f32 %v3730_v57, %v1790_v62 }
 0x7fa   : > { %2930 = vpow2.f32 %v1889_v20  ;;  %v1826_v24 = vsub.f32 %v3732_v58, %v1790_v62 }
 0x7fb   : > { %v3782_v17 = vpop.eup %2920  ;;  %v1867_v0 = vmul.f32 1.442695, %v1819_v15  ;;  %v1869_v18 = vmul.f32 1.442695, %v1820_v16  ;;  %v1879_v54 = vmul.f32 1.442695, %v1825_v19 }
 0x7fc   : > { %v3785_v22 = vpop.eup %2922  ;;  %v1881_v57 = vmul.f32 1.442695, %v1826_v24 }
 0x7fd   : > { %v3788_v26 = vpop.eup %2924  ;;  %2932 = vpow2.f32 %v1867_v0  ;;  %v1929_v51 = vadd.f32 %v3785_v22, %v3782_v17 }
 0x7fe   : > { %v3792_v30 = vpop.eup %2926  ;;  %2934 = vpow2.f32 %v1869_v18 }
 0x7ff   : > { %1930 = vadd.xlane.f32.xlu2 %v1929_v51  ;;  %v1944_v32 = vadd.f32 %v3792_v30, %v3788_v26  ;;  %v3796_v3 = vpop.eup %2928  ;;  %2936 = vpow2.f32 %v1879_v54 }
 0x800   : > { %v1775_v34 = vpop.xlane.xlu2 %1774  ;;  %v1784_v33 = vpop.xlane.xlu1 %1783  ;;  %2938 = vpow2.f32 %v1881_v57 }
 0x801   : > { %1945 = vadd.xlane.f32.xlu1 %v1944_v32  ;;  %v1815_v58 = vsub.f32 %v3710_v13, %v1775_v34  ;;  %v1816_v11 = vsub.f32 %v3712_v53, %v1775_v34  ;;  %v3800_v4 = vpop.eup %2930  ;;  %v1821_v6 = vsub.f32 %v3722_v55, %v1784_v33  ;;  %v1822_v29 = vsub.f32 %v3724_v59, %v1784_v33 }
 0x802   : > { %v1938_v28 = vadd.f32 %v3800_v4, %v3796_v3 }
 0x803   : > { %v3802_v61 = vpop.eup %2932  ;;  %v1859_v2 = vmul.f32 1.442695, %v1815_v58  ;;  %v1861_v21 = vmul.f32 1.442695, %v1816_v11  ;;  %v1871_v53 = vmul.f32 1.442695, %v1821_v6 }
 0x804   : > { %v3805_v7 = vpop.eup %2934  ;;  %v1873_v9 = vmul.f32 1.442695, %v1822_v29 }
 0x805   : > { %2940 = vpow2.f32 %v1859_v2  ;;  %v1923_v13 = vadd.f32 %v3805_v7, %v3802_v61  ;;  %v3812_v36 = vpop.eup %2936 }
 0x806   : > { %2942 = vpow2.f32 %v1861_v21  ;;  %v3816_v44 = vpop.eup %2938 }
 0x807   : > { %1924 = vadd.xlane.f32.xlu2 %v1923_v13  ;;  %2944 = vpow2.f32 %v1871_v53  ;;  %v1932_v16 = vadd.f32 %v3816_v44, %v3812_v36 }
 0x808   : > { %v1769_v12 = vpop.xlane.xlu2 %1768  ;;  %v1778_v1 = vpop.xlane.xlu1 %1777  ;;  %2946 = vpow2.f32 %v1873_v9 }
 0x809   : > { %1939 = vadd.xlane.f32.xlu1 %v1938_v28  ;;  %v1811_v55 = vsub.f32 %v3702_v50, %v1769_v12  ;;  %v1812_v59 = vsub.f32 %v3704_v41, %v1769_v12  ;;  %v1817_v5 = vsub.f32 %v3714_v52, %v1778_v1  ;;  %v1818_v15 = vsub.f32 %v3716_v46, %v1778_v1 }
 0x80b   : > { %v3818_v56 = vpop.eup %2940  ;;  %v1851_v60 = vmul.f32 1.442695, %v1811_v55  ;;  %v1853_v20 = vmul.f32 1.442695, %v1812_v59  ;;  %v1863_v41 = vmul.f32 1.442695, %v1817_v5 }
 0x80c   : > { %v3821_v62 = vpop.eup %2942  ;;  %v1865_v0 = vmul.f32 1.442695, %v1818_v15 }
 0x80d   : > { %2948 = vpow2.f32 %v1851_v60  ;;  %v1917_v50 = vadd.f32 %v3821_v62, %v3818_v56  ;;  %v3828_v24 = vpop.eup %2944 }
 0x80e   : > { %2950 = vpow2.f32 %v1853_v20  ;;  %v3832_v51 = vpop.eup %2946 }
 0x80f   : > { %1918 = vadd.xlane.f32.xlu2 %v1917_v50  ;;  %2952 = vpow2.f32 %v1863_v41 }
 0x810   : > { %v1763_v18 = vpop.xlane.xlu2 %1762  ;;  %v1772_v19 = vpop.xlane.xlu1 %1771  ;;  %2954 = vpow2.f32 %v1865_v0 }
 0x811   : > { %1933 = vadd.xlane.f32.xlu1 %v1932_v16  ;;  %v1807_v52 = vsub.f32 %v3694_v42, %v1763_v18  ;;  %v1808_v46 = vsub.f32 %v3696_v43, %v1763_v18  ;;  %v1813_v33 = vsub.f32 %v3706_v47, %v1772_v19  ;;  %v1814_v42 = vsub.f32 %v3708_v45, %v1772_v19 }
 0x812   : > { %v1926_v43 = vadd.f32 %v3832_v51, %v3828_v24 }
 0x813   : > { %v3834_v54 = vpop.eup %2948  ;;  %v1843_v32 = vmul.f32 1.442695, %v1807_v52  ;;  %v1845_v57 = vmul.f32 1.442695, %v1808_v46  ;;  %v1855_v6 = vmul.f32 1.442695, %v1813_v33 }
 0x814   : > { %v3836_v34 = vpop.eup %2950  ;;  %v1857_v13 = vmul.f32 1.442695, %v1814_v42 }
 0x815   : > { %2956 = vpow2.f32 %v1843_v32  ;;  %v1911_v58 = vadd.f32 %v3836_v34, %v3834_v54  ;;  %v3844_v21 = vpop.eup %2952 }
 0x816   : > { %2958 = vpow2.f32 %v1845_v57  ;;  %v3846_v29 = vpop.eup %2954 }
 0x817   : > { %1912 = vadd.xlane.f32.xlu2 %v1911_v58  ;;  %2960 = vpow2.f32 %v1855_v6  ;;  %v1920_v1 = vadd.f32 %v3846_v29, %v3844_v21 }
 0x818   : > { %v1760_v11 = vpop.xlane.xlu2 %1759  ;;  %v1766_v2 = vpop.xlane.xlu1 %1765  ;;  %2962 = vpow2.f32 %v1857_v13 }
 0x819   : > { %1927 = vadd.xlane.f32.xlu1 %v1926_v43  ;;  %v1809_v53 = vsub.f32 %v3698_v48, %v1766_v2  ;;  %v1810_v45 = vsub.f32 %v3700_v49, %v1766_v2  ;;  %v1805_v50 = vsub.f32 %v3690_v39, %v1760_v11  ;;  %v1806_v41 = vsub.f32 %v3692_v40, %v1760_v11 }
 0x81b   : > { %v3848_v47 = vpop.eup %2956  ;;  %v1847_v12 = vmul.f32 1.442695, %v1809_v53  ;;  %v1849_v55 = vmul.f32 1.442695, %v1810_v45  ;;  %v1841_v18 = vmul.f32 1.442695, %v1806_v41 }
 0x81c   : > { %v3851_v28 = vpop.eup %2958 }
 0x81d   : > { %v1905_v9 = vadd.f32 %v3851_v28, %v3848_v47  ;;  %v3860_v20 = vpop.eup %2960  ;;  %2964 = vpow2.f32 %v1847_v12 }
 0x81e   : > { %v3862_v15 = vpop.eup %2962  ;;  %2966 = vpow2.f32 %v1849_v55 }
 0x81f   : > { %1906 = vadd.xlane.f32.xlu2 %v1905_v9  ;;  %v1914_v16 = vadd.f32 %v3862_v15, %v3860_v20 }
 0x820   : > { %v1757_v59 = vpop.xlane.xlu2 %1756 }
 0x821   : > { %1921 = vadd.xlane.f32.xlu1 %v1920_v1  ;;  %v1803_v60 = vsub.f32 %v3686_v35, %v1757_v59  ;;  %v1804_v48 = vsub.f32 %v3688_v38, %v1757_v59  ;;  %v1839_v38 = vmul.f32 1.442695, %v1805_v50 }
 0x823   : > { %v1835_v49 = vmul.f32 1.442695, %v1803_v60  ;;  %v1837_v5 = vmul.f32 1.442695, %v1804_v48  ;;  %v3868_v35 = vpop.eup %2964 }
 0x824   : > { %v3870_v0 = vpop.eup %2966 }
 0x825   : > { %2968 = vpow2.f32 %v1835_v49  ;;  %v1908_v40 = vadd.f32 %v3870_v0, %v3868_v35 }
 0x826   : > { %2970 = vpow2.f32 %v1837_v5 }
 0x827   : > { %2972 = vpow2.f32 %v1839_v38 }
 0x828   : > { %2974 = vpow2.f32 %v1841_v18 }
 0x829   : > { %1915 = vadd.xlane.f32.xlu1 %v1914_v16 }
 0x82b   : > { %v3872_v19 = vpop.eup %2968 }
 0x82c   : > { %v3874_v52 = vpop.eup %2970 }
 0x82d   : > { %v1899_v39 = vadd.f32 %v3874_v52, %v3872_v19  ;;  %v3880_v46 = vpop.eup %2972 }
 0x82e   : > { %v3882_v32 = vpop.eup %2974 }
 0x82f   : > { %1900 = vadd.xlane.f32.xlu2 %v1899_v39  ;;  %v1902_v57 = vadd.f32 %v3882_v32, %v3880_v46 }
 0x831   : > { %1909 = vadd.xlane.f32.xlu1 %v1908_v40 }
 0x839   : > { %1903 = vadd.xlane.f32.xlu1 %v1902_v57 }
 0x858   : > { %1533 = vxpose.xlu2.b32.start.end [1/1] (short) %v3646_v37, 128 }
 0x85a   : > { %v1937_v58 = vpop.xlane.xlu2 %1936 }
 0x86a   : > { %v1943_v33 = vpop.xlane.xlu1 %1942 }
 0x872   : > { %v1931_v11 = vpop.xlane.xlu2 %1930 }
 0x874   : > { %v1946_v42 = vpop.xlane.xlu1 %1945 }
 0x875   : > { %2976 = vrcp.f32 %v1946_v42 }
 0x876   : > { %2978 = vrcp.f32 %v1943_v33 }
 0x87b   : > { %v2977_v43 = vpop.eup %2976 }
 0x87c   : > { %v1940_v2 = vpop.xlane.xlu1 %1939  ;;  %v1993_v6 = vmul.f32 %v2977_v43, %v3788_v26  ;;  %v1994_v13 = vmul.f32 %v2977_v43, %v3792_v30  ;;  %v2979_v53 = vpop.eup %2978 }
 0x87d   : > { %2980 = vrcp.f32 %v1940_v2  ;;  %v1991_v45 = vmul.f32 %v2979_v53, %v3772_v8  ;;  %v1992_v37 = vmul.f32 %v2979_v53, %v3775_v10  ;;  %v1925_v30 = vpop.xlane.xlu2 %1924 }
 0x87e   : > { %1995 = vmatpush.xpose.msra.mxu0 %v1993_v6  ;;  %2015 = vmatpush.xpose.msra.mxu1 %v1994_v13  ;;  %2982 = vrcp.f32 %v1937_v58 }
 0x882   : > { %1996 = vmatpush.xpose.msra.mxu0 %v1991_v45  ;;  %2016 = vmatpush.xpose.msra.mxu1 %v1992_v37 }
 0x883   : > { %v2981_v9 = vpop.eup %2980 }
 0x884   : > { %v1934_v12 = vpop.xlane.xlu1 %1933  ;;  %v1989_v1 = vmul.f32 %v2981_v9, %v3796_v3  ;;  %v1990_v55 = vmul.f32 %v2981_v9, %v3800_v4  ;;  %v2983_v26 = vpop.eup %2982  ;;  %v3935_v9 = vld [vmem:[%s4261_s8] sm:$0x3] }
 0x885   : > { %2984 = vrcp.f32 %v1934_v12  ;;  %v1987_v59 = vmul.f32 %v2983_v26, %v3764_v27  ;;  %v1988_v8 = vmul.f32 %v2983_v26, %v3766_v23  ;;  %v1919_v4 = vpop.xlane.xlu2 %1918 }
 0x886   : > { %1997 = vmatpush.xpose.msra.mxu0 %v1989_v1  ;;  %2017 = vmatpush.xpose.msra.mxu1 %v1990_v55  ;;  %2986 = vrcp.f32 %v1931_v11 }
 0x88a   : > { %1998 = vmatpush.xpose.msra.mxu0 %v1987_v59  ;;  %2018 = vmatpush.xpose.msra.mxu1 %v1988_v8 }
 0x88b   : > { %v2985_v10 = vpop.eup %2984 }
 0x88c   : > { %v1928_v60 = vpop.xlane.xlu1 %1927  ;;  %v1985_v48 = vmul.f32 %v2985_v10, %v3812_v36  ;;  %v1986_v3 = vmul.f32 %v2985_v10, %v3816_v44  ;;  %v2987_v49 = vpop.eup %2986 }
 0x88d   : > { %2988 = vrcp.f32 %v1928_v60  ;;  %v1983_v5 = vmul.f32 %v2987_v49, %v3782_v17  ;;  %v1984_v27 = vmul.f32 %v2987_v49, %v3785_v22  ;;  %v1913_v17 = vpop.xlane.xlu2 %1912 }
 0x88e   : > { %1999 = vmatpush.xpose.msra.mxu0 %v1985_v48  ;;  %2019 = vmatpush.xpose.msra.mxu1 %v1986_v3  ;;  %2990 = vrcp.f32 %v1925_v30 }
 0x892   : > { %2000 = vmatpush.xpose.msra.mxu0 %v1983_v5  ;;  %2020 = vmatpush.xpose.msra.mxu1 %v1984_v27 }
 0x893   : > { %v2989_v23 = vpop.eup %2988 }
 0x894   : > { %v1922_v50 = vpop.xlane.xlu1 %1921  ;;  %v1981_v41 = vmul.f32 %v2989_v23, %v3828_v24  ;;  %v1982_v36 = vmul.f32 %v2989_v23, %v3832_v51  ;;  %v2991_v16 = vpop.eup %2990 }
 0x895   : > { %2992 = vrcp.f32 %v1922_v50  ;;  %v1979_v44 = vmul.f32 %v2991_v16, %v3802_v61  ;;  %v1980_v38 = vmul.f32 %v2991_v16, %v3805_v7  ;;  %v1907_v57 = vpop.xlane.xlu2 %1906 }
 0x896   : > { %2001 = vmatpush.xpose.msra.mxu0 %v1981_v41  ;;  %2021 = vmatpush.xpose.msra.mxu1 %v1982_v36  ;;  %2994 = vrcp.f32 %v1919_v4 }
 0x89a   : > { %2002 = vmatpush.xpose.msra.mxu0 %v1979_v44  ;;  %2022 = vmatpush.xpose.msra.mxu1 %v1980_v38  ;;  %v2070_v38 = vstv %s3990_s20 }
 0x89b   : > { %v2993_v22 = vpop.eup %2992 }
 0x89c   : > { %v1916_v18 = vpop.xlane.xlu1 %1915  ;;  %v1977_v39 = vmul.f32 %v2993_v22, %v3844_v21  ;;  %v1978_v24 = vmul.f32 %v2993_v22, %v3846_v29  ;;  %v2995_v40 = vpop.eup %2994 }
 0x89d   : > { %2996 = vrcp.f32 %v1916_v18  ;;  %v1975_v51 = vmul.f32 %v2995_v40, %v3818_v56  ;;  %v1976_v61 = vmul.f32 %v2995_v40, %v3821_v62 }
 0x89e   : > { %2003 = vmatpush.xpose.msra.mxu0 %v1977_v39  ;;  %2023 = vmatpush.xpose.msra.mxu1 %v1978_v24  ;;  %2998 = vrcp.f32 %v1913_v17 }
 0x8a2   : > { %2004 = vmatpush.xpose.msra.mxu0 %v1975_v51  ;;  %2024 = vmatpush.xpose.msra.mxu1 %v1976_v61  ;;  %v1901_v43 = vpop.xlane.xlu2 %1900 }
 0x8a3   : > { %v2997_v7 = vpop.eup %2996 }
 0x8a4   : > { %v1910_v33 = vpop.xlane.xlu1 %1909  ;;  %v1973_v58 = vmul.f32 %v2997_v7, %v3860_v20  ;;  %v1974_v21 = vmul.f32 %v2997_v7, %v3862_v15  ;;  %v2999_v42 = vpop.eup %2998 }
 0x8a5   : > { %3000 = vrcp.f32 %v1910_v33  ;;  %v1971_v29 = vmul.f32 %v2999_v42, %v3834_v54  ;;  %v1972_v56 = vmul.f32 %v2999_v42, %v3836_v34 }
 0x8a6   : > { %2005 = vmatpush.xpose.msra.mxu0 %v1973_v58  ;;  %2025 = vmatpush.xpose.msra.mxu1 %v1974_v21  ;;  %3002 = vrcp.f32 %v1907_v57 }
 0x8aa   : > { %2006 = vmatpush.xpose.msra.mxu0 %v1971_v29  ;;  %2026 = vmatpush.xpose.msra.mxu1 %v1972_v56 }
 0x8ab   : > { %v3001_v62 = vpop.eup %3000 }
 0x8ac   : > { %v1904_v11 = vpop.xlane.xlu1 %1903  ;;  %v1969_v2 = vmul.f32 %v3001_v62, %v3868_v35  ;;  %v1970_v20 = vmul.f32 %v3001_v62, %v3870_v0  ;;  %v3003_v6 = vpop.eup %3002 }
 0x8ad   : > { %3004 = vrcp.f32 %v1904_v11  ;;  %v1967_v15 = vmul.f32 %v3003_v6, %v3848_v47  ;;  %v1968_v54 = vmul.f32 %v3003_v6, %v3851_v28  ;;  %v1568_v47 = vld [vmem:[%s4262_s9] sm:$0x3] }
 0x8ae   : > { %2007 = vmatpush.xpose.msra.mxu0 %v1969_v2  ;;  %2027 = vmatpush.xpose.msra.mxu1 %v1970_v20  ;;  %3006 = vrcp.f32 %v1901_v43 }
 0x8af   : > { %2040 = vperm.xlu1 %2897, %v1568_v47  }
 0x8b2   : > { %2008 = vmatpush.xpose.msra.mxu0 %v1967_v15  ;;  %2028 = vmatpush.xpose.msra.mxu1 %v1968_v54 }
 0x8b3   : > { %v3005_v34 = vpop.eup %3004 }
 0x8b4   : > { %v1965_v13 = vmul.f32 %v3005_v34, %v3880_v46  ;;  %v1966_v53 = vmul.f32 %v3005_v34, %v3882_v32  ;;  %v3007_v45 = vpop.eup %3006 }
 0x8b5   : > { %v1963_v35 = vmul.f32 %v3007_v45, %v3872_v19  ;;  %v1964_v0 = vmul.f32 %v3007_v45, %v3874_v52  ;;  %v2035_v19 = vstv %s3924_s19 }
 0x8b6   : > { %2009 = vmatpush.xpose.msra.mxu0 %v1965_v13  ;;  %2029 = vmatpush.xpose.msra.mxu1 %v1966_v53 }
 0x8ba   : > { %2010 = vmatpush.xpose.msra.mxu0 %v1963_v35  ;;  %2030 = vmatpush.xpose.msra.mxu1 %v1964_v0 }
 0x8bd   : > { %2011 = vmatmul.f32.vlgmr.msra.gmra.mxu0 %v3515_v31  ;;  %2031 = vmatmul.f32.vlgmr.msra.gmra.mxu1 %v3513_v25 }
 0x8f1   : > { %v1549_v12 = vpop.trf.xlu2 }
 0x8f9   : > { %v1550_v1 = vpop.trf.xlu2 }
 0x901   : > { %v1551_v55 = vpop.trf.xlu2 }
 0x909   : > { %v1552_v30 = vpop.trf.xlu2 }
 0x911   : > { %v1553_v60 = vpop.trf.xlu2 }
 0x919   : > { %v1554_v48 = vpop.trf.xlu2 }
 0x921   : > { %v3946_v26 = vpop.permute.xlu1 %2040  ;;  %v1555_v3 = vpop.trf.xlu2 }
 0x929   : > { %v1556_v49 = vpop.trf.xlu2 }
 0x93a   : > { %v2012_v28 = vpop.f32.mrf.mxu0  ;;  %v2032_v46 = vpop.f32.mrf.mxu1 }
 0x93b   : > { %v2033_v32 = vadd.f32 %v2032_v46, %v2012_v28 }
 0x93d   : > { %v2036_v52 = vmul.f32 %v2035_v19, %v2033_v32 }
 0x93f   : > { %v3930_v37 = vadd.f32 %v2036_v52, %v3515_v31 }
 0x941   : > { %2810 = vmatpush.msk.msrb.mxu0 %vm495_vm0, %v3930_v37 }
 0x942   : > { %2811 = vmatmul.msk.f32.vlgmr.msrb.gmra.mxu0 %vm1570_vm5, %v3935_v9 }
 0x943   : > { %2815 = vmatpush.msk.msra.mxu0 %vm495_vm0, %v3637_v63  ;;  %v3953_v63 = vld [vmem:[%s4263_s10] sm:$0x1] }
 0x94a   : > { %2816 = vmatmul.msk.f32.vlgmr.msra.gmra.mxu0 %vm1570_vm5, %v1549_v12 }
 0x952   : > { %2817 = vmatmul.msk.f32.gmra.mxu0 %vm1570_vm5, %v1550_v1 }
 0x95a   : > { %2818 = vmatmul.msk.f32.gmra.mxu0 %vm1570_vm5, %v1551_v55 }
 0x962   : > { %2819 = vmatmul.msk.f32.gmra.mxu0 %vm1570_vm5, %v1552_v30 }
 0x96a   : > { %2820 = vmatmul.msk.f32.gmra.mxu0 %vm1570_vm5, %v1553_v60 }
 0x972   : > { %2821 = vmatmul.msk.f32.gmra.mxu0 %vm1570_vm5, %v1554_v48 }
 0x97a   : > { %2822 = vmatmul.msk.f32.gmra.mxu0 %vm1570_vm5, %v1555_v3 }
 0x982   : > { %2823 = vmatmul.msk.f32.gmra.mxu0 %vm1570_vm5, %v1556_v49 }
 0x9bf   : > { %v2066_v59 = vpop.f32.mrf.mxu0 }
 0x9c0   : > { %v2067_v8 = vadd.f32 %v2066_v59, %v3946_v26 }
 0x9c2   : > { %v2069_v10 = vmax.f32 %v2067_v8, 0.0 }
 0x9c4   : > { %2812 = vmatpush.msk.msrb.mxu1 %vm2074_vm6, %v2069_v10 }
 0x9c5   : > { %2813 = vmatmul.msk.f32.vlgmr.msrb.gmra.mxu1 %vm553_vm8, %v3953_v63 }
 0x9c6   : > { %2832 = vmatpush.msk.msra.mxu1 %vm495_vm0, %v3650_v14  ;;  %v1557_v14 = vpop.trf.xlu2 }
 0x9c7   : > { %2824 = vmatmul.msk.f32.gmra.mxu0 %vm1570_vm5, %v1557_v14  ;;  %v3983_v36 = vpop.f32.mrf.mxu0 }
 0x9cd   : > { %2833 = vmatmul.msk.f32.vlgmr.msra.gmra.mxu1 %vm1570_vm5, %v1549_v12 }
 0x9ce   : > { %v1558_v4 = vpop.trf.xlu2 }
 0x9cf   : > { %2825 = vmatmul.msk.f32.gmra.mxu0 %vm1570_vm5, %v1558_v4  ;;  %v3988_v44 = vpop.f32.mrf.mxu0 }
 0x9d5   : > { %2834 = vmatmul.msk.f32.gmra.mxu1 %vm1570_vm5, %v1550_v1 }
 0x9d6   : > { %v1559_v5 = vpop.trf.xlu2 }
 0x9d7   : > { %2826 = vmatmul.msk.f32.gmra.mxu0 %vm1570_vm5, %v1559_v5  ;;  %v3994_v17 = vpop.f32.mrf.mxu0 }
 0x9dd   : > { %2835 = vmatmul.msk.f32.gmra.mxu1 %vm1570_vm5, %v1551_v55 }
 0x9de   : > { %v1560_v27 = vpop.trf.xlu2 }
 0x9df   : > { %2827 = vmatmul.msk.f32.gmra.mxu0 %vm1570_vm5, %v1560_v27  ;;  %v4001_v40 = vpop.f32.mrf.mxu0 }
 0x9e5   : > { %2836 = vmatmul.msk.f32.gmra.mxu1 %vm1570_vm5, %v1552_v30 }
 0x9e6   : > { %v1561_v23 = vpop.trf.xlu2 }
 0x9e7   : > { %2828 = vmatmul.msk.f32.gmra.mxu0 %vm1570_vm5, %v1561_v23  ;;  %v4005_v57 = vpop.f32.mrf.mxu0 }
 0x9ed   : > { %2837 = vmatmul.msk.f32.gmra.mxu1 %vm1570_vm5, %v1553_v60 }
 0x9ee   : > { %v1562_v50 = vpop.trf.xlu2 }
 0x9ef   : > { %2829 = vmatmul.msk.f32.gmra.mxu0 %vm1570_vm5, %v1562_v50  ;;  %v4009_v2 = vpop.f32.mrf.mxu0 }
 0x9f5   : > { %2838 = vmatmul.msk.f32.gmra.mxu1 %vm1570_vm5, %v1554_v48 }
 0x9f6   : > { %v1563_v41 = vpop.trf.xlu2 }
 0x9f7   : > { %2830 = vmatmul.msk.f32.gmra.mxu0 %vm1570_vm5, %v1563_v41  ;;  %v4023_v53 = vpop.f32.mrf.mxu0 }
 0x9fd   : > { %2839 = vmatmul.msk.f32.gmra.mxu1 %vm1570_vm5, %v1555_v3 }
 0x9fe   : > { %v1564_v16 = vpop.trf.xlu2 }
 0x9ff   : > { %2831 = vmatmul.msk.f32.gmra.mxu0 %vm1570_vm5, %v1564_v16  ;;  %v4029_v0 = vpop.f32.mrf.mxu0 }
 0xa05   : > { %2840 = vmatmul.msk.f32.gmra.mxu1 %vm1570_vm5, %v1556_v49 }
 0xa0d   : > { %2841 = vmatmul.msk.f32.gmra.mxu1 %vm1570_vm5, %v1557_v14 }
 0xa15   : > { %2842 = vmatmul.msk.f32.gmra.mxu1 %vm1570_vm5, %v1558_v4 }
 0xa1d   : > { %2843 = vmatmul.msk.f32.gmra.mxu1 %vm1570_vm5, %v1559_v5 }
 0xa25   : > { %2844 = vmatmul.msk.f32.gmra.mxu1 %vm1570_vm5, %v1560_v27 }
 0xa2d   : > { %2845 = vmatmul.msk.f32.gmra.mxu1 %vm1570_vm5, %v1561_v23 }
 0xa35   : > { %2846 = vmatmul.msk.f32.gmra.mxu1 %vm1570_vm5, %v1562_v50 }
 0xa3d   : > { %2847 = vmatmul.msk.f32.gmra.mxu1 %vm1570_vm5, %v1563_v41 }
 0xa42   : > { %v2095_v22 = vpop.f32.mrf.mxu1 }
 0xa43   : > { %v2096_v18 = vadd.f32 %v2095_v22, %v2070_v38 }
 0xa44   : > { %v4033_v28 = vpop.f32.mrf.mxu0 }
 0xa45   : > { %v2814_v39 = vmul.f32 -1.442695, %v2096_v18  ;;  %2848 = vmatmul.msk.f32.gmra.mxu1 %vm1570_vm5, %v1564_v16 }
 0xa47   : > { %3008 = vpow2.f32 %v2814_v39 }
 0xa4a   : > { %v3999_v24 = vpop.f32.mrf.mxu1 }
 0xa4c   : > { %v4039_v52 = vpop.f32.mrf.mxu0 }
 0xa4d   : > { %v3009_v51 = vpop.eup %3008 }
 0xa4e   : > { %v2101_v61 = vadd.f32 1.0, %v3009_v51 }
 0xa50   : > { %3010 = vrcp.f32 %v2101_v61  ;;  %v2113_v42 = vand.u32 2147483648, %v2101_v61  ;;  %v2111_v62 = vand.u32 2147483647, %v2101_v61  ;;  %vm2107_vm13 = vweird.f32 %v2101_v61 }
 0xa52   : > { %v4003_v7 = vpop.f32.mrf.mxu1  ;;  %v2114_v11 = vor.u32 1.1754944e-38, %v2113_v42  ;;  %vm2112_vm15 = vcmp.eq.f32.partialorder %v2111_v62, 8.507059e+37  ;;  %v2299_v42 = vmax.f32 %v3983_v36, %v3999_v24 }
 0xa54   : > { %v4045_v1 = vpop.f32.mrf.mxu0 }
 0xa56   : > { %v3011_v33 = vpop.eup %3010 }
 0xa57   : > { %v2103_v58 = vmul.f32 %v3011_v33, %v2101_v61  ;;  %vm2108_vm12 = vweird.f32 %v3011_v33 }
 0xa58   : > { %vm2109_vm14 = vmor %vm2107_vm13, %vm2108_vm12 }
 0xa59   : > { %v2104_v21 = vsub.f32 1.0, %v2103_v58 }
 0xa5a   : > { %v4007_v29 = vpop.f32.mrf.mxu1 }
 0xa5b   : > { %v2105_v56 = vmul.f32 %v3011_v33, %v2104_v21  ;;  %v2305_v58 = vmax.f32 %v3994_v17, %v4007_v29  ;;  %v2302_v21 = vmax.f32 %v3988_v44, %v4003_v7 }
 0xa5c   : > { %v4053_v8 = vpop.f32.mrf.mxu0 }
 0xa5d   : > { %v2106_v43 = vadd.f32 %v3011_v33, %v2105_v56 }
 0xa5f   : > { %v2110_v20 = vsel %vm2109_vm14, %v3011_v33, %v2106_v43 }
 0xa60   : > { %v2115_v6 = vsel %vm2112_vm15, %v2114_v11, %v2110_v20 }
 0xa61   : > { %v2117_v15 = vperm.slane %v2115_v6, 0 }
 0xa62   : > { %v4011_v54 = vpop.f32.mrf.mxu1 }
 0xa63   : > { %v2118_v34 = vmul.f32 %v2117_v15, %v3930_v37  ;;  %v2308_v30 = vmax.f32 %v4001_v40, %v4011_v54 }
 0xa64   : > { %v2222_v60 = vpop.f32.mrf.mxu0 }
 0xa65   : > { %v2119_v13 = vadd.f32 %v2118_v34, %v3930_v37 }
 0xa67   : > { %2120 = vst [vmem:[%s4019_s24] sm:$0xf] %v2119_v13 }
 0xa6a   : > { %v4025_v45 = vpop.f32.mrf.mxu1 }
 0xa6b   : > { %v2311_v33 = vmax.f32 %v4005_v57, %v4025_v45 }
 0xa6c   : > { %v4057_v3 = vpop.f32.mrf.mxu0 }
 0xa72   : > { %v4027_v35 = vpop.f32.mrf.mxu1 }
 0xa73   : > { %v2314_v12 = vmax.f32 %v4009_v2, %v4027_v35 }
 0xa74   : > { %v2228_v4 = vpop.f32.mrf.mxu0 }
 0xa7a   : > { %v4031_v47 = vpop.f32.mrf.mxu1 }
 0xa7b   : > { %v2317_v61 = vmax.f32 %v4023_v53, %v4031_v47 }
 0xa7c   : > { %v2231_v41 = vpop.f32.mrf.mxu0 }
 0xa82   : > { %v4035_v46 = vpop.f32.mrf.mxu1 }
 0xa83   : > { %v2320_v32 = vmax.f32 %v4029_v0, %v4035_v46 }
 0xa85   : > { %2321 = vmax.xlane.f32.xlu0 %v2320_v32 }
 0xa8a   : > { %v4041_v37 = vpop.f32.mrf.mxu1 }
 0xa8b   : > { %v2323_v51 = vmax.f32 %v4033_v28, %v4041_v37 }
 0xa8d   : > { %2315 = vmax.xlane.f32.xlu0 %v2314_v12 }
 0xa92   : > { %v4047_v55 = vpop.f32.mrf.mxu1 }
 0xa93   : > { %v2326_v39 = vmax.f32 %v4039_v52, %v4047_v55 }
 0xa95   : > { %2309 = vmax.xlane.f32.xlu0 %v2308_v30 }
 0xa9a   : > { %v4051_v59 = vpop.f32.mrf.mxu1 }
 0xa9b   : > { %v2329_v18 = vmax.f32 %v4045_v1, %v4051_v59 }
 0xaa2   : > { %v4055_v10 = vpop.f32.mrf.mxu1 }
 0xaa3   : > { %v2332_v50 = vmax.f32 %v4053_v8, %v4055_v10 }
 0xaaa   : > { %v2287_v48 = vpop.f32.mrf.mxu1 }
 0xaab   : > { %v2335_v23 = vmax.f32 %v2222_v60, %v2287_v48 }
 0xab2   : > { %v4059_v49 = vpop.f32.mrf.mxu1 }
 0xab3   : > { %v2338_v14 = vmax.f32 %v4057_v3, %v4059_v49 }
 0xab5   : > { %2339 = vmax.xlane.f32.xlu1 %v2338_v14 }
 0xaba   : > { %v2293_v5 = vpop.f32.mrf.mxu1 }
 0xabb   : > { %v2341_v27 = vmax.f32 %v2228_v4, %v2293_v5 }
 0xabd   : > { %2336 = vmax.xlane.f32.xlu1 %v2335_v23  ;;  %2342 = vmax.xlane.f32.xlu2 %v2341_v27 }
 0xac2   : > { %v2296_v16 = vpop.f32.mrf.mxu1 }
 0xac3   : > { %v2344_v22 = vmax.f32 %v2231_v41, %v2296_v16 }
 0xac5   : > { %2333 = vmax.xlane.f32.xlu1 %v2332_v50 }
 0xacd   : > { %2345 = vmax.xlane.f32.xlu1 %v2344_v22 }
 0xad5   : > { %2330 = vmax.xlane.f32.xlu1 %v2329_v18 }
 0xadd   : > { %2327 = vmax.xlane.f32.xlu1 %v2326_v39 }
 0xae5   : > { %2324 = vmax.xlane.f32.xlu1 %v2323_v51 }
 0xaed   : > { %2318 = vmax.xlane.f32.xlu1 %v2317_v61 }
 0xaf5   : > { %2312 = vmax.xlane.f32.xlu1 %v2311_v33 }
 0xafd   : > { %2306 = vmax.xlane.f32.xlu1 %v2305_v58 }
 0xb05   : > { %2303 = vmax.xlane.f32.xlu1 %v2302_v21 }
 0xb0d   : > { %2300 = vmax.xlane.f32.xlu1 %v2299_v42 }
 0xb28   : > { %v2340_v56 = vpop.xlane.xlu1 %2339 }
 0xb29   : > { %v2373_v18 = vsub.f32 %v4057_v3, %v2340_v56  ;;  %v2374_v61 = vsub.f32 %v4059_v49, %v2340_v56 }
 0xb2b   : > { %v2431_v33 = vmul.f32 1.442695, %v2373_v18  ;;  %v2433_v58 = vmul.f32 1.442695, %v2374_v61 }
 0xb30   : > { %v2337_v62 = vpop.xlane.xlu1 %2336  ;;  %v2343_v43 = vpop.xlane.xlu2 %2342 }
 0xb31   : > { %v2371_v11 = vsub.f32 %v2222_v60, %v2337_v62  ;;  %v2372_v20 = vsub.f32 %v2287_v48, %v2337_v62  ;;  %v2375_v6 = vsub.f32 %v2228_v4, %v2343_v43  ;;  %v2376_v15 = vsub.f32 %v2293_v5, %v2343_v43 }
 0xb33   : > { %v2427_v34 = vmul.f32 1.442695, %v2371_v11  ;;  %v2429_v13 = vmul.f32 1.442695, %v2372_v20  ;;  %v2435_v32 = vmul.f32 1.442695, %v2375_v6 }
 0xb34   : > { %v2437_v12 = vmul.f32 1.442695, %v2376_v15 }
 0xb35   : > { %3012 = vpow2.f32 %v2427_v34 }
 0xb36   : > { %3014 = vpow2.f32 %v2429_v13 }
 0xb37   : > { %3016 = vpow2.f32 %v2435_v32 }
 0xb38   : > { %3018 = vpow2.f32 %v2437_v12  ;;  %v2334_v30 = vpop.xlane.xlu1 %2333 }
 0xb39   : > { %v2370_v49 = vsub.f32 %v4055_v10, %v2334_v30  ;;  %v2322_v10 = vpop.xlane.xlu0 %2321 }
 0xb3a   : > { %v2362_v61 = vsub.f32 %v4035_v46, %v2322_v10 }
 0xb3b   : > { %v4081_v14 = vpop.eup %3012 }
 0xb3c   : > { %v4083_v27 = vpop.eup %3014 }
 0xb3d   : > { %v4085_v23 = vpop.eup %3016  ;;  %v2479_v60 = vadd.f32 %v4083_v27, %v4081_v14 }
 0xb3e   : > { %v4089_v48 = vpop.eup %3018 }
 0xb3f   : > { %v2485_v4 = vadd.f32 %v4089_v48, %v4085_v23  ;;  %2480 = vadd.xlane.f32.xlu1 %v2479_v60 }
 0xb40   : > { %v2346_v5 = vpop.xlane.xlu1 %2345 }
 0xb41   : > { %2486 = vadd.xlane.f32.xlu0 %v2485_v4  ;;  %v2377_v50 = vsub.f32 %v2231_v41, %v2346_v5  ;;  %v2378_v22 = vsub.f32 %v2296_v16, %v2346_v5  ;;  %v2369_v41 = vsub.f32 %v4053_v8, %v2334_v30 }
 0xb43   : > { %v2439_v39 = vmul.f32 1.442695, %v2377_v50  ;;  %v2441_v51 = vmul.f32 1.442695, %v2378_v22 }
 0xb45   : > { %3020 = vpow2.f32 %v2439_v39 }
 0xb46   : > { %3022 = vpow2.f32 %v2441_v51 }
 0xb47   : > { %3024 = vpow2.f32 %v2431_v33 }
 0xb48   : > { %v2331_v21 = vpop.xlane.xlu1 %2330  ;;  %3026 = vpow2.f32 %v2433_v58  ;;  %v2316_v58 = vpop.xlane.xlu0 %2315 }
 0xb49   : > { %v2367_v42 = vsub.f32 %v4045_v1, %v2331_v21  ;;  %v2368_v62 = vsub.f32 %v4051_v59, %v2331_v21  ;;  %v2423_v1 = vmul.f32 1.442695, %v2369_v41  ;;  %v2425_v59 = vmul.f32 1.442695, %v2370_v49 }
 0xb4b   : > { %v4097_v43 = vpop.eup %3020  ;;  %v2419_v16 = vmul.f32 1.442695, %v2367_v42  ;;  %v2421_v3 = vmul.f32 1.442695, %v2368_v62 }
 0xb4c   : > { %v4100_v11 = vpop.eup %3022 }
 0xb4d   : > { %3028 = vpow2.f32 %v2419_v16  ;;  %v2488_v56 = vadd.f32 %v4100_v11, %v4097_v43  ;;  %v4105_v6 = vpop.eup %3024  ;;  %v2357_v16 = vsub.f32 %v4009_v2, %v2316_v58 }
 0xb4e   : > { %3030 = vpow2.f32 %v2421_v3  ;;  %v4107_v15 = vpop.eup %3026 }
 0xb4f   : > { %2489 = vadd.xlane.f32.xlu0 %v2488_v56  ;;  %3032 = vpow2.f32 %v2423_v1  ;;  %v2482_v12 = vadd.f32 %v4107_v15, %v4105_v6  ;;  %v2358_v1 = vsub.f32 %v4027_v35, %v2316_v58 }
 0xb50   : > { %v2328_v20 = vpop.xlane.xlu1 %2327  ;;  %3034 = vpow2.f32 %v2425_v59  ;;  %v2399_v59 = vmul.f32 1.442695, %v2357_v16  ;;  %v2310_v2 = vpop.xlane.xlu0 %2309 }
 0xb51   : > { %v2365_v34 = vsub.f32 %v4039_v52, %v2328_v20  ;;  %v2366_v32 = vsub.f32 %v4047_v55, %v2328_v20  ;;  %v2361_v55 = vsub.f32 %v4029_v0, %v2322_v10  ;;  %v2401_v20 = vmul.f32 1.442695, %v2358_v1 }
 0xb53   : > { %v4109_v8 = vpop.eup %3028  ;;  %v2415_v60 = vmul.f32 1.442695, %v2365_v34  ;;  %v2417_v4 = vmul.f32 1.442695, %v2366_v32  ;;  %v2407_v21 = vmul.f32 1.442695, %v2361_v55 }
 0xb54   : > { %v4112_v13 = vpop.eup %3030 }
 0xb55   : > { %v2473_v30 = vadd.f32 %v4112_v13, %v4109_v8  ;;  %v4119_v50 = vpop.eup %3032  ;;  %3036 = vpow2.f32 %v2415_v60  ;;  %v2353_v60 = vsub.f32 %v4001_v40, %v2310_v2 }
 0xb56   : > { %v4123_v18 = vpop.eup %3034  ;;  %3038 = vpow2.f32 %v2417_v4 }
 0xb57   : > { %2483 = vadd.xlane.f32.xlu0 %v2482_v12  ;;  %2474 = vadd.xlane.f32.xlu1 %v2473_v30  ;;  %v2476_v33 = vadd.f32 %v4123_v18, %v4119_v50  ;;  %v2391_v55 = vmul.f32 1.442695, %v2353_v60 }
 0xb58   : > { %v2325_v5 = vpop.xlane.xlu1 %2324 }
 0xb59   : > { %v2363_v52 = vsub.f32 %v4033_v28, %v2325_v5  ;;  %v2364_v22 = vsub.f32 %v4041_v37, %v2325_v5  ;;  %v2409_v28 = vmul.f32 1.442695, %v2362_v61 }
 0xb5b   : > { %v2411_v39 = vmul.f32 1.442695, %v2363_v52  ;;  %v2413_v51 = vmul.f32 1.442695, %v2364_v22  ;;  %v4129_v42 = vpop.eup %3036  ;;  %v2354_v22 = vsub.f32 %v4011_v54, %v2310_v2 }
 0xb5c   : > { %v4133_v41 = vpop.eup %3038 }
 0xb5d   : > { %3040 = vpow2.f32 %v2411_v39  ;;  %v2393_v39 = vmul.f32 1.442695, %v2354_v22 }
 0xb5e   : > { %3042 = vpow2.f32 %v2413_v51 }
 0xb5f   : > { %2477 = vadd.xlane.f32.xlu0 %v2476_v33  ;;  %3044 = vpow2.f32 %v2407_v21 }
 0xb60   : > { %v2319_v37 = vpop.xlane.xlu1 %2318  ;;  %3046 = vpow2.f32 %v2409_v28 }
 0xb61   : > { %v2359_v0 = vsub.f32 %v4023_v53, %v2319_v37  ;;  %v2360_v62 = vsub.f32 %v4031_v47, %v2319_v37  ;;  %v2470_v53 = vadd.f32 %v4133_v41, %v4129_v42 }
 0xb63   : > { %v4135_v46 = vpop.eup %3040  ;;  %v2403_v3 = vmul.f32 1.442695, %v2359_v0  ;;  %v2405_v49 = vmul.f32 1.442695, %v2360_v62 }
 0xb64   : > { %v4138_v56 = vpop.eup %3042 }
 0xb65   : > { %3048 = vpow2.f32 %v2403_v3  ;;  %v2467_v47 = vadd.f32 %v4138_v56, %v4135_v46  ;;  %v4145_v10 = vpop.eup %3044 }
 0xb66   : > { %3050 = vpow2.f32 %v2405_v49  ;;  %v4149_v12 = vpop.eup %3046 }
 0xb67   : > { %2471 = vadd.xlane.f32.xlu0 %v2470_v53  ;;  %2468 = vadd.xlane.f32.xlu1 %v2467_v47  ;;  %3052 = vpow2.f32 %v2399_v59 }
 0xb68   : > { %v2313_v34 = vpop.xlane.xlu1 %2312  ;;  %3054 = vpow2.f32 %v2401_v20 }
 0xb69   : > { %v2355_v32 = vsub.f32 %v4005_v57, %v2313_v34  ;;  %v2356_v35 = vsub.f32 %v4025_v45, %v2313_v34  ;;  %v2464_v57 = vadd.f32 %v4149_v12, %v4145_v10 }
 0xb6b   : > { %v4151_v30 = vpop.eup %3048  ;;  %v2395_v4 = vmul.f32 1.442695, %v2355_v32  ;;  %v2397_v5 = vmul.f32 1.442695, %v2356_v35 }
 0xb6c   : > { %v4154_v52 = vpop.eup %3050 }
 0xb6d   : > { %3056 = vpow2.f32 %v2395_v4  ;;  %v2461_v45 = vadd.f32 %v4154_v52, %v4151_v30  ;;  %v4161_v51 = vpop.eup %3052 }
 0xb6e   : > { %3058 = vpow2.f32 %v2397_v5  ;;  %v4165_v54 = vpop.eup %3054 }
 0xb6f   : > { %2465 = vadd.xlane.f32.xlu0 %v2464_v57  ;;  %2462 = vadd.xlane.f32.xlu1 %v2461_v45  ;;  %3060 = vpow2.f32 %v2391_v55  ;;  %v2458_v0 = vadd.f32 %v4165_v54, %v4161_v51 }
 0xb70   : > { %v2307_v40 = vpop.xlane.xlu1 %2306  ;;  %3062 = vpow2.f32 %v2393_v39 }
 0xb71   : > { %v2351_v61 = vsub.f32 %v3994_v17, %v2307_v40  ;;  %v2352_v33 = vsub.f32 %v4007_v29, %v2307_v40 }
 0xb73   : > { %v4167_v58 = vpop.eup %3056  ;;  %v2387_v21 = vmul.f32 1.442695, %v2351_v61  ;;  %v2389_v28 = vmul.f32 1.442695, %v2352_v33 }
 0xb74   : > { %v4169_v37 = vpop.eup %3058 }
 0xb75   : > { %3064 = vpow2.f32 %v2387_v21  ;;  %v2455_v62 = vadd.f32 %v4169_v37, %v4167_v58  ;;  %v4175_v29 = vpop.eup %3060 }
 0xb76   : > { %3066 = vpow2.f32 %v2389_v28  ;;  %v4179_v49 = vpop.eup %3062 }
 0xb77   : > { %2459 = vadd.xlane.f32.xlu0 %v2458_v0  ;;  %2456 = vadd.xlane.f32.xlu1 %v2455_v62  ;;  %v2452_v20 = vadd.f32 %v4179_v49, %v4175_v29 }
 0xb78   : > { %v2304_v17 = vpop.xlane.xlu1 %2303 }
 0xb79   : > { %v2349_v16 = vsub.f32 %v3988_v44, %v2304_v17  ;;  %v2350_v3 = vsub.f32 %v4003_v7, %v2304_v17 }
 0xb7b   : > { %v4181_v1 = vpop.eup %3064  ;;  %v2383_v53 = vmul.f32 1.442695, %v2349_v16  ;;  %v2385_v47 = vmul.f32 1.442695, %v2350_v3 }
 0xb7c   : > { %v4183_v59 = vpop.eup %3066 }
 0xb7d   : > { %3068 = vpow2.f32 %v2383_v53  ;;  %v2449_v2 = vadd.f32 %v4183_v59, %v4181_v1 }
 0xb7e   : > { %3070 = vpow2.f32 %v2385_v47 }
 0xb7f   : > { %2453 = vadd.xlane.f32.xlu0 %v2452_v20  ;;  %2450 = vadd.xlane.f32.xlu1 %v2449_v2 }
 0xb80   : > { %v2301_v44 = vpop.xlane.xlu1 %2300 }
 0xb81   : > { %v2347_v7 = vsub.f32 %v3983_v36, %v2301_v44  ;;  %v2348_v34 = vsub.f32 %v3999_v24, %v2301_v44 }
 0xb83   : > { %v4191_v32 = vpop.eup %3068  ;;  %v2379_v35 = vmul.f32 1.442695, %v2347_v7  ;;  %v2381_v60 = vmul.f32 1.442695, %v2348_v34 }
 0xb84   : > { %v4193_v4 = vpop.eup %3070 }
 0xb85   : > { %3072 = vpow2.f32 %v2379_v35  ;;  %v2446_v5 = vadd.f32 %v4193_v4, %v4191_v32 }
 0xb86   : > { %3074 = vpow2.f32 %v2381_v60 }
 0xb87   : > { %2447 = vadd.xlane.f32.xlu0 %v2446_v5 }
 0xb8b   : > { %v4197_v22 = vpop.eup %3072 }
 0xb8c   : > { %v4199_v57 = vpop.eup %3074 }
 0xb8d   : > { %v2443_v36 = vadd.f32 %v4199_v57, %v4197_v22 }
 0xb8f   : > { %2444 = vadd.xlane.f32.xlu1 %v2443_v36 }
 0xbb2   : > { %v2481_v39 = vpop.xlane.xlu1 %2480 }
 0xbb4   : > { %v2487_v24 = vpop.xlane.xlu0 %2486 }
 0xbc2   : > { %v2490_v45 = vpop.xlane.xlu0 %2489 }
 0xbc3   : > { %3076 = vrcp.f32 %v2490_v45 }
 0xbc4   : > { %3078 = vrcp.f32 %v2487_v24 }
 0xbc9   : > { %v3077_v55 = vpop.eup %3076 }
 0xbca   : > { %v2484_v40 = vpop.xlane.xlu0 %2483  ;;  %v2537_v61 = vmul.f32 %v3077_v55, %v4097_v43  ;;  %v2538_v33 = vmul.f32 %v3077_v55, %v4100_v11  ;;  %v3079_v21 = vpop.eup %3078 }
 0xbcb   : > { %3080 = vrcp.f32 %v2484_v40  ;;  %v2535_v28 = vmul.f32 %v3079_v21, %v4085_v23  ;;  %v2536_v0 = vmul.f32 %v3079_v21, %v4089_v48  ;;  %v2475_v17 = vpop.xlane.xlu1 %2474 }
 0xbcc   : > { %2539 = vmatpush.xpose.msra.mxu2 %v2537_v61  ;;  %2559 = vmatpush.xpose.msra.mxu3 %v2538_v33  ;;  %3082 = vrcp.f32 %v2481_v39 }
 0xbd0   : > { %2540 = vmatpush.xpose.msra.mxu2 %v2535_v28  ;;  %2560 = vmatpush.xpose.msra.mxu3 %v2536_v0 }
 0xbd1   : > { %v3081_v62 = vpop.eup %3080 }
 0xbd2   : > { %v2478_v16 = vpop.xlane.xlu0 %2477  ;;  %v2533_v3 = vmul.f32 %v3081_v62, %v4105_v6  ;;  %v2534_v43 = vmul.f32 %v3081_v62, %v4107_v15  ;;  %v3083_v53 = vpop.eup %3082 }
 0xbd3   : > { %3084 = vrcp.f32 %v2478_v16  ;;  %v2531_v11 = vmul.f32 %v3083_v53, %v4081_v14  ;;  %v2532_v23 = vmul.f32 %v3083_v53, %v4083_v27 }
 0xbd4   : > { %2541 = vmatpush.xpose.msra.mxu2 %v2533_v3  ;;  %2561 = vmatpush.xpose.msra.mxu3 %v2534_v43  ;;  %3086 = vrcp.f32 %v2475_v17 }
 0xbd8   : > { %2542 = vmatpush.xpose.msra.mxu2 %v2531_v11  ;;  %2562 = vmatpush.xpose.msra.mxu3 %v2532_v23 }
 0xbd9   : > { %v3085_v48 = vpop.eup %3084 }
 0xbda   : > { %v2472_v47 = vpop.xlane.xlu0 %2471  ;;  %v2469_v20 = vpop.xlane.xlu1 %2468  ;;  %v2529_v2 = vmul.f32 %v3085_v48, %v4119_v50  ;;  %v2530_v6 = vmul.f32 %v3085_v48, %v4123_v18 }
 0xbdb   : > { %v3087_v44 = vpop.eup %3086  ;;  %3088 = vrcp.f32 %v2472_v47 }
 0xbdc   : > { %2543 = vmatpush.xpose.msra.mxu2 %v2529_v2  ;;  %2563 = vmatpush.xpose.msra.mxu3 %v2530_v6  ;;  %3090 = vrcp.f32 %v2469_v20  ;;  %v2527_v15 = vmul.f32 %v3087_v44, %v4109_v8  ;;  %v2528_v14 = vmul.f32 %v3087_v44, %v4112_v13 }
 0xbe0   : > { %2544 = vmatpush.xpose.msra.mxu2 %v2527_v15  ;;  %2564 = vmatpush.xpose.msra.mxu3 %v2528_v14 }
 0xbe1   : > { %v3089_v27 = vpop.eup %3088 }
 0xbe2   : > { %v2466_v7 = vpop.xlane.xlu0 %2465  ;;  %v2463_v34 = vpop.xlane.xlu1 %2462  ;;  %v2525_v35 = vmul.f32 %v3089_v27, %v4129_v42  ;;  %v2526_v50 = vmul.f32 %v3089_v27, %v4133_v41 }
 0xbe3   : > { %v3091_v60 = vpop.eup %3090  ;;  %3092 = vrcp.f32 %v2466_v7 }
 0xbe4   : > { %2545 = vmatpush.xpose.msra.mxu2 %v2525_v35  ;;  %2565 = vmatpush.xpose.msra.mxu3 %v2526_v50  ;;  %3094 = vrcp.f32 %v2463_v34  ;;  %v2523_v18 = vmul.f32 %v3091_v60, %v4135_v46  ;;  %v2524_v8 = vmul.f32 %v3091_v60, %v4138_v56 }
 0xbe8   : > { %2546 = vmatpush.xpose.msra.mxu2 %v2523_v18  ;;  %2566 = vmatpush.xpose.msra.mxu3 %v2524_v8 }
 0xbe9   : > { %v3093_v13 = vpop.eup %3092 }
 0xbea   : > { %v2460_v5 = vpop.xlane.xlu0 %2459  ;;  %v2457_v36 = vpop.xlane.xlu1 %2456  ;;  %v2521_v24 = vmul.f32 %v3093_v13, %v4145_v10  ;;  %v2522_v42 = vmul.f32 %v3093_v13, %v4149_v12 }
 0xbeb   : > { %v3095_v45 = vpop.eup %3094  ;;  %3096 = vrcp.f32 %v2460_v5 }
 0xbec   : > { %2547 = vmatpush.xpose.msra.mxu2 %v2521_v24  ;;  %2567 = vmatpush.xpose.msra.mxu3 %v2522_v42  ;;  %3098 = vrcp.f32 %v2457_v36  ;;  %v2519_v41 = vmul.f32 %v3095_v45, %v4151_v30  ;;  %v2520_v46 = vmul.f32 %v3095_v45, %v4154_v52 }
 0xbf0   : > { %2548 = vmatpush.xpose.msra.mxu2 %v2519_v41  ;;  %2568 = vmatpush.xpose.msra.mxu3 %v2520_v46 }
 0xbf1   : > { %v3097_v56 = vpop.eup %3096 }
 0xbf2   : > { %v2454_v55 = vpop.xlane.xlu0 %2453  ;;  %v2451_v39 = vpop.xlane.xlu1 %2450  ;;  %v2517_v40 = vmul.f32 %v3097_v56, %v4161_v51  ;;  %v2518_v10 = vmul.f32 %v3097_v56, %v4165_v54 }
 0xbf3   : > { %v3099_v61 = vpop.eup %3098  ;;  %3100 = vrcp.f32 %v2454_v55 }
 0xbf4   : > { %2549 = vmatpush.xpose.msra.mxu2 %v2517_v40  ;;  %2569 = vmatpush.xpose.msra.mxu3 %v2518_v10  ;;  %3102 = vrcp.f32 %v2451_v39  ;;  %v2515_v12 = vmul.f32 %v3099_v61, %v4167_v58  ;;  %v2516_v30 = vmul.f32 %v3099_v61, %v4169_v37 }
 0xbf8   : > { %2550 = vmatpush.xpose.msra.mxu2 %v2515_v12  ;;  %2570 = vmatpush.xpose.msra.mxu3 %v2516_v30 }
 0xbf9   : > { %v3101_v52 = vpop.eup %3100 }
 0xbfa   : > { %v2448_v33 = vpop.xlane.xlu0 %2447  ;;  %v2513_v21 = vmul.f32 %v3101_v52, %v4175_v29  ;;  %v2514_v28 = vmul.f32 %v3101_v52, %v4179_v49  ;;  %v3103_v51 = vpop.eup %3102 }
 0xbfb   : > { %3104 = vrcp.f32 %v2448_v33  ;;  %v2511_v54 = vmul.f32 %v3103_v51, %v4181_v1  ;;  %v2512_v0 = vmul.f32 %v3103_v51, %v4183_v59 }
 0xbfc   : > { %2551 = vmatpush.xpose.msra.mxu2 %v2513_v21  ;;  %2571 = vmatpush.xpose.msra.mxu3 %v2514_v28 }
 0xc00   : > { %2552 = vmatpush.xpose.msra.mxu2 %v2511_v54  ;;  %2572 = vmatpush.xpose.msra.mxu3 %v2512_v0 }
 0xc01   : > { %v3105_v58 = vpop.eup %3104 }
 0xc02   : > { %v2445_v37 = vpop.xlane.xlu1 %2444  ;;  %v2509_v62 = vmul.f32 %v3105_v58, %v4191_v32  ;;  %v2510_v17 = vmul.f32 %v3105_v58, %v4193_v4 }
 0xc03   : > { %3106 = vrcp.f32 %v2445_v37 }
 0xc04   : > { %2553 = vmatpush.xpose.msra.mxu2 %v2509_v62  ;;  %2573 = vmatpush.xpose.msra.mxu3 %v2510_v17 }
 0xc09   : > { %v3107_v29 = vpop.eup %3106 }
 0xc0a   : > { %v2507_v49 = vmul.f32 %v3107_v29, %v4197_v22  ;;  %v2508_v16 = vmul.f32 %v3107_v29, %v4199_v57 }
 0xc0c   : > { %2554 = vmatpush.xpose.msra.mxu2 %v2507_v49  ;;  %2574 = vmatpush.xpose.msra.mxu3 %v2508_v16 }
 0xc0f   : > { %2555 = vmatmul.f32.vlgmr.msra.gmra.mxu2 %v3515_v31  ;;  %2575 = vmatmul.f32.vlgmr.msra.gmra.mxu3 %v3513_v25 }
 0xc92   : > { %v2556_v1 = vpop.f32.mrf.mxu2  ;;  %v2576_v59 = vpop.f32.mrf.mxu3 }
 0xc93   : > { %v2577_v32 = vadd.f32 %v2576_v59, %v2556_v1 }
 0xc95   : > { %v2579_v4 = vmul.f32 %v2577_v32, %v2035_v19 }
 0xc97   : > { %v2580_v3 = vadd.f32 %v2579_v4, %v3513_v25 }
 0xc99   : > { %2849 = vmatpush.msk.msrb.mxu2 %vm495_vm0, %v2580_v3 }
 0xc9a   : > { %2850 = vmatmul.msk.f32.vlgmr.msrb.gmra.mxu2 %vm1570_vm5, %v3935_v9 }
 0xd1d   : > { %v2601_v22 = vpop.f32.mrf.mxu2 }
 0xd1e   : > { %v2602_v57 = vadd.f32 %v2601_v22, %v3946_v26 }
 0xd20   : > { %v2604_v43 = vmax.f32 %v2602_v57, 0.0 }
 0xd22   : > { %2851 = vmatpush.msk.msrb.mxu3 %vm2074_vm6, %v2604_v43 }
 0xd23   : > { %2852 = vmatmul.msk.f32.vlgmr.msrb.gmra.mxu3 %vm553_vm8, %v3953_v63 }
 0xda6   : > { %v2625_v31 = vpop.f32.mrf.mxu3 }
 0xda7   : > { %v2626_v53 = vadd.f32 %v2625_v31, %v2070_v38 }
 0xda9   : > { %v2853_v19 = vmul.f32 -1.442695, %v2626_v53 }
 0xdab   : > { %3108 = vpow2.f32 %v2853_v19 }
 0xdb1   : > { %v3109_v25 = vpop.eup %3108 }
 0xdb2   : > { %v2631_v11 = vadd.f32 1.0, %v3109_v25 }
 0xdb4   : > { %3110 = vrcp.f32 %v2631_v11  ;;  %v2643_v47 = vand.u32 2147483648, %v2631_v11  ;;  %v2641_v20 = vand.u32 2147483647, %v2631_v11  ;;  %vm2637_vm1 = vweird.f32 %v2631_v11 }
 0xdb6   : > { %v2644_v63 = vor.u32 1.1754944e-38, %v2643_v47  ;;  %vm2642_vm8 = vcmp.eq.f32.partialorder %v2641_v20, 8.507059e+37 }
 0xdba   : > { %v3111_v23 = vpop.eup %3110 }
 0xdbb   : > { %v2633_v48 = vmul.f32 %v3111_v23, %v2631_v11  ;;  %vm2638_vm0 = vweird.f32 %v3111_v23 }
 0xdbc   : > { %vm2639_vm2 = vmor %vm2637_vm1, %vm2638_vm0 }
 0xdbd   : > { %v2634_v9 = vsub.f32 1.0, %v2633_v48 }
 0xdbf   : > { %v2635_v26 = vmul.f32 %v3111_v23, %v2634_v9 }
 0xdc1   : > { %v2636_v2 = vadd.f32 %v3111_v23, %v2635_v26 }
 0xdc3   : > { %v2640_v6 = vsel %vm2639_vm2, %v3111_v23, %v2636_v2 }
 0xdc4   : > { %v2645_v38 = vsel %vm2642_vm8, %v2644_v63, %v2640_v6 }
 0xdc5   : > { %v2647_v44 = vperm.slane %v2645_v38, 0 }
 0xdc7   : > { %v2648_v15 = vmul.f32 %v2647_v44, %v2580_v3 }
 0xdc9   : > { %v2649_v14 = vadd.f32 %v2648_v15, %v2580_v3 }
 0xdcb   : > { %2650 = vst [vmem:[%s4019_s24 + $0x4] sm:$0xf] %v2649_v14 }
 0xdcc PF: > { %s25_s25 = sadd.s32 1, %s3137_s25  }
 0xdcd   : > { %p22_p7 = scmp.ge.s32.totalorder %s25_s25, 4  }
 0xdcf   :  { %24 = sbr.rel (!%p22_p7) target bundleno = 1 (0x1), region = 152 }
 0xdd4   :  { %2686 = vsyncpa [#allocation5], 1 }
 0xdd5   :  { %2688 = vsyncpa [#allocation5 + $0x1], 1 }

</bundles_post_ra>
